<compile_context>
chip_gen: v7x
topology: tpu7x:2x2x1
jax: 0.10.0
libtpu: 0.0.40
codegen_flags: <defaults>
</compile_context>

<pallas_src>
import jax
import jax.numpy as jnp
from jax import lax
from jax.experimental import pallas as pl
from jax.experimental.pallas import tpu as pltpu


LANE = 128        # TPU lane width: feature / patch axes are zero-padded to this
BN_EPS = 1e-5     # torch BatchNorm default eps
NRM_EPS = 1e-12   # F.normalize default eps


def _pad_to(x, rows, cols):
    r, c = x.shape
    return jnp.pad(x, ((0, rows - r), (0, cols - c)))


def _im2col(x, height, width, c_in):
    """(B, H, W, C) -> lane-dense (B*H*W, 128) bf16 patch matrix for a 3x3, pad=1 conv."""
    b = x.shape[0]
    xp = jnp.pad(x, ((0, 0), (1, 1), (1, 1), (0, 0)))
    taps = [xp[:, kh:kh + height, kw:kw + width, :]
            for kh in range(3) for kw in range(3)]            # 9 x (B,H,W,C)
    cols = jnp.stack(taps, axis=3)                            # (B,H,W,9,C)
    cols = cols.reshape(b * height * width, 9 * c_in)
    cols = jnp.pad(cols, ((0, 0), (0, LANE - 9 * c_in)))
    return cols.astype(jnp.bfloat16)


def make_simclr_forward(n_per_view, height, width, c_in, feat, hid, out, img_tile=None):
    """Build (forward, init_params) for the SimCLR forward pass."""
    assert out == LANE, "reference module fixes out_dim=128"
    assert feat <= LANE and hid <= LANE
    assert 9 * c_in <= LANE, "im2col patch width must fit in one 128-lane vreg row"

    two_n = 2 * n_per_view
    hw = height * width
    assert hw % 8 == 0

    # images per grid step: single step at small shapes (review: no resident-output
    # epilogue needed); chunk with img_tile at scale (keep >= 512 rows/step and raise
    # vmem_limit_bytes in CompilerParams if the bf16 patch block grows large).
    bt = two_n if (img_tile is None or two_n % img_tile != 0) else img_tile
    n_steps = two_n // bt
    rows = bt * hw                                            # conv rows per grid step

    # ------------------------------------------------------------ backbone kernel
    def backbone_kernel(xcol_ref, cw_ref, csh_ref, h_ref):
        w = cw_ref[...]                                       # (128,128) bf16, BN folded
        shift = csh_ref[...]                                  # (1,128) f32
        inv_hw = jnp.float32(1.0 / hw)

        def body(i, carry):
            r0 = pl.multiple_of(i * hw, hw)                   # per-image slab of hw rows
            patch = xcol_ref[pl.ds(r0, hw), :]                # (hw,128) bf16, lane-dense
            y = jnp.dot(patch, w, preferred_element_type=jnp.float32)
            y = jnp.maximum(y + shift, 0.0)                   # conv bias + BN2d + ReLU
            h_ref[pl.ds(i, 1), :] = jnp.sum(y, axis=0, keepdims=True) * inv_hw
            return carry

        lax.fori_loop(0, bt, body, 0, unroll=True)

    backbone_cost = pl.CostEstimate(
        flops=2 * two_n * hw * LANE * LANE + 3 * two_n * hw * LANE,
        transcendentals=0,
        bytes_accessed=(two_n * hw * LANE * 2            # bf16 patch matrix
                        + LANE * LANE * 2 + LANE * 4     # weights + shift
                        + two_n * LANE * 4),             # pooled features
    )

    backbone = pl.pallas_call(
        backbone_kernel,
        grid=(n_steps,),
        in_specs=[
            pl.BlockSpec((rows, LANE), lambda i: (i, 0)),     # im2col patch block
            pl.BlockSpec((LANE, LANE), lambda i: (0, 0)),     # conv weight (BN folded)
            pl.BlockSpec((1, LANE), lambda i: (0, 0)),        # conv/BN shift
        ],
        out_specs=pl.BlockSpec((bt, LANE), lambda i: (i, 0)), # per-step h block
        out_shape=jax.ShapeDtypeStruct((two_n, LANE), jnp.float32),
        compiler_params=pltpu.CompilerParams(
            dimension_semantics=("parallel",),                # independent image tiles
        ),
        cost_estimate=backbone_cost,
    )

    # ------------------------------------------------------ projection-head kernel
    def head_kernel(h_ref, w1_ref, b1_ref, g1_ref, be1_ref,
                    w2_ref, b2_ref, g2_ref, be2_ref, z_ref):
        hfull = h_ref[...].astype(jnp.bfloat16)               # (2N,128)
        # Linear 1
        y1 = jnp.dot(hfull, w1_ref[...],
                     preferred_element_type=jnp.float32) + b1_ref[...]
        # BatchNorm1d (training-mode biased batch stats), PER VIEW.
        y1 = y1.reshape(2, n_per_view, LANE)
        mu1 = jnp.mean(y1, axis=1, keepdims=True)
        var1 = jnp.mean(jnp.square(y1 - mu1), axis=1, keepdims=True)
        y1 = (y1 - mu1) * lax.rsqrt(var1 + BN_EPS) * g1_ref[...] + be1_ref[...]
        y1 = jnp.maximum(y1, 0.0).reshape(two_n, LANE)        # ReLU
        # Linear 2
        y2 = jnp.dot(y1.astype(jnp.bfloat16), w2_ref[...],
                     preferred_element_type=jnp.float32) + b2_ref[...]
        y2 = y2.reshape(2, n_per_view, out)
        mu2 = jnp.mean(y2, axis=1, keepdims=True)
        var2 = jnp.mean(jnp.square(y2 - mu2), axis=1, keepdims=True)
        y2 = (y2 - mu2) * lax.rsqrt(var2 + BN_EPS) * g2_ref[...] + be2_ref[...]
        y2 = y2.reshape(two_n, out)
        # F.normalize(dim=1): x / max(||x||, eps) == x * rsqrt(max(||x||^2, eps^2))
        sq = jnp.sum(y2 * y2, axis=1, keepdims=True)
        z_ref[...] = y2 * lax.rsqrt(jnp.maximum(sq, NRM_EPS * NRM_EPS))

    vec = pl.BlockSpec((1, LANE), lambda i: (0, 0))
    head = pl.pallas_call(
        head_kernel,
        grid=(1,),
        in_specs=[
            pl.BlockSpec((two_n, LANE), lambda i: (0, 0)),    # h (lane-padded)
            pl.BlockSpec((LANE, LANE), lambda i: (0, 0)),     # w1
            vec, vec, vec,                                    # b1, g1, be1
            pl.BlockSpec((LANE, out), lambda i: (0, 0)),      # w2
            pl.BlockSpec((1, out), lambda i: (0, 0)),         # b2
            pl.BlockSpec((1, out), lambda i: (0, 0)),         # g2
            pl.BlockSpec((1, out), lambda i: (0, 0)),         # be2
        ],
        out_specs=pl.BlockSpec((two_n, out), lambda i: (0, 0)),
        out_shape=jax.ShapeDtypeStruct((two_n, out), jnp.float32),
        cost_estimate=pl.CostEstimate(
            flops=4 * two_n * LANE * LANE,
            transcendentals=5 * two_n,
            bytes_accessed=2 * two_n * LANE * 4 + 2 * LANE * LANE * 2,
        ),
    )

    # ------------------------------------------------------------------ wrapper
    @jax.jit
    def forward(x1, x2, params):
        """Reproduces SimCLR.forward(x1, x2) -> (h1, h2, z1, z2). x*: (N, H, W, C)."""
        x = jnp.concatenate([x1, x2], axis=0)                 # (2N, H, W, C)
        xcol = _im2col(x, height, width, c_in)                # (2N*H*W, 128) bf16
        h_pad = backbone(xcol, params["cw"], params["cshift"])
        z = head(h_pad, params["w1"], params["b1"], params["g1"], params["be1"],
                 params["w2"], params["b2"], params["g2"], params["be2"])
        h1 = h_pad[:n_per_view, :feat]
        h2 = h_pad[n_per_view:, :feat]
        return h1, h2, z[:n_per_view], z[n_per_view:]

    # ------------------------------------------------------------------ params
    def init_params(key):
        ks = jax.random.split(key, 10)
        # synthetic backbone: Conv2d(C, feat, 3, pad=1) + BatchNorm2d(feat) (eval, frozen)
        conv_w = 0.1 * jax.random.normal(ks[0], (3, 3, c_in, feat), jnp.float32)
        conv_b = 0.1 * jax.random.normal(ks[1], (feat,), jnp.float32)
        gamma = 1.0 + 0.1 * jax.random.normal(ks[2], (feat,), jnp.float32)
        beta = 0.1 * jax.random.normal(ks[3], (feat,), jnp.float32)
        r_mean = 0.1 * jax.random.normal(ks[4], (feat,), jnp.float32)
        r_var = jax.random.uniform(ks[5], (feat,), jnp.float32, 0.5, 1.5)
        scale = gamma / jnp.sqrt(r_var + BN_EPS)              # eval-mode BN2d is affine
        shift = beta - r_mean * scale
        # fold BN scale into conv weight, conv bias into shift (identical in eval mode);
        # pack for one im2col matmul: row index = (kh*3+kw)*c_in + c  (matches _im2col).
        cw = (conv_w * scale).reshape(9 * c_in, feat)
        cshift = (conv_b * scale + shift).reshape(1, feat)
        cw = _pad_to(cw, LANE, LANE).astype(jnp.bfloat16)
        cshift = _pad_to(cshift, 1, LANE)

        # projection head: Linear(feat,hid) -> BN1d -> ReLU -> Linear(hid,out) -> BN1d
        # NOTE: padded gamma/beta lanes MUST stay exactly zero so BN of the padded lanes
        # stays zero (zero-pad below guarantees it).
        w1 = 0.1 * jax.random.normal(ks[6], (feat, hid), jnp.float32)
        b1 = 0.1 * jax.random.normal(ks[7], (1, hid), jnp.float32)
        g1 = jnp.ones((1, hid), jnp.float32)                  # BatchNorm1d default init
        be1 = jnp.zeros((1, hid), jnp.float32)
        w2 = 0.1 * jax.random.normal(ks[8], (hid, out), jnp.float32)
        b2 = 0.1 * jax.random.normal(ks[9], (1, out), jnp.float32)
        g2 = jnp.ones((1, out), jnp.float32)
        be2 = jnp.zeros((1, out), jnp.float32)
        return dict(
            cw=cw, cshift=cshift,
            w1=_pad_to(w1, LANE, LANE).astype(jnp.bfloat16),
            b1=_pad_to(b1, 1, LANE), g1=_pad_to(g1, 1, LANE), be1=_pad_to(be1, 1, LANE),
            w2=_pad_to(w2, LANE, out).astype(jnp.bfloat16),
            b2=b2, g2=g2, be2=be2,
        )

    return forward, init_params


def reference_forward(x1, x2, params, *, n_per_view, height, width, c_in, feat):
    """Pure-JAX reference (same bf16 matmul casts) for correctness checking."""
    two_n = 2 * n_per_view
    hw = height * width
    x = jnp.concatenate([x1, x2], axis=0)
    xcol = _im2col(x, height, width, c_in)
    y = jnp.dot(xcol, params["cw"], preferred_element_type=jnp.float32)
    y = jnp.maximum(y + params["cshift"], 0.0)
    h = jnp.mean(y.reshape(two_n, hw, LANE), axis=1)

    def bn(yv, g, be):
        yv = yv.reshape(2, n_per_view, -1)
        mu = jnp.mean(yv, axis=1, keepdims=True)
        var = jnp.mean(jnp.square(yv - mu), axis=1, keepdims=True)
        return ((yv - mu) * lax.rsqrt(var + BN_EPS) * g + be).reshape(two_n, -1)

    y1 = jnp.dot(h.astype(jnp.bfloat16), params["w1"],
                 preferred_element_type=jnp.float32) + params["b1"]
    y1 = jnp.maximum(bn(y1, params["g1"], params["be1"]), 0.0)
    y2 = jnp.dot(y1.astype(jnp.bfloat16), params["w2"],
                 preferred_element_type=jnp.float32) + params["b2"]
    y2 = bn(y2, params["g2"], params["be2"])
    sq = jnp.sum(y2 * y2, axis=1, keepdims=True)
    z = y2 * lax.rsqrt(jnp.maximum(sq, NRM_EPS * NRM_EPS))
    return (h[:n_per_view, :feat], h[n_per_view:, :feat],
            z[:n_per_view], z[n_per_view:])


if __name__ == "__main__":
    N, H, W, C = 8, 16, 16, 4          # small synthetic shapes (NHWC)
    FEAT, HID, OUT = 64, 32, 128       # feature_dim, projection_dim (-> hidden), out_dim=128

    forward, init_params = make_simclr_forward(N, H, W, C, FEAT, HID, OUT)

    key = jax.random.PRNGKey(0)
    k_x1, k_x2, k_p = jax.random.split(key, 3)
    # two augmented "views" (a torch NCHW tensor would be transposed to NHWC here)
    x1 = jax.random.normal(k_x1, (N, H, W, C), jnp.float32)
    x2 = jax.random.normal(k_x2, (N, H, W, C), jnp.float32)
    params = init_params(k_p)

    h1, h2, z1, z2 = forward(x1, x2, params)
    jax.block_until_ready((h1, h2, z1, z2))

    assert h1.shape == (N, FEAT) and h2.shape == (N, FEAT)
    assert z1.shape == (N, OUT) and z2.shape == (N, OUT)
    # z rows are L2-normalized
    assert bool(jnp.allclose(jnp.sum(z1 * z1, axis=1), 1.0, atol=1e-3))
    assert bool(jnp.allclose(jnp.sum(z2 * z2, axis=1), 1.0, atol=1e-3))

    # pure-JAX reference check (same bf16 matmul precision; loose tolerance for
    # MXU-vs-XLA reduction-order differences)
    rh1, rh2, rz1, rz2 = reference_forward(
        x1, x2, params, n_per_view=N, height=H, width=W, c_in=C, feat=FEAT)
    assert bool(jnp.allclose(h1, rh1, atol=5e-3, rtol=5e-3))
    assert bool(jnp.allclose(h2, rh2, atol=5e-3, rtol=5e-3))
    assert bool(jnp.allclose(z1, rz1, atol=5e-3, rtol=5e-3))
    assert bool(jnp.allclose(z2, rz2, atol=5e-3, rtol=5e-3))

    print("KERNEL_OK")
</pallas_src>

<mosaic_0001>
module attributes {stable_mosaic.version = 11 : i64} {
  func.func @backbone_kernel(%arg0: i32, %arg1: memref<4096x128xbf16, #tpu.memory_space<vmem>>, %arg2: memref<128x128xbf16, #tpu.memory_space<vmem>>, %arg3: memref<1x128xf32, #tpu.memory_space<vmem>>, %arg4: memref<16x128xf32, #tpu.memory_space<vmem>>) attributes {dimension_semantics = [#tpu.dimension_semantics<parallel>], iteration_bounds = array<i64: 1>, scalar_prefetch = 0 : i64, scratch_operands = 0 : i64, tpu.core_type = #tpu.core_type<tc>, window_params = [{transform_indices = @transform_0, window_bounds = array<i64: 4096, 128>}, {pipeline_mode = #tpu.pipeline_mode<synchronous>, transform_indices = @transform_1, window_bounds = array<i64: 128, 128>}, {pipeline_mode = #tpu.pipeline_mode<synchronous>, transform_indices = @transform_2, window_bounds = array<i64: 1, 128>}, {transform_indices = @transform_3, window_bounds = array<i64: 16, 128>}]} {
    %c0 = arith.constant 0 : index
    %c0_0 = arith.constant 0 : index
    %0 = vector.load %arg2[%c0, %c0_0] : memref<128x128xbf16, #tpu.memory_space<vmem>>, vector<128x128xbf16>
    %c0_1 = arith.constant 0 : index
    %c0_2 = arith.constant 0 : index
    %1 = vector.load %arg3[%c0_1, %c0_2] : memref<1x128xf32, #tpu.memory_space<vmem>>, vector<1x128xf32>
    %cst = arith.constant 3.906250e-03 : f32
    %c0_i32 = arith.constant 0 : i32
    %c256_i32 = arith.constant 256 : i32
    %2 = arith.muli %c0_i32, %c256_i32 : i32
    %3 = tpu.assume_multiple %2, 256 : i32
    %4 = arith.index_cast %3 : i32 to index
    %c0_3 = arith.constant 0 : index
    %5 = vector.load %arg1[%4, %c0_3] : memref<4096x128xbf16, #tpu.memory_space<vmem>>, vector<256x128xbf16>
    %cst_4 = arith.constant dense<0.000000e+00> : vector<256x128xf32>
    %6 = tpu.matmul %5, %0, %cst_4 {dimension_numbers = #tpu.dot_dimension_numbers<[1], [0], [0], [1], [0, 0, 1, 1], [], []>} : vector<256x128xbf16>, vector<128x128xbf16>, vector<256x128xf32> -> vector<256x128xf32>
    %7 = vector.broadcast %1 : vector<1x128xf32> to vector<256x128xf32>
    %8 = arith.addf %6, %7 : vector<256x128xf32>
    %cst_5 = arith.constant 0.000000e+00 : f32
    %9 = vector.broadcast %cst_5 : f32 to vector<256x128xf32>
    %10 = arith.maximumf %8, %9 : vector<256x128xf32>
    %cst_6 = arith.constant dense<0.000000e+00> : vector<128xf32>
    %11 = vector.multi_reduction <add>, %10, %cst_6 [0] : vector<256x128xf32> to vector<128xf32>
    %12 = vector.shape_cast %11 : vector<128xf32> to vector<1x128xf32>
    %13 = vector.broadcast %cst : f32 to vector<1x128xf32>
    %14 = arith.mulf %12, %13 : vector<1x128xf32>
    %15 = arith.index_cast %c0_i32 : i32 to index
    %c0_7 = arith.constant 0 : index
    %16 = vector.load %arg4[%15, %c0_7] : memref<16x128xf32, #tpu.memory_space<vmem>>, vector<1x128xf32>
    tpu.vector_store %arg4[%15, %c0_7], %14 {strides = array<i32>} : memref<16x128xf32, #tpu.memory_space<vmem>>, vector<1x128xf32>,
    %c1_i32 = arith.constant 1 : i32
    %c256_i32_8 = arith.constant 256 : i32
    %17 = arith.muli %c1_i32, %c256_i32_8 : i32
    %18 = tpu.assume_multiple %17, 256 : i32
    %19 = arith.index_cast %18 : i32 to index
    %c0_9 = arith.constant 0 : index
    %20 = vector.load %arg1[%19, %c0_9] : memref<4096x128xbf16, #tpu.memory_space<vmem>>, vector<256x128xbf16>
    %cst_10 = arith.constant dense<0.000000e+00> : vector<256x128xf32>
    %21 = tpu.matmul %20, %0, %cst_10 {dimension_numbers = #tpu.dot_dimension_numbers<[1], [0], [0], [1], [0, 0, 1, 1], [], []>} : vector<256x128xbf16>, vector<128x128xbf16>, vector<256x128xf32> -> vector<256x128xf32>
    %22 = vector.broadcast %1 : vector<1x128xf32> to vector<256x128xf32>
    %23 = arith.addf %21, %22 : vector<256x128xf32>
    %cst_11 = arith.constant 0.000000e+00 : f32
    %24 = vector.broadcast %cst_11 : f32 to vector<256x128xf32>
    %25 = arith.maximumf %23, %24 : vector<256x128xf32>
    %cst_12 = arith.constant dense<0.000000e+00> : vector<128xf32>
    %26 = vector.multi_reduction <add>, %25, %cst_12 [0] : vector<256x128xf32> to vector<128xf32>
    %27 = vector.shape_cast %26 : vector<128xf32> to vector<1x128xf32>
    %28 = vector.broadcast %cst : f32 to vector<1x128xf32>
    %29 = arith.mulf %27, %28 : vector<1x128xf32>
    %30 = arith.index_cast %c1_i32 : i32 to index
    %c0_13 = arith.constant 0 : index
    %31 = vector.load %arg4[%30, %c0_13] : memref<16x128xf32, #tpu.memory_space<vmem>>, vector<1x128xf32>
    tpu.vector_store %arg4[%30, %c0_13], %29 {strides = array<i32>} : memref<16x128xf32, #tpu.memory_space<vmem>>, vector<1x128xf32>,
    %c2_i32 = arith.constant 2 : i32
    %c256_i32_14 = arith.constant 256 : i32
    %32 = arith.muli %c2_i32, %c256_i32_14 : i32
    %33 = tpu.assume_multiple %32, 256 : i32
    %34 = arith.index_cast %33 : i32 to index
    %c0_15 = arith.constant 0 : index
    %35 = vector.load %arg1[%34, %c0_15] : memref<4096x128xbf16, #tpu.memory_space<vmem>>, vector<256x128xbf16>
    %cst_16 = arith.constant dense<0.000000e+00> : vector<256x128xf32>
    %36 = tpu.matmul %35, %0, %cst_16 {dimension_numbers = #tpu.dot_dimension_numbers<[1], [0], [0], [1], [0, 0, 1, 1], [], []>} : vector<256x128xbf16>, vector<128x128xbf16>, vector<256x128xf32> -> vector<256x128xf32>
    %37 = vector.broadcast %1 : vector<1x128xf32> to vector<256x128xf32>
    %38 = arith.addf %36, %37 : vector<256x128xf32>
    %cst_17 = arith.constant 0.000000e+00 : f32
    %39 = vector.broadcast %cst_17 : f32 to vector<256x128xf32>
    %40 = arith.maximumf %38, %39 : vector<256x128xf32>
    %cst_18 = arith.constant dense<0.000000e+00> : vector<128xf32>
    %41 = vector.multi_reduction <add>, %40, %cst_18 [0] : vector<256x128xf32> to vector<128xf32>
    %42 = vector.shape_cast %41 : vector<128xf32> to vector<1x128xf32>
    %43 = vector.broadcast %cst : f32 to vector<1x128xf32>
    %44 = arith.mulf %42, %43 : vector<1x128xf32>
    %45 = arith.index_cast %c2_i32 : i32 to index
    %c0_19 = arith.constant 0 : index
    %46 = vector.load %arg4[%45, %c0_19] : memref<16x128xf32, #tpu.memory_space<vmem>>, vector<1x128xf32>
    tpu.vector_store %arg4[%45, %c0_19], %44 {strides = array<i32>} : memref<16x128xf32, #tpu.memory_space<vmem>>, vector<1x128xf32>,
    %c3_i32 = arith.constant 3 : i32
    %c256_i32_20 = arith.constant 256 : i32
    %47 = arith.muli %c3_i32, %c256_i32_20 : i32
    %48 = tpu.assume_multiple %47, 256 : i32
    %49 = arith.index_cast %48 : i32 to index
    %c0_21 = arith.constant 0 : index
    %50 = vector.load %arg1[%49, %c0_21] : memref<4096x128xbf16, #tpu.memory_space<vmem>>, vector<256x128xbf16>
    %cst_22 = arith.constant dense<0.000000e+00> : vector<256x128xf32>
    %51 = tpu.matmul %50, %0, %cst_22 {dimension_numbers = #tpu.dot_dimension_numbers<[1], [0], [0], [1], [0, 0, 1, 1], [], []>} : vector<256x128xbf16>, vector<128x128xbf16>, vector<256x128xf32> -> vector<256x128xf32>
    %52 = vector.broadcast %1 : vector<1x128xf32> to vector<256x128xf32>
    %53 = arith.addf %51, %52 : vector<256x128xf32>
    %cst_23 = arith.constant 0.000000e+00 : f32
    %54 = vector.broadcast %cst_23 : f32 to vector<256x128xf32>
    %55 = arith.maximumf %53, %54 : vector<256x128xf32>
    %cst_24 = arith.constant dense<0.000000e+00> : vector<128xf32>
    %56 = vector.multi_reduction <add>, %55, %cst_24 [0] : vector<256x128xf32> to vector<128xf32>
    %57 = vector.shape_cast %56 : vector<128xf32> to vector<1x128xf32>
    %58 = vector.broadcast %cst : f32 to vector<1x128xf32>
    %59 = arith.mulf %57, %58 : vector<1x128xf32>
    %60 = arith.index_cast %c3_i32 : i32 to index
    %c0_25 = arith.constant 0 : index
    %61 = vector.load %arg4[%60, %c0_25] : memref<16x128xf32, #tpu.memory_space<vmem>>, vector<1x128xf32>
    tpu.vector_store %arg4[%60, %c0_25], %59 {strides = array<i32>} : memref<16x128xf32, #tpu.memory_space<vmem>>, vector<1x128xf32>,
    %c4_i32 = arith.constant 4 : i32
    %c256_i32_26 = arith.constant 256 : i32
    %62 = arith.muli %c4_i32, %c256_i32_26 : i32
    %63 = tpu.assume_multiple %62, 256 : i32
    %64 = arith.index_cast %63 : i32 to index
    %c0_27 = arith.constant 0 : index
    %65 = vector.load %arg1[%64, %c0_27] : memref<4096x128xbf16, #tpu.memory_space<vmem>>, vector<256x128xbf16>
    %cst_28 = arith.constant dense<0.000000e+00> : vector<256x128xf32>
    %66 = tpu.matmul %65, %0, %cst_28 {dimension_numbers = #tpu.dot_dimension_numbers<[1], [0], [0], [1], [0, 0, 1, 1], [], []>} : vector<256x128xbf16>, vector<128x128xbf16>, vector<256x128xf32> -> vector<256x128xf32>
    %67 = vector.broadcast %1 : vector<1x128xf32> to vector<256x128xf32>
    %68 = arith.addf %66, %67 : vector<256x128xf32>
    %cst_29 = arith.constant 0.000000e+00 : f32
    %69 = vector.broadcast %cst_29 : f32 to vector<256x128xf32>
    %70 = arith.maximumf %68, %69 : vector<256x128xf32>
    %cst_30 = arith.constant dense<0.000000e+00> : vector<128xf32>
    %71 = vector.multi_reduction <add>, %70, %cst_30 [0] : vector<256x128xf32> to vector<128xf32>
    %72 = vector.shape_cast %71 : vector<128xf32> to vector<1x128xf32>
    %73 = vector.broadcast %cst : f32 to vector<1x128xf32>
    %74 = arith.mulf %72, %73 : vector<1x128xf32>
    %75 = arith.index_cast %c4_i32 : i32 to index
    %c0_31 = arith.constant 0 : index
    %76 = vector.load %arg4[%75, %c0_31] : memref<16x128xf32, #tpu.memory_space<vmem>>, vector<1x128xf32>
    tpu.vector_store %arg4[%75, %c0_31], %74 {strides = array<i32>} : memref<16x128xf32, #tpu.memory_space<vmem>>, vector<1x128xf32>,
    %c5_i32 = arith.constant 5 : i32
    %c256_i32_32 = arith.constant 256 : i32
    %77 = arith.muli %c5_i32, %c256_i32_32 : i32
    %78 = tpu.assume_multiple %77, 256 : i32
    %79 = arith.index_cast %78 : i32 to index
    %c0_33 = arith.constant 0 : index
    %80 = vector.load %arg1[%79, %c0_33] : memref<4096x128xbf16, #tpu.memory_space<vmem>>, vector<256x128xbf16>
    %cst_34 = arith.constant dense<0.000000e+00> : vector<256x128xf32>
    %81 = tpu.matmul %80, %0, %cst_34 {dimension_numbers = #tpu.dot_dimension_numbers<[1], [0], [0], [1], [0, 0, 1, 1], [], []>} : vector<256x128xbf16>, vector<128x128xbf16>, vector<256x128xf32> -> vector<256x128xf32>
    %82 = vector.broadcast %1 : vector<1x128xf32> to vector<256x128xf32>
    %83 = arith.addf %81, %82 : vector<256x128xf32>
    %cst_35 = arith.constant 0.000000e+00 : f32
    %84 = vector.broadcast %cst_35 : f32 to vector<256x128xf32>
    %85 = arith.maximumf %83, %84 : vector<256x128xf32>
    %cst_36 = arith.constant dense<0.000000e+00> : vector<128xf32>
    %86 = vector.multi_reduction <add>, %85, %cst_36 [0] : vector<256x128xf32> to vector<128xf32>
    %87 = vector.shape_cast %86 : vector<128xf32> to vector<1x128xf32>
    %88 = vector.broadcast %cst : f32 to vector<1x128xf32>
    %89 = arith.mulf %87, %88 : vector<1x128xf32>
    %90 = arith.index_cast %c5_i32 : i32 to index
    %c0_37 = arith.constant 0 : index
    %91 = vector.load %arg4[%90, %c0_37] : memref<16x128xf32, #tpu.memory_space<vmem>>, vector<1x128xf32>
    tpu.vector_store %arg4[%90, %c0_37], %89 {strides = array<i32>} : memref<16x128xf32, #tpu.memory_space<vmem>>, vector<1x128xf32>,
    %c6_i32 = arith.constant 6 : i32
    %c256_i32_38 = arith.constant 256 : i32
    %92 = arith.muli %c6_i32, %c256_i32_38 : i32
    %93 = tpu.assume_multiple %92, 256 : i32
    %94 = arith.index_cast %93 : i32 to index
    %c0_39 = arith.constant 0 : index
    %95 = vector.load %arg1[%94, %c0_39] : memref<4096x128xbf16, #tpu.memory_space<vmem>>, vector<256x128xbf16>
    %cst_40 = arith.constant dense<0.000000e+00> : vector<256x128xf32>
    %96 = tpu.matmul %95, %0, %cst_40 {dimension_numbers = #tpu.dot_dimension_numbers<[1], [0], [0], [1], [0, 0, 1, 1], [], []>} : vector<256x128xbf16>, vector<128x128xbf16>, vector<256x128xf32> -> vector<256x128xf32>
    %97 = vector.broadcast %1 : vector<1x128xf32> to vector<256x128xf32>
    %98 = arith.addf %96, %97 : vector<256x128xf32>
    %cst_41 = arith.constant 0.000000e+00 : f32
    %99 = vector.broadcast %cst_41 : f32 to vector<256x128xf32>
    %100 = arith.maximumf %98, %99 : vector<256x128xf32>
    %cst_42 = arith.constant dense<0.000000e+00> : vector<128xf32>
    %101 = vector.multi_reduction <add>, %100, %cst_42 [0] : vector<256x128xf32> to vector<128xf32>
    %102 = vector.shape_cast %101 : vector<128xf32> to vector<1x128xf32>
    %103 = vector.broadcast %cst : f32 to vector<1x128xf32>
    %104 = arith.mulf %102, %103 : vector<1x128xf32>
    %105 = arith.index_cast %c6_i32 : i32 to index
    %c0_43 = arith.constant 0 : index
    %106 = vector.load %arg4[%105, %c0_43] : memref<16x128xf32, #tpu.memory_space<vmem>>, vector<1x128xf32>
    tpu.vector_store %arg4[%105, %c0_43], %104 {strides = array<i32>} : memref<16x128xf32, #tpu.memory_space<vmem>>, vector<1x128xf32>,
    %c7_i32 = arith.constant 7 : i32
    %c256_i32_44 = arith.constant 256 : i32
    %107 = arith.muli %c7_i32, %c256_i32_44 : i32
    %108 = tpu.assume_multiple %107, 256 : i32
    %109 = arith.index_cast %108 : i32 to index
    %c0_45 = arith.constant 0 : index
    %110 = vector.load %arg1[%109, %c0_45] : memref<4096x128xbf16, #tpu.memory_space<vmem>>, vector<256x128xbf16>
    %cst_46 = arith.constant dense<0.000000e+00> : vector<256x128xf32>
    %111 = tpu.matmul %110, %0, %cst_46 {dimension_numbers = #tpu.dot_dimension_numbers<[1], [0], [0], [1], [0, 0, 1, 1], [], []>} : vector<256x128xbf16>, vector<128x128xbf16>, vector<256x128xf32> -> vector<256x128xf32>
    %112 = vector.broadcast %1 : vector<1x128xf32> to vector<256x128xf32>
    %113 = arith.addf %111, %112 : vector<256x128xf32>
    %cst_47 = arith.constant 0.000000e+00 : f32
    %114 = vector.broadcast %cst_47 : f32 to vector<256x128xf32>
    %115 = arith.maximumf %113, %114 : vector<256x128xf32>
    %cst_48 = arith.constant dense<0.000000e+00> : vector<128xf32>
    %116 = vector.multi_reduction <add>, %115, %cst_48 [0] : vector<256x128xf32> to vector<128xf32>
    %117 = vector.shape_cast %116 : vector<128xf32> to vector<1x128xf32>
    %118 = vector.broadcast %cst : f32 to vector<1x128xf32>
    %119 = arith.mulf %117, %118 : vector<1x128xf32>
    %120 = arith.index_cast %c7_i32 : i32 to index
    %c0_49 = arith.constant 0 : index
    %121 = vector.load %arg4[%120, %c0_49] : memref<16x128xf32, #tpu.memory_space<vmem>>, vector<1x128xf32>
    tpu.vector_store %arg4[%120, %c0_49], %119 {strides = array<i32>} : memref<16x128xf32, #tpu.memory_space<vmem>>, vector<1x128xf32>,
    %c8_i32 = arith.constant 8 : i32
    %c256_i32_50 = arith.constant 256 : i32
    %122 = arith.muli %c8_i32, %c256_i32_50 : i32
    %123 = tpu.assume_multiple %122, 256 : i32
    %124 = arith.index_cast %123 : i32 to index
    %c0_51 = arith.constant 0 : index
    %125 = vector.load %arg1[%124, %c0_51] : memref<4096x128xbf16, #tpu.memory_space<vmem>>, vector<256x128xbf16>
    %cst_52 = arith.constant dense<0.000000e+00> : vector<256x128xf32>
    %126 = tpu.matmul %125, %0, %cst_52 {dimension_numbers = #tpu.dot_dimension_numbers<[1], [0], [0], [1], [0, 0, 1, 1], [], []>} : vector<256x128xbf16>, vector<128x128xbf16>, vector<256x128xf32> -> vector<256x128xf32>
    %127 = vector.broadcast %1 : vector<1x128xf32> to vector<256x128xf32>
    %128 = arith.addf %126, %127 : vector<256x128xf32>
    %cst_53 = arith.constant 0.000000e+00 : f32
    %129 = vector.broadcast %cst_53 : f32 to vector<256x128xf32>
    %130 = arith.maximumf %128, %129 : vector<256x128xf32>
    %cst_54 = arith.constant dense<0.000000e+00> : vector<128xf32>
    %131 = vector.multi_reduction <add>, %130, %cst_54 [0] : vector<256x128xf32> to vector<128xf32>
    %132 = vector.shape_cast %131 : vector<128xf32> to vector<1x128xf32>
    %133 = vector.broadcast %cst : f32 to vector<1x128xf32>
    %134 = arith.mulf %132, %133 : vector<1x128xf32>
    %135 = arith.index_cast %c8_i32 : i32 to index
    %c0_55 = arith.constant 0 : index
    %136 = vector.load %arg4[%135, %c0_55] : memref<16x128xf32, #tpu.memory_space<vmem>>, vector<1x128xf32>
    tpu.vector_store %arg4[%135, %c0_55], %134 {strides = array<i32>} : memref<16x128xf32, #tpu.memory_space<vmem>>, vector<1x128xf32>,
    %c9_i32 = arith.constant 9 : i32
    %c256_i32_56 = arith.constant 256 : i32
    %137 = arith.muli %c9_i32, %c256_i32_56 : i32
    %138 = tpu.assume_multiple %137, 256 : i32
    %139 = arith.index_cast %138 : i32 to index
    %c0_57 = arith.constant 0 : index
    %140 = vector.load %arg1[%139, %c0_57] : memref<4096x128xbf16, #tpu.memory_space<vmem>>, vector<256x128xbf16>
    %cst_58 = arith.constant dense<0.000000e+00> : vector<256x128xf32>
    %141 = tpu.matmul %140, %0, %cst_58 {dimension_numbers = #tpu.dot_dimension_numbers<[1], [0], [0], [1], [0, 0, 1, 1], [], []>} : vector<256x128xbf16>, vector<128x128xbf16>, vector<256x128xf32> -> vector<256x128xf32>
    %142 = vector.broadcast %1 : vector<1x128xf32> to vector<256x128xf32>
    %143 = arith.addf %141, %142 : vector<256x128xf32>
    %cst_59 = arith.constant 0.000000e+00 : f32
    %144 = vector.broadcast %cst_59 : f32 to vector<256x128xf32>
    %145 = arith.maximumf %143, %144 : vector<256x128xf32>
    %cst_60 = arith.constant dense<0.000000e+00> : vector<128xf32>
    %146 = vector.multi_reduction <add>, %145, %cst_60 [0] : vector<256x128xf32> to vector<128xf32>
    %147 = vector.shape_cast %146 : vector<128xf32> to vector<1x128xf32>
    %148 = vector.broadcast %cst : f32 to vector<1x128xf32>
    %149 = arith.mulf %147, %148 : vector<1x128xf32>
    %150 = arith.index_cast %c9_i32 : i32 to index
    %c0_61 = arith.constant 0 : index
    %151 = vector.load %arg4[%150, %c0_61] : memref<16x128xf32, #tpu.memory_space<vmem>>, vector<1x128xf32>
    tpu.vector_store %arg4[%150, %c0_61], %149 {strides = array<i32>} : memref<16x128xf32, #tpu.memory_space<vmem>>, vector<1x128xf32>,
    %c10_i32 = arith.constant 10 : i32
    %c256_i32_62 = arith.constant 256 : i32
    %152 = arith.muli %c10_i32, %c256_i32_62 : i32
    %153 = tpu.assume_multiple %152, 256 : i32
    %154 = arith.index_cast %153 : i32 to index
    %c0_63 = arith.constant 0 : index
    %155 = vector.load %arg1[%154, %c0_63] : memref<4096x128xbf16, #tpu.memory_space<vmem>>, vector<256x128xbf16>
    %cst_64 = arith.constant dense<0.000000e+00> : vector<256x128xf32>
    %156 = tpu.matmul %155, %0, %cst_64 {dimension_numbers = #tpu.dot_dimension_numbers<[1], [0], [0], [1], [0, 0, 1, 1], [], []>} : vector<256x128xbf16>, vector<128x128xbf16>, vector<256x128xf32> -> vector<256x128xf32>
    %157 = vector.broadcast %1 : vector<1x128xf32> to vector<256x128xf32>
    %158 = arith.addf %156, %157 : vector<256x128xf32>
    %cst_65 = arith.constant 0.000000e+00 : f32
    %159 = vector.broadcast %cst_65 : f32 to vector<256x128xf32>
    %160 = arith.maximumf %158, %159 : vector<256x128xf32>
    %cst_66 = arith.constant dense<0.000000e+00> : vector<128xf32>
    %161 = vector.multi_reduction <add>, %160, %cst_66 [0] : vector<256x128xf32> to vector<128xf32>
    %162 = vector.shape_cast %161 : vector<128xf32> to vector<1x128xf32>
    %163 = vector.broadcast %cst : f32 to vector<1x128xf32>
    %164 = arith.mulf %162, %163 : vector<1x128xf32>
    %165 = arith.index_cast %c10_i32 : i32 to index
    %c0_67 = arith.constant 0 : index
    %166 = vector.load %arg4[%165, %c0_67] : memref<16x128xf32, #tpu.memory_space<vmem>>, vector<1x128xf32>
    tpu.vector_store %arg4[%165, %c0_67], %164 {strides = array<i32>} : memref<16x128xf32, #tpu.memory_space<vmem>>, vector<1x128xf32>,
    %c11_i32 = arith.constant 11 : i32
    %c256_i32_68 = arith.constant 256 : i32
    %167 = arith.muli %c11_i32, %c256_i32_68 : i32
    %168 = tpu.assume_multiple %167, 256 : i32
    %169 = arith.index_cast %168 : i32 to index
    %c0_69 = arith.constant 0 : index
    %170 = vector.load %arg1[%169, %c0_69] : memref<4096x128xbf16, #tpu.memory_space<vmem>>, vector<256x128xbf16>
    %cst_70 = arith.constant dense<0.000000e+00> : vector<256x128xf32>
    %171 = tpu.matmul %170, %0, %cst_70 {dimension_numbers = #tpu.dot_dimension_numbers<[1], [0], [0], [1], [0, 0, 1, 1], [], []>} : vector<256x128xbf16>, vector<128x128xbf16>, vector<256x128xf32> -> vector<256x128xf32>
    %172 = vector.broadcast %1 : vector<1x128xf32> to vector<256x128xf32>
    %173 = arith.addf %171, %172 : vector<256x128xf32>
    %cst_71 = arith.constant 0.000000e+00 : f32
    %174 = vector.broadcast %cst_71 : f32 to vector<256x128xf32>
    %175 = arith.maximumf %173, %174 : vector<256x128xf32>
    %cst_72 = arith.constant dense<0.000000e+00> : vector<128xf32>
    %176 = vector.multi_reduction <add>, %175, %cst_72 [0] : vector<256x128xf32> to vector<128xf32>
    %177 = vector.shape_cast %176 : vector<128xf32> to vector<1x128xf32>
    %178 = vector.broadcast %cst : f32 to vector<1x128xf32>
    %179 = arith.mulf %177, %178 : vector<1x128xf32>
    %180 = arith.index_cast %c11_i32 : i32 to index
    %c0_73 = arith.constant 0 : index
    %181 = vector.load %arg4[%180, %c0_73] : memref<16x128xf32, #tpu.memory_space<vmem>>, vector<1x128xf32>
    tpu.vector_store %arg4[%180, %c0_73], %179 {strides = array<i32>} : memref<16x128xf32, #tpu.memory_space<vmem>>, vector<1x128xf32>,
    %c12_i32 = arith.constant 12 : i32
    %c256_i32_74 = arith.constant 256 : i32
    %182 = arith.muli %c12_i32, %c256_i32_74 : i32
    %183 = tpu.assume_multiple %182, 256 : i32
    %184 = arith.index_cast %183 : i32 to index
    %c0_75 = arith.constant 0 : index
    %185 = vector.load %arg1[%184, %c0_75] : memref<4096x128xbf16, #tpu.memory_space<vmem>>, vector<256x128xbf16>
    %cst_76 = arith.constant dense<0.000000e+00> : vector<256x128xf32>
    %186 = tpu.matmul %185, %0, %cst_76 {dimension_numbers = #tpu.dot_dimension_numbers<[1], [0], [0], [1], [0, 0, 1, 1], [], []>} : vector<256x128xbf16>, vector<128x128xbf16>, vector<256x128xf32> -> vector<256x128xf32>
    %187 = vector.broadcast %1 : vector<1x128xf32> to vector<256x128xf32>
    %188 = arith.addf %186, %187 : vector<256x128xf32>
    %cst_77 = arith.constant 0.000000e+00 : f32
    %189 = vector.broadcast %cst_77 : f32 to vector<256x128xf32>
    %190 = arith.maximumf %188, %189 : vector<256x128xf32>
    %cst_78 = arith.constant dense<0.000000e+00> : vector<128xf32>
    %191 = vector.multi_reduction <add>, %190, %cst_78 [0] : vector<256x128xf32> to vector<128xf32>
    %192 = vector.shape_cast %191 : vector<128xf32> to vector<1x128xf32>
    %193 = vector.broadcast %cst : f32 to vector<1x128xf32>
    %194 = arith.mulf %192, %193 : vector<1x128xf32>
    %195 = arith.index_cast %c12_i32 : i32 to index
    %c0_79 = arith.constant 0 : index
    %196 = vector.load %arg4[%195, %c0_79] : memref<16x128xf32, #tpu.memory_space<vmem>>, vector<1x128xf32>
    tpu.vector_store %arg4[%195, %c0_79], %194 {strides = array<i32>} : memref<16x128xf32, #tpu.memory_space<vmem>>, vector<1x128xf32>,
    %c13_i32 = arith.constant 13 : i32
    %c256_i32_80 = arith.constant 256 : i32
    %197 = arith.muli %c13_i32, %c256_i32_80 : i32
    %198 = tpu.assume_multiple %197, 256 : i32
    %199 = arith.index_cast %198 : i32 to index
    %c0_81 = arith.constant 0 : index
    %200 = vector.load %arg1[%199, %c0_81] : memref<4096x128xbf16, #tpu.memory_space<vmem>>, vector<256x128xbf16>
    %cst_82 = arith.constant dense<0.000000e+00> : vector<256x128xf32>
    %201 = tpu.matmul %200, %0, %cst_82 {dimension_numbers = #tpu.dot_dimension_numbers<[1], [0], [0], [1], [0, 0, 1, 1], [], []>} : vector<256x128xbf16>, vector<128x128xbf16>, vector<256x128xf32> -> vector<256x128xf32>
    %202 = vector.broadcast %1 : vector<1x128xf32> to vector<256x128xf32>
    %203 = arith.addf %201, %202 : vector<256x128xf32>
    %cst_83 = arith.constant 0.000000e+00 : f32
    %204 = vector.broadcast %cst_83 : f32 to vector<256x128xf32>
    %205 = arith.maximumf %203, %204 : vector<256x128xf32>
    %cst_84 = arith.constant dense<0.000000e+00> : vector<128xf32>
    %206 = vector.multi_reduction <add>, %205, %cst_84 [0] : vector<256x128xf32> to vector<128xf32>
    %207 = vector.shape_cast %206 : vector<128xf32> to vector<1x128xf32>
    %208 = vector.broadcast %cst : f32 to vector<1x128xf32>
    %209 = arith.mulf %207, %208 : vector<1x128xf32>
    %210 = arith.index_cast %c13_i32 : i32 to index
    %c0_85 = arith.constant 0 : index
    %211 = vector.load %arg4[%210, %c0_85] : memref<16x128xf32, #tpu.memory_space<vmem>>, vector<1x128xf32>
    tpu.vector_store %arg4[%210, %c0_85], %209 {strides = array<i32>} : memref<16x128xf32, #tpu.memory_space<vmem>>, vector<1x128xf32>,
    %c14_i32 = arith.constant 14 : i32
    %c256_i32_86 = arith.constant 256 : i32
    %212 = arith.muli %c14_i32, %c256_i32_86 : i32
    %213 = tpu.assume_multiple %212, 256 : i32
    %214 = arith.index_cast %213 : i32 to index
    %c0_87 = arith.constant 0 : index
    %215 = vector.load %arg1[%214, %c0_87] : memref<4096x128xbf16, #tpu.memory_space<vmem>>, vector<256x128xbf16>
    %cst_88 = arith.constant dense<0.000000e+00> : vector<256x128xf32>
    %216 = tpu.matmul %215, %0, %cst_88 {dimension_numbers = #tpu.dot_dimension_numbers<[1], [0], [0], [1], [0, 0, 1, 1], [], []>} : vector<256x128xbf16>, vector<128x128xbf16>, vector<256x128xf32> -> vector<256x128xf32>
    %217 = vector.broadcast %1 : vector<1x128xf32> to vector<256x128xf32>
    %218 = arith.addf %216, %217 : vector<256x128xf32>
    %cst_89 = arith.constant 0.000000e+00 : f32
    %219 = vector.broadcast %cst_89 : f32 to vector<256x128xf32>
    %220 = arith.maximumf %218, %219 : vector<256x128xf32>
    %cst_90 = arith.constant dense<0.000000e+00> : vector<128xf32>
    %221 = vector.multi_reduction <add>, %220, %cst_90 [0] : vector<256x128xf32> to vector<128xf32>
    %222 = vector.shape_cast %221 : vector<128xf32> to vector<1x128xf32>
    %223 = vector.broadcast %cst : f32 to vector<1x128xf32>
    %224 = arith.mulf %222, %223 : vector<1x128xf32>
    %225 = arith.index_cast %c14_i32 : i32 to index
    %c0_91 = arith.constant 0 : index
    %226 = vector.load %arg4[%225, %c0_91] : memref<16x128xf32, #tpu.memory_space<vmem>>, vector<1x128xf32>
    tpu.vector_store %arg4[%225, %c0_91], %224 {strides = array<i32>} : memref<16x128xf32, #tpu.memory_space<vmem>>, vector<1x128xf32>,
    %c15_i32 = arith.constant 15 : i32
    %c256_i32_92 = arith.constant 256 : i32
    %227 = arith.muli %c15_i32, %c256_i32_92 : i32
    %228 = tpu.assume_multiple %227, 256 : i32
    %229 = arith.index_cast %228 : i32 to index
    %c0_93 = arith.constant 0 : index
    %230 = vector.load %arg1[%229, %c0_93] : memref<4096x128xbf16, #tpu.memory_space<vmem>>, vector<256x128xbf16>
    %cst_94 = arith.constant dense<0.000000e+00> : vector<256x128xf32>
    %231 = tpu.matmul %230, %0, %cst_94 {dimension_numbers = #tpu.dot_dimension_numbers<[1], [0], [0], [1], [0, 0, 1, 1], [], []>} : vector<256x128xbf16>, vector<128x128xbf16>, vector<256x128xf32> -> vector<256x128xf32>
    %232 = vector.broadcast %1 : vector<1x128xf32> to vector<256x128xf32>
    %233 = arith.addf %231, %232 : vector<256x128xf32>
    %cst_95 = arith.constant 0.000000e+00 : f32
    %234 = vector.broadcast %cst_95 : f32 to vector<256x128xf32>
    %235 = arith.maximumf %233, %234 : vector<256x128xf32>
    %cst_96 = arith.constant dense<0.000000e+00> : vector<128xf32>
    %236 = vector.multi_reduction <add>, %235, %cst_96 [0] : vector<256x128xf32> to vector<128xf32>
    %237 = vector.shape_cast %236 : vector<128xf32> to vector<1x128xf32>
    %238 = vector.broadcast %cst : f32 to vector<1x128xf32>
    %239 = arith.mulf %237, %238 : vector<1x128xf32>
    %240 = arith.index_cast %c15_i32 : i32 to index
    %c0_97 = arith.constant 0 : index
    %241 = vector.load %arg4[%240, %c0_97] : memref<16x128xf32, #tpu.memory_space<vmem>>, vector<1x128xf32>
    tpu.vector_store %arg4[%240, %c0_97], %239 {strides = array<i32>} : memref<16x128xf32, #tpu.memory_space<vmem>>, vector<1x128xf32>,
    %c16_i32 = arith.constant 16 : i32
    return
  }
  func.func @transform_0(%arg0: i32) -> (i32, i32) {
    %c0_i32 = arith.constant 0 : i32
    %c0_i32_0 = arith.constant 0 : i32
    return %arg0, %c0_i32 : i32, i32
  }
  func.func @transform_1(%arg0: i32) -> (i32, i32) {
    %c0_i32 = arith.constant 0 : i32
    %c0_i32_0 = arith.constant 0 : i32
    %c0_i32_1 = arith.constant 0 : i32
    return %c0_i32, %c0_i32_0 : i32, i32
  }
  func.func @transform_2(%arg0: i32) -> (i32, i32) {
    %c0_i32 = arith.constant 0 : i32
    %c0_i32_0 = arith.constant 0 : i32
    %c0_i32_1 = arith.constant 0 : i32
    return %c0_i32, %c0_i32_0 : i32, i32
  }
  func.func @transform_3(%arg0: i32) -> (i32, i32) {
    %c0_i32 = arith.constant 0 : i32
    %c0_i32_0 = arith.constant 0 : i32
    return %arg0, %c0_i32 : i32, i32
  }
}

module attributes {stable_mosaic.version = 11 : i64} {
  func.func @head_kernel(%arg0: i32, %arg1: memref<16x128xf32, #tpu.memory_space<vmem>>, %arg2: memref<128x128xbf16, #tpu.memory_space<vmem>>, %arg3: memref<1x128xf32, #tpu.memory_space<vmem>>, %arg4: memref<1x128xf32, #tpu.memory_space<vmem>>, %arg5: memref<1x128xf32, #tpu.memory_space<vmem>>, %arg6: memref<128x128xbf16, #tpu.memory_space<vmem>>, %arg7: memref<1x128xf32, #tpu.memory_space<vmem>>, %arg8: memref<1x128xf32, #tpu.memory_space<vmem>>, %arg9: memref<1x128xf32, #tpu.memory_space<vmem>>, %arg10: memref<16x128xf32, #tpu.memory_space<vmem>>) attributes {dimension_semantics = [#tpu.dimension_semantics<arbitrary>], iteration_bounds = array<i64: 1>, scalar_prefetch = 0 : i64, scratch_operands = 0 : i64, tpu.core_type = #tpu.core_type<tc>, window_params = [{pipeline_mode = #tpu.pipeline_mode<synchronous>, transform_indices = @transform_0, window_bounds = array<i64: 16, 128>}, {pipeline_mode = #tpu.pipeline_mode<synchronous>, transform_indices = @transform_1, window_bounds = array<i64: 128, 128>}, {pipeline_mode = #tpu.pipeline_mode<synchronous>, transform_indices = @transform_2, window_bounds = array<i64: 1, 128>}, {pipeline_mode = #tpu.pipeline_mode<synchronous>, transform_indices = @transform_3, window_bounds = array<i64: 1, 128>}, {pipeline_mode = #tpu.pipeline_mode<synchronous>, transform_indices = @transform_4, window_bounds = array<i64: 1, 128>}, {pipeline_mode = #tpu.pipeline_mode<synchronous>, transform_indices = @transform_5, window_bounds = array<i64: 128, 128>}, {pipeline_mode = #tpu.pipeline_mode<synchronous>, transform_indices = @transform_6, window_bounds = array<i64: 1, 128>}, {pipeline_mode = #tpu.pipeline_mode<synchronous>, transform_indices = @transform_7, window_bounds = array<i64: 1, 128>}, {pipeline_mode = #tpu.pipeline_mode<synchronous>, transform_indices = @transform_8, window_bounds = array<i64: 1, 128>}, {pipeline_mode = #tpu.pipeline_mode<synchronous>, transform_indices = @transform_9, window_bounds = array<i64: 16, 128>}]} {
    %c0 = arith.constant 0 : index
    %c0_0 = arith.constant 0 : index
    %0 = vector.load %arg1[%c0, %c0_0] : memref<16x128xf32, #tpu.memory_space<vmem>>, vector<16x128xf32>
    %1 = arith.truncf %0 : vector<16x128xf32> to vector<16x128xbf16>
    %c0_1 = arith.constant 0 : index
    %c0_2 = arith.constant 0 : index
    %2 = vector.load %arg2[%c0_1, %c0_2] : memref<128x128xbf16, #tpu.memory_space<vmem>>, vector<128x128xbf16>
    %cst = arith.constant dense<0.000000e+00> : vector<16x128xf32>
    %3 = tpu.matmul %1, %2, %cst {dimension_numbers = #tpu.dot_dimension_numbers<[1], [0], [0], [1], [0, 0, 1, 1], [], []>} : vector<16x128xbf16>, vector<128x128xbf16>, vector<16x128xf32> -> vector<16x128xf32>
    %c0_3 = arith.constant 0 : index
    %c0_4 = arith.constant 0 : index
    %4 = vector.load %arg3[%c0_3, %c0_4] : memref<1x128xf32, #tpu.memory_space<vmem>>, vector<1x128xf32>
    %5 = vector.broadcast %4 : vector<1x128xf32> to vector<16x128xf32>
    %6 = arith.addf %3, %5 : vector<16x128xf32>
    %7 = vector.shape_cast %6 : vector<16x128xf32> to vector<2x8x128xf32>
    %cst_5 = arith.constant dense<0.000000e+00> : vector<2x128xf32>
    %8 = vector.multi_reduction <add>, %7, %cst_5 [1] : vector<2x8x128xf32> to vector<2x128xf32>
    %9 = vector.shape_cast %8 : vector<2x128xf32> to vector<2x1x128xf32>
    %cst_6 = arith.constant 8.000000e+00 : f32
    %10 = vector.broadcast %cst_6 : f32 to vector<2x1x128xf32>
    %11 = arith.divf %9, %10 : vector<2x1x128xf32>
    %12 = vector.broadcast %11 : vector<2x1x128xf32> to vector<2x8x128xf32>
    %13 = arith.subf %7, %12 : vector<2x8x128xf32>
    %14 = arith.mulf %13, %13 : vector<2x8x128xf32>
    %cst_7 = arith.constant dense<0.000000e+00> : vector<2x128xf32>
    %15 = vector.multi_reduction <add>, %14, %cst_7 [1] : vector<2x8x128xf32> to vector<2x128xf32>
    %16 = vector.shape_cast %15 : vector<2x128xf32> to vector<2x1x128xf32>
    %cst_8 = arith.constant 8.000000e+00 : f32
    %17 = vector.broadcast %cst_8 : f32 to vector<2x1x128xf32>
    %18 = arith.divf %16, %17 : vector<2x1x128xf32>
    %19 = vector.broadcast %11 : vector<2x1x128xf32> to vector<2x8x128xf32>
    %20 = arith.subf %7, %19 : vector<2x8x128xf32>
    %cst_9 = arith.constant 9.99999974E-6 : f32
    %21 = vector.broadcast %cst_9 : f32 to vector<2x1x128xf32>
    %22 = arith.addf %18, %21 : vector<2x1x128xf32>
    %23 = math.rsqrt %22 : vector<2x1x128xf32>
    %24 = vector.broadcast %23 : vector<2x1x128xf32> to vector<2x8x128xf32>
    %25 = arith.mulf %20, %24 : vector<2x8x128xf32>
    %c0_10 = arith.constant 0 : index
    %c0_11 = arith.constant 0 : index
    %26 = vector.load %arg4[%c0_10, %c0_11] : memref<1x128xf32, #tpu.memory_space<vmem>>, vector<1x128xf32>
    %27 = vector.shape_cast %26 : vector<1x128xf32> to vector<1x1x128xf32>
    %28 = vector.broadcast %27 : vector<1x1x128xf32> to vector<2x8x128xf32>
    %29 = arith.mulf %25, %28 : vector<2x8x128xf32>
    %c0_12 = arith.constant 0 : index
    %c0_13 = arith.constant 0 : index
    %30 = vector.load %arg5[%c0_12, %c0_13] : memref<1x128xf32, #tpu.memory_space<vmem>>, vector<1x128xf32>
    %31 = vector.shape_cast %30 : vector<1x128xf32> to vector<1x1x128xf32>
    %32 = vector.broadcast %31 : vector<1x1x128xf32> to vector<2x8x128xf32>
    %33 = arith.addf %29, %32 : vector<2x8x128xf32>
    %cst_14 = arith.constant 0.000000e+00 : f32
    %34 = vector.broadcast %cst_14 : f32 to vector<2x8x128xf32>
    %35 = arith.maximumf %33, %34 : vector<2x8x128xf32>
    %36 = vector.shape_cast %35 : vector<2x8x128xf32> to vector<16x128xf32>
    %37 = arith.truncf %36 : vector<16x128xf32> to vector<16x128xbf16>
    %c0_15 = arith.constant 0 : index
    %c0_16 = arith.constant 0 : index
    %38 = vector.load %arg6[%c0_15, %c0_16] : memref<128x128xbf16, #tpu.memory_space<vmem>>, vector<128x128xbf16>
    %cst_17 = arith.constant dense<0.000000e+00> : vector<16x128xf32>
    %39 = tpu.matmul %37, %38, %cst_17 {dimension_numbers = #tpu.dot_dimension_numbers<[1], [0], [0], [1], [0, 0, 1, 1], [], []>} : vector<16x128xbf16>, vector<128x128xbf16>, vector<16x128xf32> -> vector<16x128xf32>
    %c0_18 = arith.constant 0 : index
    %c0_19 = arith.constant 0 : index
    %40 = vector.load %arg7[%c0_18, %c0_19] : memref<1x128xf32, #tpu.memory_space<vmem>>, vector<1x128xf32>
    %41 = vector.broadcast %40 : vector<1x128xf32> to vector<16x128xf32>
    %42 = arith.addf %39, %41 : vector<16x128xf32>
    %43 = vector.shape_cast %42 : vector<16x128xf32> to vector<2x8x128xf32>
    %cst_20 = arith.constant dense<0.000000e+00> : vector<2x128xf32>
    %44 = vector.multi_reduction <add>, %43, %cst_20 [1] : vector<2x8x128xf32> to vector<2x128xf32>
    %45 = vector.shape_cast %44 : vector<2x128xf32> to vector<2x1x128xf32>
    %cst_21 = arith.constant 8.000000e+00 : f32
    %46 = vector.broadcast %cst_21 : f32 to vector<2x1x128xf32>
    %47 = arith.divf %45, %46 : vector<2x1x128xf32>
    %48 = vector.broadcast %47 : vector<2x1x128xf32> to vector<2x8x128xf32>
    %49 = arith.subf %43, %48 : vector<2x8x128xf32>
    %50 = arith.mulf %49, %49 : vector<2x8x128xf32>
    %cst_22 = arith.constant dense<0.000000e+00> : vector<2x128xf32>
    %51 = vector.multi_reduction <add>, %50, %cst_22 [1] : vector<2x8x128xf32> to vector<2x128xf32>
    %52 = vector.shape_cast %51 : vector<2x128xf32> to vector<2x1x128xf32>
    %cst_23 = arith.constant 8.000000e+00 : f32
    %53 = vector.broadcast %cst_23 : f32 to vector<2x1x128xf32>
    %54 = arith.divf %52, %53 : vector<2x1x128xf32>
    %55 = vector.broadcast %47 : vector<2x1x128xf32> to vector<2x8x128xf32>
    %56 = arith.subf %43, %55 : vector<2x8x128xf32>
    %cst_24 = arith.constant 9.99999974E-6 : f32
    %57 = vector.broadcast %cst_24 : f32 to vector<2x1x128xf32>
    %58 = arith.addf %54, %57 : vector<2x1x128xf32>
    %59 = math.rsqrt %58 : vector<2x1x128xf32>
    %60 = vector.broadcast %59 : vector<2x1x128xf32> to vector<2x8x128xf32>
    %61 = arith.mulf %56, %60 : vector<2x8x128xf32>
    %c0_25 = arith.constant 0 : index
    %c0_26 = arith.constant 0 : index
    %62 = vector.load %arg8[%c0_25, %c0_26] : memref<1x128xf32, #tpu.memory_space<vmem>>, vector<1x128xf32>
    %63 = vector.shape_cast %62 : vector<1x128xf32> to vector<1x1x128xf32>
    %64 = vector.broadcast %63 : vector<1x1x128xf32> to vector<2x8x128xf32>
    %65 = arith.mulf %61, %64 : vector<2x8x128xf32>
    %c0_27 = arith.constant 0 : index
    %c0_28 = arith.constant 0 : index
    %66 = vector.load %arg9[%c0_27, %c0_28] : memref<1x128xf32, #tpu.memory_space<vmem>>, vector<1x128xf32>
    %67 = vector.shape_cast %66 : vector<1x128xf32> to vector<1x1x128xf32>
    %68 = vector.broadcast %67 : vector<1x1x128xf32> to vector<2x8x128xf32>
    %69 = arith.addf %65, %68 : vector<2x8x128xf32>
    %70 = vector.shape_cast %69 : vector<2x8x128xf32> to vector<16x128xf32>
    %71 = arith.mulf %70, %70 : vector<16x128xf32>
    %cst_29 = arith.constant dense<0.000000e+00> : vector<16xf32>
    %72 = vector.multi_reduction <add>, %71, %cst_29 [1] : vector<16x128xf32> to vector<16xf32>
    %73 = vector.shape_cast %72 : vector<16xf32> to vector<16x1xf32>
    %cst_30 = arith.constant 1.000000e-24 : f32
    %74 = vector.broadcast %cst_30 : f32 to vector<16x1xf32>
    %75 = arith.maximumf %73, %74 : vector<16x1xf32>
    %76 = math.rsqrt %75 : vector<16x1xf32>
    %77 = vector.broadcast %76 : vector<16x1xf32> to vector<16x128xf32>
    %78 = arith.mulf %70, %77 : vector<16x128xf32>
    %c0_31 = arith.constant 0 : index
    %c0_32 = arith.constant 0 : index
    %79 = vector.load %arg10[%c0_31, %c0_32] : memref<16x128xf32, #tpu.memory_space<vmem>>, vector<16x128xf32>
    tpu.vector_store %arg10[%c0_31, %c0_32], %78 {strides = array<i32>} : memref<16x128xf32, #tpu.memory_space<vmem>>, vector<16x128xf32>,
    return
  }
  func.func @transform_0(%arg0: i32) -> (i32, i32) {
    %c0_i32 = arith.constant 0 : i32
    %c0_i32_0 = arith.constant 0 : i32
    %c0_i32_1 = arith.constant 0 : i32
    return %c0_i32, %c0_i32_0 : i32, i32
  }
  func.func @transform_1(%arg0: i32) -> (i32, i32) {
    %c0_i32 = arith.constant 0 : i32
    %c0_i32_0 = arith.constant 0 : i32
    %c0_i32_1 = arith.constant 0 : i32
    return %c0_i32, %c0_i32_0 : i32, i32
  }
  func.func @transform_2(%arg0: i32) -> (i32, i32) {
    %c0_i32 = arith.constant 0 : i32
    %c0_i32_0 = arith.constant 0 : i32
    %c0_i32_1 = arith.constant 0 : i32
    return %c0_i32, %c0_i32_0 : i32, i32
  }
  func.func @transform_3(%arg0: i32) -> (i32, i32) {
    %c0_i32 = arith.constant 0 : i32
    %c0_i32_0 = arith.constant 0 : i32
    %c0_i32_1 = arith.constant 0 : i32
    return %c0_i32, %c0_i32_0 : i32, i32
  }
  func.func @transform_4(%arg0: i32) -> (i32, i32) {
    %c0_i32 = arith.constant 0 : i32
    %c0_i32_0 = arith.constant 0 : i32
    %c0_i32_1 = arith.constant 0 : i32
    return %c0_i32, %c0_i32_0 : i32, i32
  }
  func.func @transform_5(%arg0: i32) -> (i32, i32) {
    %c0_i32 = arith.constant 0 : i32
    %c0_i32_0 = arith.constant 0 : i32
    %c0_i32_1 = arith.constant 0 : i32
    return %c0_i32, %c0_i32_0 : i32, i32
  }
  func.func @transform_6(%arg0: i32) -> (i32, i32) {
    %c0_i32 = arith.constant 0 : i32
    %c0_i32_0 = arith.constant 0 : i32
    %c0_i32_1 = arith.constant 0 : i32
    return %c0_i32, %c0_i32_0 : i32, i32
  }
  func.func @transform_7(%arg0: i32) -> (i32, i32) {
    %c0_i32 = arith.constant 0 : i32
    %c0_i32_0 = arith.constant 0 : i32
    %c0_i32_1 = arith.constant 0 : i32
    return %c0_i32, %c0_i32_0 : i32, i32
  }
  func.func @transform_8(%arg0: i32) -> (i32, i32) {
    %c0_i32 = arith.constant 0 : i32
    %c0_i32_0 = arith.constant 0 : i32
    %c0_i32_1 = arith.constant 0 : i32
    return %c0_i32, %c0_i32_0 : i32, i32
  }
  func.func @transform_9(%arg0: i32) -> (i32, i32) {
    %c0_i32 = arith.constant 0 : i32
    %c0_i32_0 = arith.constant 0 : i32
    %c0_i32_1 = arith.constant 0 : i32
    return %c0_i32, %c0_i32_0 : i32, i32
  }
}

</mosaic_0001>

<bundles_post_ra>
// kernel: forward.3
= control target key start
LH: loop header
LB: loop body
LE: loop exit
PB: predicated region body
PF: predicated region fallthrough
CT: control target
= control target key end

     0   :  { %v504_v0 = vmov 0.0   ;;  %vm505_vm0 = vmmov 0   ;;  %s634_s1 = inlined_call_operand.vmem [shape: bf16[128,128], index: 1, kind: input, shape index: {}]   ;;  %s635_s0 = inlined_call_operand.vmem [shape: f32[16,128], index: 0, kind: input, shape index: {}]   ;;  %s636_s5 = inlined_call_operand.vmem [shape: bf16[128,128], index: 5, kind: input, shape index: {}]   ;;  %s637_s2 = inlined_call_operand.vmem [shape: f32[1,128], index: 2, kind: input, shape index: {}]   ;;  %s638_s3 = inlined_call_operand.vmem [shape: f32[1,128], index: 3, kind: input, shape index: {}]   ;;  %s639_s4 = inlined_call_operand.vmem [shape: f32[1,128], index: 4, kind: input, shape index: {}]   ;;  %s640_s6 = inlined_call_operand.vmem [shape: f32[1,128], index: 6, kind: input, shape index: {}]   ;;  %s641_s7 = inlined_call_operand.vmem [shape: f32[1,128], index: 7, kind: input, shape index: {}]   ;;  %s642_s8 = inlined_call_operand.vmem [shape: f32[1,128], index: 8, kind: input, shape index: {}]   ;;  %s643_s9 = inlined_call_operand.vmem [shape: f32[16,128], index: 9, kind: output, shape index: {}]  }
   0x1   :  { %434 = vmatprep.subr.bf16.mxu0 %v504_v0  ;;  %v476_v1 = vld [vmem:[%s634_s1] sm:$0xff]   ;;  %450 = vmatprep.mubr.msk.bf16.mxu0 %vm505_vm0, %v504_v0  ;;  %v477_v2 = vld [vmem:[%s634_s1 + $0x8] sm:$0xff]   ;;  %v478_v3 = vld [vmem:[%s634_s1 + $0x10] sm:$0xff]  }
   0x2   :  { %454 = vmatprep.subr.bf16.mxu1 %v504_v0  ;;  %470 = vmatprep.mubr.msk.bf16.mxu1 %vm505_vm0, %v504_v0  ;;  %v479_v4 = vld [vmem:[%s634_s1 + $0x18] sm:$0xff]   ;;  %v480_v5 = vld [vmem:[%s634_s1 + $0x20] sm:$0xff]   ;;  %v481_v6 = vld [vmem:[%s634_s1 + $0x28] sm:$0xff]  }
   0x3   :  { %435 = vmatpush3.bf16.msra.mxu0 %v476_v1  ;;  %v482_v7 = vld [vmem:[%s634_s1 + $0x30] sm:$0xff]   ;;  %v483_v8 = vld [vmem:[%s634_s1 + $0x38] sm:$0xff]   ;;  %v33_v9 = vld [vmem:[%s635_s0] sm:$0xff] }
   0x4   :  { %436 = vmatprep.subr.bf16.mxu0 %v504_v0  ;;  %v34_v10 = vld [vmem:[%s635_s0 + $0x8] sm:$0xff]  ;;  %v484_v12 = vld [vmem:[%s636_s5] sm:$0xff]   ;;  %v486_v14 = vld [vmem:[%s636_s5 + $0x10] sm:$0xff]  }
   0x5   :  { %v35_v11 = vpack.c.bf16 %v34_v10, %v33_v9  ;;  %455 = vmatpush3.bf16.msra.mxu1 %v484_v12  ;;  %v485_v13 = vld [vmem:[%s636_s5 + $0x8] sm:$0xff]   ;;  %v487_v15 = vld [vmem:[%s636_s5 + $0x18] sm:$0xff]   ;;  %v488_v16 = vld [vmem:[%s636_s5 + $0x20] sm:$0xff]  }
   0x6   :  { %456 = vmatprep.subr.bf16.mxu1 %v504_v0  ;;  %v489_v17 = vld [vmem:[%s636_s5 + $0x28] sm:$0xff]   ;;  %v490_v18 = vld [vmem:[%s636_s5 + $0x30] sm:$0xff]   ;;  %v491_v19 = vld [vmem:[%s636_s5 + $0x38] sm:$0xff]  }
   0x7   :  { %437 = vmatpush3.bf16.msra.mxu0 %v477_v2  ;;  %v394_v20 = vld [vmem:[%s637_s2] ss:$0 sm:$0xff] }
   0x8   :  { %438 = vmatprep.subr.bf16.mxu0 %v504_v0  ;;  %v403_v62 = vld [vmem:[%s638_s3] ss:$0 sm:$0xff] }
   0x9   :  { %457 = vmatpush3.bf16.msra.mxu1 %v485_v13  ;;  %v404_v1 = vld [vmem:[%s639_s4] ss:$0 sm:$0xff] }
   0xa   :  { %458 = vmatprep.subr.bf16.mxu1 %v504_v0  ;;  %v405_v10 = vld [vmem:[%s640_s6] ss:$0 sm:$0xff] }
   0xb   :  { %439 = vmatpush3.bf16.msra.mxu0 %v478_v3 }
   0xc   :  { %440 = vmatprep.subr.bf16.mxu0 %v504_v0 }
   0xd   :  { %459 = vmatpush3.bf16.msra.mxu1 %v486_v14 }
   0xe   :  { %460 = vmatprep.subr.bf16.mxu1 %v504_v0 }
   0xf   :  { %441 = vmatpush3.bf16.msra.mxu0 %v479_v4 }
  0x10   :  { %442 = vmatprep.subr.bf16.mxu0 %v504_v0 }
  0x11   :  { %461 = vmatpush3.bf16.msra.mxu1 %v487_v15 }
  0x12   :  { %462 = vmatprep.subr.bf16.mxu1 %v504_v0 }
  0x13   :  { %443 = vmatpush3.bf16.msra.mxu0 %v480_v5 }
  0x14   :  { %444 = vmatprep.subr.bf16.mxu0 %v504_v0 }
  0x15   :  { %463 = vmatpush3.bf16.msra.mxu1 %v488_v16 }
  0x16   :  { %464 = vmatprep.subr.bf16.mxu1 %v504_v0 }
  0x17   :  { %445 = vmatpush3.bf16.msra.mxu0 %v481_v6 }
  0x18   :  { %446 = vmatprep.subr.bf16.mxu0 %v504_v0 }
  0x19   :  { %465 = vmatpush3.bf16.msra.mxu1 %v489_v17 }
  0x1a   :  { %466 = vmatprep.subr.bf16.mxu1 %v504_v0 }
  0x1b   :  { %447 = vmatpush3.bf16.msra.mxu0 %v482_v7 }
  0x1c   :  { %448 = vmatprep.subr.bf16.mxu0 %v504_v0 }
  0x1d   :  { %467 = vmatpush3.bf16.msra.mxu1 %v490_v18 }
  0x1e   :  { %468 = vmatprep.subr.bf16.mxu1 %v504_v0 }
  0x1f   :  { %449 = vmatpush3.bf16.msra.mxu0 %v483_v8 }
  0x21   :  { %469 = vmatpush3.bf16.msra.mxu1 %v491_v19 }
  0x22   :  { %451 = vmatmul.mubr.bf16.vlgmr.msra.gmra.mrb[0].mxu0 %v35_v11 }
  0xf5   :  { %v141_v21 = vpop.f32.mrb[0].mxu0 }
  0xf6   :  { %v142_v22 = vadd.f32 %v394_v20, %v141_v21  ;;  %v452_v23 = vpop.f32.mrb[1].mxu0 }
  0xf7   :  { %v144_v24 = vpop.f32.mrb[2].mxu0 }
  0xf8   :  { %v148_v25 = vrot.slane %v142_v22, 4  ;;  %v145_v26 = vadd.f32 %v394_v20, %v144_v24  ;;  %v453_v27 = vpop.f32.mrb[3].mxu0 }
  0xfa   :  { %v149_v28 = vadd.f32 %v148_v25, %v142_v22  ;;  %v154_v29 = vrot.slane %v145_v26, 4 }
  0xfc   :  { %v150_v30 = vrot.slane %v149_v28, 2  ;;  %v155_v31 = vadd.f32 %v154_v29, %v145_v26 }
  0xfe   :  { %v151_v32 = vadd.f32 %v150_v30, %v149_v28  ;;  %v156_v33 = vrot.slane %v155_v31, 2 }
 0x100   :  { %v152_v34 = vrot.slane %v151_v32, 1  ;;  %v157_v35 = vadd.f32 %v156_v33, %v155_v31 }
 0x102   :  { %v153_v36 = vadd.f32 %v152_v34, %v151_v32  ;;  %v158_v37 = vrot.slane %v157_v35, 1 }
 0x104   :  { %v161_v38 = vmul.f32 0.125, %v153_v36  ;;  %v159_v39 = vadd.f32 %v158_v37, %v157_v35 }
 0x106   :  { %v163_v40 = vsub.f32 %v142_v22, %v161_v38  ;;  %v162_v41 = vmul.f32 0.125, %v159_v39 }
 0x108   :  { %v165_v42 = vmul.f32 %v163_v40, %v163_v40  ;;  %v164_v43 = vsub.f32 %v145_v26, %v162_v41 }
 0x10a   :  { %v167_v44 = vrot.slane %v165_v42, 4  ;;  %v166_v45 = vmul.f32 %v164_v43, %v164_v43 }
 0x10c   :  { %v168_v46 = vadd.f32 %v167_v44, %v165_v42  ;;  %v173_v47 = vrot.slane %v166_v45, 4 }
 0x10e   :  { %v169_v48 = vrot.slane %v168_v46, 2  ;;  %v174_v49 = vadd.f32 %v173_v47, %v166_v45 }
 0x110   :  { %v170_v50 = vadd.f32 %v169_v48, %v168_v46  ;;  %v175_v51 = vrot.slane %v174_v49, 2 }
 0x112   :  { %v171_v52 = vrot.slane %v170_v50, 1  ;;  %v176_v53 = vadd.f32 %v175_v51, %v174_v49 }
 0x114   :  { %v172_v54 = vadd.f32 %v171_v52, %v170_v50  ;;  %v177_v55 = vrot.slane %v176_v53, 1  ;;  %v414_v52 = vld [vmem:[%s641_s7] ss:$0 sm:$0xff] }
 0x116   :  { %v179_v56 = vmul.f32 0.125, %v172_v54  ;;  %v178_v57 = vadd.f32 %v177_v55, %v176_v53  ;;  %v415_v55 = vld [vmem:[%s642_s8] ss:$0 sm:$0xff] }
 0x118   :  { %v181_v58 = vadd.f32 1e-05, %v179_v56  ;;  %v180_v59 = vmul.f32 0.125, %v178_v57 }
 0x11a   :  { %492 = vrsqrt.f32 %v181_v58  ;;  %v182_v60 = vadd.f32 1e-05, %v180_v59 }
 0x11c   :  { %494 = vrsqrt.f32 %v182_v60 }
 0x124   :  { %v493_v61 = vpop.eup %492 }
 0x125   :  { %v185_v63 = vmul.f32 %v493_v61, %v163_v40 }
 0x126   :  { %v495_v0 = vpop.eup %494 }
 0x127   :  { %v186_v2 = vmul.f32 %v495_v0, %v164_v43  ;;  %v194_v3 = vmul.f32 %v403_v62, %v185_v63 }
 0x129   :  { %v195_v4 = vmul.f32 %v403_v62, %v186_v2  ;;  %v203_v5 = vadd.f32 %v404_v1, %v194_v3 }
 0x12b   :  { %v204_v6 = vadd.f32 %v404_v1, %v195_v4  ;;  %v205_v7 = vmax.f32 %v203_v5, 0.0 }
 0x12d   :  { %v206_v8 = vmax.f32 %v204_v6, 0.0 }
 0x12f   :  { %v207_v9 = vpack.c.bf16 %v206_v8, %v205_v7 }
 0x131   :  { %471 = vmatmul.mubr.bf16.vlgmr.msra.gmra.mrb[0].mxu1 %v207_v9 }
 0x204   :  { %v313_v11 = vpop.f32.mrb[0].mxu1 }
 0x205   :  { %v314_v12 = vadd.f32 %v405_v10, %v313_v11  ;;  %v472_v13 = vpop.f32.mrb[1].mxu1 }
 0x206   :  { %v316_v14 = vpop.f32.mrb[2].mxu1 }
 0x207   :  { %v320_v15 = vrot.slane %v314_v12, 4  ;;  %v317_v16 = vadd.f32 %v405_v10, %v316_v14  ;;  %v473_v17 = vpop.f32.mrb[3].mxu1 }
 0x209   :  { %v321_v18 = vadd.f32 %v320_v15, %v314_v12  ;;  %v326_v19 = vrot.slane %v317_v16, 4 }
 0x20b   :  { %v322_v20 = vrot.slane %v321_v18, 2  ;;  %v327_v21 = vadd.f32 %v326_v19, %v317_v16 }
 0x20d   :  { %v323_v22 = vadd.f32 %v322_v20, %v321_v18  ;;  %v328_v23 = vrot.slane %v327_v21, 2 }
 0x20f   :  { %v324_v24 = vrot.slane %v323_v22, 1  ;;  %v329_v25 = vadd.f32 %v328_v23, %v327_v21 }
 0x211   :  { %v325_v26 = vadd.f32 %v324_v24, %v323_v22  ;;  %v330_v27 = vrot.slane %v329_v25, 1 }
 0x213   :  { %v332_v28 = vmul.f32 0.125, %v325_v26  ;;  %v331_v29 = vadd.f32 %v330_v27, %v329_v25 }
 0x215   :  { %v334_v30 = vsub.f32 %v314_v12, %v332_v28  ;;  %v333_v31 = vmul.f32 0.125, %v331_v29 }
 0x217   :  { %v336_v32 = vmul.f32 %v334_v30, %v334_v30  ;;  %v335_v33 = vsub.f32 %v317_v16, %v333_v31 }
 0x219   :  { %v338_v34 = vrot.slane %v336_v32, 4  ;;  %v337_v35 = vmul.f32 %v335_v33, %v335_v33 }
 0x21b   :  { %v339_v36 = vadd.f32 %v338_v34, %v336_v32  ;;  %v344_v37 = vrot.slane %v337_v35, 4 }
 0x21d   :  { %v340_v38 = vrot.slane %v339_v36, 2  ;;  %v345_v39 = vadd.f32 %v344_v37, %v337_v35 }
 0x21f   :  { %v341_v40 = vadd.f32 %v340_v38, %v339_v36  ;;  %v346_v41 = vrot.slane %v345_v39, 2 }
 0x221   :  { %v342_v42 = vrot.slane %v341_v40, 1  ;;  %v347_v43 = vadd.f32 %v346_v41, %v345_v39 }
 0x223   :  { %v343_v44 = vadd.f32 %v342_v42, %v341_v40  ;;  %v348_v45 = vrot.slane %v347_v43, 1 }
 0x225   :  { %v350_v46 = vmul.f32 0.125, %v343_v44  ;;  %v349_v47 = vadd.f32 %v348_v45, %v347_v43 }
 0x227   :  { %v352_v48 = vadd.f32 1e-05, %v350_v46  ;;  %v351_v49 = vmul.f32 0.125, %v349_v47 }
 0x229   :  { %496 = vrsqrt.f32 %v352_v48  ;;  %v353_v50 = vadd.f32 1e-05, %v351_v49 }
 0x22b   :  { %498 = vrsqrt.f32 %v353_v50 }
 0x233   :  { %v497_v51 = vpop.eup %496 }
 0x234   :  { %v356_v53 = vmul.f32 %v497_v51, %v334_v30 }
 0x235   :  { %v499_v54 = vpop.eup %498 }
 0x236   :  { %v357_v56 = vmul.f32 %v499_v54, %v335_v33  ;;  %v365_v57 = vmul.f32 %v414_v52, %v356_v53 }
 0x238   :  { %v374_v58 = vadd.f32 %v415_v55, %v365_v57  ;;  %v366_v59 = vmul.f32 %v414_v52, %v357_v56 }
 0x23a   :  { %v376_v60 = vmul.f32 %v374_v58, %v374_v58  ;;  %v375_v61 = vadd.f32 %v415_v55, %v366_v59 }
 0x23c   :  { %378 = vadd.xlane.f32.xlu0 %v376_v60  ;;  %v377_v62 = vmul.f32 %v375_v61, %v375_v61 }
 0x240   :  { %380 = vadd.xlane.f32.xlu0 %v377_v62 }
 0x2c9   :  { %v379_v63 = vpop.xlane.xlu0 %378 }
 0x2ca   :  { %v382_v0 = vmax.f32 %v379_v63, 1e-24 }
 0x2cc   :  { %500 = vrsqrt.f32 %v382_v0 }
 0x2cd   :  { %v381_v1 = vpop.xlane.xlu0 %380 }
 0x2ce   :  { %v383_v2 = vmax.f32 %v381_v1, 1e-24 }
 0x2d0   :  { %502 = vrsqrt.f32 %v383_v2 }
 0x2d6   :  { %v501_v3 = vpop.eup %500 }
 0x2d7   :  { %v386_v4 = vmul.f32 %v501_v3, %v374_v58 }
 0x2d9   :  { %388 = vst [vmem:[%s643_s9] sm:$0xff] %v386_v4 }
 0x2da   :  { %v503_v5 = vpop.eup %502 }
 0x2db   :  { %v387_v6 = vmul.f32 %v503_v5, %v375_v61 }
 0x2dd   :  { %389 = vst [vmem:[%s643_s9 + $0x8] sm:$0xff] %v387_v6 }

// kernel: forward.2
= control target key start
LH: loop header
LB: loop body
LE: loop exit
PB: predicated region body
PF: predicated region fallthrough
CT: control target
= control target key end

     0   :  { %s9801_s1 = inlined_call_operand.vmem [shape: bf16[128,128], index: 1, kind: input, shape index: {}]   ;;  %s9802_s0 = inlined_call_operand.vmem [shape: bf16[4096,128], index: 0, kind: input, shape index: {}]   ;;  %s9803_s2 = inlined_call_operand.vmem [shape: f32[1,128], index: 2, kind: input, shape index: {}]   ;;  %s9804_s3 = inlined_call_operand.vmem [shape: f32[16,128], index: 3, kind: output, shape index: {}]  }
   0x1   :  { %v8077_v0 = vld [vmem:[%s9801_s1] sm:$0xff]   ;;  %v8082_v1 = vld [vmem:[%s9801_s1 + $0x8] sm:$0xff]   ;;  %v8093_v2 = vld [vmem:[%s9801_s1 + $0x10] sm:$0xff]  }
   0x2   :  { %6994 = vmatprep.subr.bf16.mxu0 %v8077_v0  ;;  %7042 = vmatprep.subr.bf16.mxu1 %v8077_v0  ;;  %v8100_v3 = vld [vmem:[%s9801_s1 + $0x18] sm:$0xff]   ;;  %v7770_v4 = vld [vmem:[%s9802_s0] sm:$0xff]   ;;  %v8126_v7 = vld [vmem:[%s9801_s1 + $0x28] sm:$0xff]  }
   0x3   :  { %6995 = vmatpush3.bf16.msra.mxu0 %v8077_v0  ;;  %7043 = vmatpush3.bf16.msra.mxu1 %v8077_v0  ;;  %v7771_v5 = vld [vmem:[%s9802_s0 + $0x80] sm:$0xff]   ;;  %v8135_v8 = vld [vmem:[%s9801_s1 + $0x30] sm:$0xff]   ;;  %v8144_v9 = vld [vmem:[%s9801_s1 + $0x38] sm:$0xff]  }
   0x4   :  { %6996 = vmatprep.subr.bf16.mxu0 %v8082_v1  ;;  %7044 = vmatprep.subr.bf16.mxu1 %v8082_v1  ;;  %v8117_v6 = vld [vmem:[%s9801_s1 + $0x20] sm:$0xff]   ;;  %v7772_v10 = vld [vmem:[%s9802_s0 + $0x8] sm:$0xff]   ;;  %v7774_v12 = vld [vmem:[%s9802_s0 + $0x10] sm:$0xff]  }
   0x5   :  { %7010 = vmatprep.mubr.bf16.mxu0 %v7770_v4  ;;  %7058 = vmatprep.mubr.bf16.mxu1 %v7771_v5  ;;  %v7773_v11 = vld [vmem:[%s9802_s0 + $0x88] sm:$0xff]   ;;  %v7775_v13 = vld [vmem:[%s9802_s0 + $0x90] sm:$0xff]   ;;  %v7776_v14 = vld [vmem:[%s9802_s0 + $0x18] sm:$0xff]  }
   0x6   :  { %v7777_v15 = vld [vmem:[%s9802_s0 + $0x98] sm:$0xff]   ;;  %v7778_v16 = vld [vmem:[%s9802_s0 + $0x20] sm:$0xff]   ;;  %v7780_v18 = vld [vmem:[%s9802_s0 + $0x28] sm:$0xff]  }
   0x7   :  { %6997 = vmatpush3.bf16.msra.mxu0 %v8082_v1  ;;  %7045 = vmatpush3.bf16.msra.mxu1 %v8082_v1  ;;  %v7779_v17 = vld [vmem:[%s9802_s0 + $0xa0] sm:$0xff]   ;;  %v7781_v19 = vld [vmem:[%s9802_s0 + $0xa8] sm:$0xff]   ;;  %v7782_v20 = vld [vmem:[%s9802_s0 + $0x30] sm:$0xff]  }
   0x8   :  { %6998 = vmatprep.subr.bf16.mxu0 %v8093_v2  ;;  %7046 = vmatprep.subr.bf16.mxu1 %v8093_v2  ;;  %v7783_v21 = vld [vmem:[%s9802_s0 + $0xb0] sm:$0xff]   ;;  %v7784_v22 = vld [vmem:[%s9802_s0 + $0x38] sm:$0xff]   ;;  %v7786_v24 = vld [vmem:[%s9802_s0 + $0x40] sm:$0xff]  }
   0x9   :  { %v7785_v23 = vld [vmem:[%s9802_s0 + $0xb8] sm:$0xff]   ;;  %v7787_v25 = vld [vmem:[%s9802_s0 + $0xc0] sm:$0xff]   ;;  %v7788_v26 = vld [vmem:[%s9802_s0 + $0x48] sm:$0xff]  }
   0xa   :  { %v7789_v27 = vld [vmem:[%s9802_s0 + $0xc8] sm:$0xff]   ;;  %v7790_v28 = vld [vmem:[%s9802_s0 + $0x50] sm:$0xff]   ;;  %v7792_v30 = vld [vmem:[%s9802_s0 + $0x58] sm:$0xff]  }
   0xb   :  { %6999 = vmatpush3.bf16.msra.mxu0 %v8093_v2  ;;  %7047 = vmatpush3.bf16.msra.mxu1 %v8093_v2  ;;  %v7791_v29 = vld [vmem:[%s9802_s0 + $0xd0] sm:$0xff]   ;;  %v7793_v31 = vld [vmem:[%s9802_s0 + $0xd8] sm:$0xff]   ;;  %v7794_v32 = vld [vmem:[%s9802_s0 + $0x60] sm:$0xff]  }
   0xc   :  { %7000 = vmatprep.subr.bf16.mxu0 %v8100_v3  ;;  %7048 = vmatprep.subr.bf16.mxu1 %v8100_v3  ;;  %v7795_v33 = vld [vmem:[%s9802_s0 + $0xe0] sm:$0xff]   ;;  %v7796_v34 = vld [vmem:[%s9802_s0 + $0x68] sm:$0xff]   ;;  %v7798_v36 = vld [vmem:[%s9802_s0 + $0x70] sm:$0xff]  }
   0xd   :  { %v7797_v35 = vld [vmem:[%s9802_s0 + $0xe8] sm:$0xff]   ;;  %v7799_v37 = vld [vmem:[%s9802_s0 + $0xf0] sm:$0xff]   ;;  %v7800_v38 = vld [vmem:[%s9802_s0 + $0x78] sm:$0xff]  }
   0xe   :  { %v7801_v39 = vld [vmem:[%s9802_s0 + $0xf8] sm:$0xff]   ;;  %v7802_v40 = vld [vmem:[%s9802_s0 + $0x100] sm:$0xff]   ;;  %v7804_v42 = vld [vmem:[%s9802_s0 + $0x108] sm:$0xff]  }
   0xf   :  { %7001 = vmatpush3.bf16.msra.mxu0 %v8100_v3  ;;  %7049 = vmatpush3.bf16.msra.mxu1 %v8100_v3  ;;  %v7803_v41 = vld [vmem:[%s9802_s0 + $0x180] sm:$0xff]   ;;  %v7805_v43 = vld [vmem:[%s9802_s0 + $0x188] sm:$0xff]   ;;  %v7806_v44 = vld [vmem:[%s9802_s0 + $0x110] sm:$0xff]  }
  0x10   :  { %7002 = vmatprep.subr.bf16.mxu0 %v8117_v6  ;;  %7050 = vmatprep.subr.bf16.mxu1 %v8117_v6  ;;  %v7807_v45 = vld [vmem:[%s9802_s0 + $0x190] sm:$0xff]   ;;  %v7808_v46 = vld [vmem:[%s9802_s0 + $0x118] sm:$0xff]   ;;  %v7810_v48 = vld [vmem:[%s9802_s0 + $0x120] sm:$0xff]  }
  0x11   :  { %v7809_v47 = vld [vmem:[%s9802_s0 + $0x198] sm:$0xff]   ;;  %v7811_v49 = vld [vmem:[%s9802_s0 + $0x1a0] sm:$0xff]   ;;  %v7812_v50 = vld [vmem:[%s9802_s0 + $0x128] sm:$0xff]  }
  0x12   :  { %v7813_v51 = vld [vmem:[%s9802_s0 + $0x1a8] sm:$0xff]   ;;  %v7814_v52 = vld [vmem:[%s9802_s0 + $0x130] sm:$0xff]   ;;  %v7816_v54 = vld [vmem:[%s9802_s0 + $0x138] sm:$0xff]  }
  0x13   :  { %7003 = vmatpush3.bf16.msra.mxu0 %v8117_v6  ;;  %7051 = vmatpush3.bf16.msra.mxu1 %v8117_v6  ;;  %v7815_v53 = vld [vmem:[%s9802_s0 + $0x1b0] sm:$0xff]   ;;  %v7817_v55 = vld [vmem:[%s9802_s0 + $0x1b8] sm:$0xff]   ;;  %v7818_v56 = vld [vmem:[%s9802_s0 + $0x140] sm:$0xff]  }
  0x14   :  { %7004 = vmatprep.subr.bf16.mxu0 %v8126_v7  ;;  %7052 = vmatprep.subr.bf16.mxu1 %v8126_v7  ;;  %v7819_v57 = vld [vmem:[%s9802_s0 + $0x1c0] sm:$0xff]   ;;  %v7820_v58 = vld [vmem:[%s9802_s0 + $0x148] sm:$0xff]   ;;  %v7822_v60 = vld [vmem:[%s9802_s0 + $0x150] sm:$0xff]  }
  0x15   :  { %v7821_v59 = vld [vmem:[%s9802_s0 + $0x1c8] sm:$0xff]   ;;  %v7823_v61 = vld [vmem:[%s9802_s0 + $0x1d0] sm:$0xff]   ;;  %v7824_v62 = vld [vmem:[%s9802_s0 + $0x158] sm:$0xff]  }
  0x16   :  { %v7825_v63 = vld [vmem:[%s9802_s0 + $0x1d8] sm:$0xff]   ;;  %v7830_v4 = vld [vmem:[%s9802_s0 + $0x170] sm:$0xff]  }
  0x17   :  { %7005 = vmatpush3.bf16.msra.mxu0 %v8126_v7  ;;  %7053 = vmatpush3.bf16.msra.mxu1 %v8126_v7  ;;  %v7831_v5 = vld [vmem:[%s9802_s0 + $0x1f0] sm:$0xff]  }
  0x18   :  { %7006 = vmatprep.subr.bf16.mxu0 %v8135_v8  ;;  %7054 = vmatprep.subr.bf16.mxu1 %v8135_v8 }
  0x1b   :  { %7007 = vmatpush3.bf16.msra.mxu0 %v8135_v8  ;;  %7055 = vmatpush3.bf16.msra.mxu1 %v8135_v8 }
  0x1c   :  { %7008 = vmatprep.subr.bf16.mxu0 %v8144_v9  ;;  %7056 = vmatprep.subr.bf16.mxu1 %v8144_v9 }
  0x1f   :  { %7009 = vmatpush3.bf16.msra.mxu0 %v8144_v9  ;;  %7057 = vmatpush3.bf16.msra.mxu1 %v8144_v9 }
  0x20   :  { %7090 = vmatprep.subr.bf16.mxu0 %v8077_v0  ;;  %7138 = vmatprep.subr.bf16.mxu1 %v8077_v0 }
  0x22   :  { %7011 = vmatmul.mubr.bf16.vlgmr.msra.gmra.mrb[0].mxu0 %v7772_v10  ;;  %7059 = vmatmul.mubr.bf16.vlgmr.msra.gmra.mrb[0].mxu1 %v7773_v11  ;;  %v7836_v10 = vld [vmem:[%s9802_s0 + $0x208] sm:$0xff]  }
  0x23   :  { %7091 = vmatpush3.bf16.msra.mxu0 %v8077_v0  ;;  %7139 = vmatpush3.bf16.msra.mxu1 %v8077_v0  ;;  %v7837_v11 = vld [vmem:[%s9802_s0 + $0x288] sm:$0xff]  }
  0x24   :  { %7014 = vmatprep.mubr.bf16.mxu0 %v7774_v12  ;;  %7062 = vmatprep.mubr.bf16.mxu1 %v7775_v13  ;;  %v7838_v12 = vld [vmem:[%s9802_s0 + $0x210] sm:$0xff]  }
  0x25   :  { %7092 = vmatprep.subr.bf16.mxu0 %v8082_v1  ;;  %7140 = vmatprep.subr.bf16.mxu1 %v8082_v1  ;;  %v7839_v13 = vld [vmem:[%s9802_s0 + $0x290] sm:$0xff]  }
  0x27   :  { %7093 = vmatpush3.bf16.msra.mxu0 %v8082_v1  ;;  %7141 = vmatpush3.bf16.msra.mxu1 %v8082_v1 }
  0x28   :  { %7094 = vmatprep.subr.bf16.mxu0 %v8093_v2  ;;  %7142 = vmatprep.subr.bf16.mxu1 %v8093_v2 }
  0x2a   :  { %7015 = vmatmul.mubr.bf16.gmra.mrb[4].mxu0 %v7776_v14  ;;  %7063 = vmatmul.mubr.bf16.gmra.mrb[4].mxu1 %v7777_v15  ;;  %v8425_v14 = vld [vmem:[%s9801_s1] sm:$0xff]   ;;  %v7840_v15 = vld [vmem:[%s9802_s0 + $0x218] sm:$0xff]  }
  0x2b   :  { %7018 = vmatprep.mubr.bf16.mxu0 %v7778_v16  ;;  %7066 = vmatprep.mubr.bf16.mxu1 %v7779_v17  ;;  %v7841_v16 = vld [vmem:[%s9802_s0 + $0x298] sm:$0xff]   ;;  %v8438_v17 = vld [vmem:[%s9801_s1 + $0x8] sm:$0xff]  }
  0x2c   :  { %7095 = vmatpush3.bf16.msra.mxu0 %v8093_v2  ;;  %7143 = vmatpush3.bf16.msra.mxu1 %v8093_v2 }
  0x2d   :  { %7096 = vmatprep.subr.bf16.mxu0 %v8100_v3  ;;  %7144 = vmatprep.subr.bf16.mxu1 %v8100_v3 }
  0x30   :  { %7097 = vmatpush3.bf16.msra.mxu0 %v8100_v3  ;;  %7145 = vmatpush3.bf16.msra.mxu1 %v8100_v3 }
  0x31   :  { %7098 = vmatprep.subr.bf16.mxu0 %v8117_v6  ;;  %7146 = vmatprep.subr.bf16.mxu1 %v8117_v6 }
  0x32   :  { %7019 = vmatmul.mubr.bf16.gmra.mrb[8].mxu0 %v7780_v18  ;;  %7067 = vmatmul.mubr.bf16.gmra.mrb[8].mxu1 %v7781_v19  ;;  %v7842_v18 = vld [vmem:[%s9802_s0 + $0x220] sm:$0xff]  }
  0x33   :  { %7022 = vmatprep.mubr.bf16.mxu0 %v7782_v20  ;;  %7070 = vmatprep.mubr.bf16.mxu1 %v7783_v21  ;;  %v7843_v19 = vld [vmem:[%s9802_s0 + $0x2a0] sm:$0xff]   ;;  %v8453_v20 = vld [vmem:[%s9801_s1 + $0x10] sm:$0xff]   ;;  %v7844_v21 = vld [vmem:[%s9802_s0 + $0x228] sm:$0xff]  }
  0x34   :  { %7099 = vmatpush3.bf16.msra.mxu0 %v8117_v6  ;;  %7147 = vmatpush3.bf16.msra.mxu1 %v8117_v6 }
  0x35   :  { %7100 = vmatprep.subr.bf16.mxu0 %v8126_v7  ;;  %7148 = vmatprep.subr.bf16.mxu1 %v8126_v7 }
  0x38   :  { %7101 = vmatpush3.bf16.msra.mxu0 %v8126_v7  ;;  %7149 = vmatpush3.bf16.msra.mxu1 %v8126_v7 }
  0x39   :  { %7102 = vmatprep.subr.bf16.mxu0 %v8135_v8  ;;  %7150 = vmatprep.subr.bf16.mxu1 %v8135_v8 }
  0x3a   :  { %7023 = vmatmul.mubr.bf16.gmra.mrb[12].mxu0 %v7784_v22  ;;  %7071 = vmatmul.mubr.bf16.gmra.mrb[12].mxu1 %v7785_v23  ;;  %v7845_v22 = vld [vmem:[%s9802_s0 + $0x2a8] sm:$0xff]   ;;  %v7846_v23 = vld [vmem:[%s9802_s0 + $0x230] sm:$0xff]  }
  0x3b   :  { %7026 = vmatprep.mubr.bf16.mxu0 %v7786_v24  ;;  %7074 = vmatprep.mubr.bf16.mxu1 %v7787_v25  ;;  %v7847_v24 = vld [vmem:[%s9802_s0 + $0x2b0] sm:$0xff]   ;;  %v8474_v25 = vld [vmem:[%s9801_s1 + $0x18] sm:$0xff]  }
  0x3c   :  { %7103 = vmatpush3.bf16.msra.mxu0 %v8135_v8  ;;  %7151 = vmatpush3.bf16.msra.mxu1 %v8135_v8 }
  0x3d   :  { %7104 = vmatprep.subr.bf16.mxu0 %v8144_v9  ;;  %7152 = vmatprep.subr.bf16.mxu1 %v8144_v9 }
  0x40   :  { %7105 = vmatpush3.bf16.msra.mxu0 %v8144_v9  ;;  %7153 = vmatpush3.bf16.msra.mxu1 %v8144_v9 }
  0x41   :  { %7186 = vmatprep.subr.bf16.mxu0 %v8077_v0  ;;  %7234 = vmatprep.subr.bf16.mxu1 %v8077_v0 }
  0x42   :  { %7027 = vmatmul.mubr.bf16.gmra.mrb[16].mxu0 %v7788_v26  ;;  %7075 = vmatmul.mubr.bf16.gmra.mrb[16].mxu1 %v7789_v27  ;;  %v8483_v26 = vld [vmem:[%s9801_s1 + $0x20] sm:$0xff]   ;;  %v7848_v27 = vld [vmem:[%s9802_s0 + $0x238] sm:$0xff]  }
  0x43   :  { %7030 = vmatprep.mubr.bf16.mxu0 %v7790_v28  ;;  %7078 = vmatprep.mubr.bf16.mxu1 %v7791_v29  ;;  %v7849_v28 = vld [vmem:[%s9802_s0 + $0x2b8] sm:$0xff]   ;;  %v7850_v29 = vld [vmem:[%s9802_s0 + $0x240] sm:$0xff]  }
  0x4a   :  { %7031 = vmatmul.mubr.bf16.gmra.mrb[20].mxu0 %v7792_v30  ;;  %7079 = vmatmul.mubr.bf16.gmra.mrb[20].mxu1 %v7793_v31  ;;  %v7851_v30 = vld [vmem:[%s9802_s0 + $0x2c0] sm:$0xff]   ;;  %v8504_v31 = vld [vmem:[%s9801_s1 + $0x28] sm:$0xff]  }
  0x4b   :  { %7034 = vmatprep.mubr.bf16.mxu0 %v7794_v32  ;;  %7082 = vmatprep.mubr.bf16.mxu1 %v7795_v33  ;;  %v8513_v32 = vld [vmem:[%s9801_s1 + $0x30] sm:$0xff]   ;;  %v7852_v33 = vld [vmem:[%s9802_s0 + $0x248] sm:$0xff]  }
  0x52   :  { %7035 = vmatmul.mubr.bf16.gmra.mrb[24].mxu0 %v7796_v34  ;;  %7083 = vmatmul.mubr.bf16.gmra.mrb[24].mxu1 %v7797_v35  ;;  %v7853_v34 = vld [vmem:[%s9802_s0 + $0x2c8] sm:$0xff]   ;;  %v7854_v35 = vld [vmem:[%s9802_s0 + $0x250] sm:$0xff]  }
  0x53   :  { %7038 = vmatprep.mubr.bf16.mxu0 %v7798_v36  ;;  %7086 = vmatprep.mubr.bf16.mxu1 %v7799_v37  ;;  %v7855_v36 = vld [vmem:[%s9802_s0 + $0x2d0] sm:$0xff]   ;;  %v8534_v37 = vld [vmem:[%s9801_s1 + $0x38] sm:$0xff]  }
  0x5a   :  { %7039 = vmatmul.mubr.bf16.gmra.mrb[28].mxu0 %v7800_v38  ;;  %7087 = vmatmul.mubr.bf16.gmra.mrb[28].mxu1 %v7801_v39  ;;  %v7856_v38 = vld [vmem:[%s9802_s0 + $0x258] sm:$0xff]  }
  0x5b   :  { %7106 = vmatprep.mubr.bf16.mxu0 %v7802_v40  ;;  %7154 = vmatprep.mubr.bf16.mxu1 %v7803_v41  ;;  %v7857_v39 = vld [vmem:[%s9802_s0 + $0x2d8] sm:$0xff]   ;;  %v7858_v40 = vld [vmem:[%s9802_s0 + $0x260] sm:$0xff]  }
  0x5c   :  { %v7859_v41 = vld [vmem:[%s9802_s0 + $0x2e0] sm:$0xff]  }
  0x62   :  { %7107 = vmatmul.mubr.bf16.vlgmr.msra.gmra.mrb[32].mxu0 %v7804_v42  ;;  %7155 = vmatmul.mubr.bf16.vlgmr.msra.gmra.mrb[32].mxu1 %v7805_v43  ;;  %v7860_v42 = vld [vmem:[%s9802_s0 + $0x268] sm:$0xff]  }
  0x63   :  { %7187 = vmatpush3.bf16.msra.mxu0 %v8077_v0  ;;  %7235 = vmatpush3.bf16.msra.mxu1 %v8077_v0  ;;  %v7861_v43 = vld [vmem:[%s9802_s0 + $0x2e8] sm:$0xff]  }
  0x64   :  { %7110 = vmatprep.mubr.bf16.mxu0 %v7806_v44  ;;  %7158 = vmatprep.mubr.bf16.mxu1 %v7807_v45  ;;  %v7862_v44 = vld [vmem:[%s9802_s0 + $0x270] sm:$0xff]  }
  0x65   :  { %7188 = vmatprep.subr.bf16.mxu0 %v8082_v1  ;;  %7236 = vmatprep.subr.bf16.mxu1 %v8082_v1  ;;  %v7863_v45 = vld [vmem:[%s9802_s0 + $0x2f0] sm:$0xff]  }
  0x67   :  { %7189 = vmatpush3.bf16.msra.mxu0 %v8082_v1  ;;  %7237 = vmatpush3.bf16.msra.mxu1 %v8082_v1  ;;  %v7826_v1 = vld [vmem:[%s9802_s0 + $0x160] sm:$0xff]  }
  0x68   :  { %7190 = vmatprep.subr.bf16.mxu0 %v8093_v2  ;;  %7238 = vmatprep.subr.bf16.mxu1 %v8093_v2 }
  0x6a   :  { %7111 = vmatmul.mubr.bf16.gmra.mrb[36].mxu0 %v7808_v46  ;;  %7159 = vmatmul.mubr.bf16.gmra.mrb[36].mxu1 %v7809_v47  ;;  %v7864_v46 = vld [vmem:[%s9802_s0 + $0x278] sm:$0xff]  }
  0x6b   :  { %7114 = vmatprep.mubr.bf16.mxu0 %v7810_v48  ;;  %7162 = vmatprep.mubr.bf16.mxu1 %v7811_v49  ;;  %v7865_v47 = vld [vmem:[%s9802_s0 + $0x2f8] sm:$0xff]   ;;  %v7866_v48 = vld [vmem:[%s9802_s0 + $0x300] sm:$0xff]  }
  0x6c   :  { %7191 = vmatpush3.bf16.msra.mxu0 %v8093_v2  ;;  %7239 = vmatpush3.bf16.msra.mxu1 %v8093_v2  ;;  %v7828_v2 = vld [vmem:[%s9802_s0 + $0x168] sm:$0xff]   ;;  %v7867_v49 = vld [vmem:[%s9802_s0 + $0x380] sm:$0xff]  }
  0x6d   :  { %7192 = vmatprep.subr.bf16.mxu0 %v8100_v3  ;;  %7240 = vmatprep.subr.bf16.mxu1 %v8100_v3 }
  0x70   :  { %7193 = vmatpush3.bf16.msra.mxu0 %v8100_v3  ;;  %7241 = vmatpush3.bf16.msra.mxu1 %v8100_v3  ;;  %v7829_v3 = vld [vmem:[%s9802_s0 + $0x1e8] sm:$0xff]  }
  0x71   :  { %7194 = vmatprep.subr.bf16.mxu0 %v8117_v6  ;;  %7242 = vmatprep.subr.bf16.mxu1 %v8117_v6 }
  0x72   :  { %7115 = vmatmul.mubr.bf16.gmra.mrb[40].mxu0 %v7812_v50  ;;  %7163 = vmatmul.mubr.bf16.gmra.mrb[40].mxu1 %v7813_v51  ;;  %v7868_v50 = vld [vmem:[%s9802_s0 + $0x308] sm:$0xff]  }
  0x73   :  { %7118 = vmatprep.mubr.bf16.mxu0 %v7814_v52  ;;  %7166 = vmatprep.mubr.bf16.mxu1 %v7815_v53  ;;  %v7869_v51 = vld [vmem:[%s9802_s0 + $0x388] sm:$0xff]   ;;  %v7870_v52 = vld [vmem:[%s9802_s0 + $0x310] sm:$0xff]  }
  0x74   :  { %7195 = vmatpush3.bf16.msra.mxu0 %v8117_v6  ;;  %7243 = vmatpush3.bf16.msra.mxu1 %v8117_v6  ;;  %v7832_v6 = vld [vmem:[%s9802_s0 + $0x178] sm:$0xff]   ;;  %v7871_v53 = vld [vmem:[%s9802_s0 + $0x390] sm:$0xff]  }
  0x75   :  { %7196 = vmatprep.subr.bf16.mxu0 %v8126_v7  ;;  %7244 = vmatprep.subr.bf16.mxu1 %v8126_v7 }
  0x78   :  { %7197 = vmatpush3.bf16.msra.mxu0 %v8126_v7  ;;  %7245 = vmatpush3.bf16.msra.mxu1 %v8126_v7  ;;  %v7833_v7 = vld [vmem:[%s9802_s0 + $0x1f8] sm:$0xff]  }
  0x79   :  { %7198 = vmatprep.subr.bf16.mxu0 %v8135_v8  ;;  %7246 = vmatprep.subr.bf16.mxu1 %v8135_v8 }
  0x7a   :  { %7119 = vmatmul.mubr.bf16.gmra.mrb[44].mxu0 %v7816_v54  ;;  %7167 = vmatmul.mubr.bf16.gmra.mrb[44].mxu1 %v7817_v55  ;;  %v7872_v54 = vld [vmem:[%s9802_s0 + $0x318] sm:$0xff]  }
  0x7b   :  { %7122 = vmatprep.mubr.bf16.mxu0 %v7818_v56  ;;  %7170 = vmatprep.mubr.bf16.mxu1 %v7819_v57  ;;  %v7873_v55 = vld [vmem:[%s9802_s0 + $0x398] sm:$0xff]   ;;  %v7874_v56 = vld [vmem:[%s9802_s0 + $0x320] sm:$0xff]  }
  0x7c   :  { %7199 = vmatpush3.bf16.msra.mxu0 %v8135_v8  ;;  %7247 = vmatpush3.bf16.msra.mxu1 %v8135_v8  ;;  %v7834_v8 = vld [vmem:[%s9802_s0 + $0x200] sm:$0xff]  }
  0x7d   :  { %7200 = vmatprep.subr.bf16.mxu0 %v8144_v9  ;;  %7248 = vmatprep.subr.bf16.mxu1 %v8144_v9  ;;  %v7875_v57 = vld [vmem:[%s9802_s0 + $0x3a0] sm:$0xff]  }
  0x80   :  { %7201 = vmatpush3.bf16.msra.mxu0 %v8144_v9  ;;  %7249 = vmatpush3.bf16.msra.mxu1 %v8144_v9  ;;  %v7835_v9 = vld [vmem:[%s9802_s0 + $0x280] sm:$0xff]  }
  0x81   :  { %7282 = vmatprep.subr.bf16.mxu0 %v8077_v0  ;;  %7330 = vmatprep.subr.bf16.mxu1 %v8077_v0  ;;  %v7827_v0 = vld [vmem:[%s9802_s0 + $0x1e0] sm:$0xff]  }
  0x82   :  { %7123 = vmatmul.mubr.bf16.gmra.mrb[48].mxu0 %v7820_v58  ;;  %7171 = vmatmul.mubr.bf16.gmra.mrb[48].mxu1 %v7821_v59  ;;  %v7876_v58 = vld [vmem:[%s9802_s0 + $0x328] sm:$0xff]  }
  0x83   :  { %7126 = vmatprep.mubr.bf16.mxu0 %v7822_v60  ;;  %7174 = vmatprep.mubr.bf16.mxu1 %v7823_v61  ;;  %v7877_v59 = vld [vmem:[%s9802_s0 + $0x3a8] sm:$0xff]   ;;  %v7878_v60 = vld [vmem:[%s9802_s0 + $0x330] sm:$0xff]  }
  0x84   :  { %v7879_v61 = vld [vmem:[%s9802_s0 + $0x3b0] sm:$0xff]  }
  0x8a   :  { %7127 = vmatmul.mubr.bf16.gmra.mrb[52].mxu0 %v7824_v62  ;;  %7175 = vmatmul.mubr.bf16.gmra.mrb[52].mxu1 %v7825_v63  ;;  %v8633_v62 = vld [vmem:[%s9803_s2] ss:$0 sm:$0xff] }
  0x8b   :  { %7130 = vmatprep.mubr.bf16.mxu0 %v7826_v1  ;;  %7178 = vmatprep.mubr.bf16.mxu1 %v7827_v0 }
  0x92   :  { %7131 = vmatmul.mubr.bf16.gmra.mrb[56].mxu0 %v7828_v2  ;;  %7179 = vmatmul.mubr.bf16.gmra.mrb[56].mxu1 %v7829_v3  ;;  %v7880_v3 = vld [vmem:[%s9802_s0 + $0x338] sm:$0xff]  }
  0x93   :  { %7134 = vmatprep.mubr.bf16.mxu0 %v7830_v4  ;;  %7182 = vmatprep.mubr.bf16.mxu1 %v7831_v5  ;;  %v7881_v4 = vld [vmem:[%s9802_s0 + $0x3b8] sm:$0xff]  }
  0x9a   :  { %7135 = vmatmul.mubr.bf16.gmra.mrb[60].mxu0 %v7832_v6  ;;  %7183 = vmatmul.mubr.bf16.gmra.mrb[60].mxu1 %v7833_v7 }
  0x9b   :  { %7202 = vmatprep.mubr.bf16.mxu0 %v7834_v8  ;;  %7250 = vmatprep.mubr.bf16.mxu1 %v7835_v9  ;;  %v7882_v9 = vld [vmem:[%s9802_s0 + $0x340] sm:$0xff]  }
  0xa2   :  { %7203 = vmatmul.mubr.bf16.vlgmr.msra.gmra.mrb[64].mxu0 %v7836_v10  ;;  %7251 = vmatmul.mubr.bf16.vlgmr.msra.gmra.mrb[64].mxu1 %v7837_v11  ;;  %v7883_v10 = vld [vmem:[%s9802_s0 + $0x3c0] sm:$0xff]  }
  0xa3   :  { %7283 = vmatpush3.bf16.msra.mxu0 %v8425_v14  ;;  %7331 = vmatpush3.bf16.msra.mxu1 %v8425_v14 }
  0xa4   :  { %7206 = vmatprep.mubr.bf16.mxu0 %v7838_v12  ;;  %7254 = vmatprep.mubr.bf16.mxu1 %v7839_v13 }
  0xa5   :  { %7284 = vmatprep.subr.bf16.mxu0 %v8438_v17  ;;  %7332 = vmatprep.subr.bf16.mxu1 %v8438_v17 }
  0xa7   :  { %7285 = vmatpush3.bf16.msra.mxu0 %v8438_v17  ;;  %7333 = vmatpush3.bf16.msra.mxu1 %v8438_v17 }
  0xa8   :  { %7286 = vmatprep.subr.bf16.mxu0 %v8453_v20  ;;  %7334 = vmatprep.subr.bf16.mxu1 %v8453_v20 }
  0xaa   :  { %7207 = vmatmul.mubr.bf16.gmra.mrb[68].mxu0 %v7840_v15  ;;  %7255 = vmatmul.mubr.bf16.gmra.mrb[68].mxu1 %v7841_v16 }
  0xab   :  { %7210 = vmatprep.mubr.bf16.mxu0 %v7842_v18  ;;  %7258 = vmatprep.mubr.bf16.mxu1 %v7843_v19 }
  0xac   :  { %7287 = vmatpush3.bf16.msra.mxu0 %v8453_v20  ;;  %7335 = vmatpush3.bf16.msra.mxu1 %v8453_v20 }
  0xad   :  { %7288 = vmatprep.subr.bf16.mxu0 %v8474_v25  ;;  %7336 = vmatprep.subr.bf16.mxu1 %v8474_v25 }
  0xb0   :  { %7289 = vmatpush3.bf16.msra.mxu0 %v8474_v25  ;;  %7337 = vmatpush3.bf16.msra.mxu1 %v8474_v25 }
  0xb1   :  { %7290 = vmatprep.subr.bf16.mxu0 %v8483_v26  ;;  %7338 = vmatprep.subr.bf16.mxu1 %v8483_v26 }
  0xb2   :  { %7211 = vmatmul.mubr.bf16.gmra.mrb[72].mxu0 %v7844_v21  ;;  %7259 = vmatmul.mubr.bf16.gmra.mrb[72].mxu1 %v7845_v22 }
  0xb3   :  { %7214 = vmatprep.mubr.bf16.mxu0 %v7846_v23  ;;  %7262 = vmatprep.mubr.bf16.mxu1 %v7847_v24 }
  0xb4   :  { %7291 = vmatpush3.bf16.msra.mxu0 %v8483_v26  ;;  %7339 = vmatpush3.bf16.msra.mxu1 %v8483_v26 }
  0xb5   :  { %7292 = vmatprep.subr.bf16.mxu0 %v8504_v31  ;;  %7340 = vmatprep.subr.bf16.mxu1 %v8504_v31 }
  0xb8   :  { %7293 = vmatpush3.bf16.msra.mxu0 %v8504_v31  ;;  %7341 = vmatpush3.bf16.msra.mxu1 %v8504_v31 }
  0xb9   :  { %7294 = vmatprep.subr.bf16.mxu0 %v8513_v32  ;;  %7342 = vmatprep.subr.bf16.mxu1 %v8513_v32 }
  0xba   :  { %7215 = vmatmul.mubr.bf16.gmra.mrb[76].mxu0 %v7848_v27  ;;  %7263 = vmatmul.mubr.bf16.gmra.mrb[76].mxu1 %v7849_v28 }
  0xbb   :  { %7218 = vmatprep.mubr.bf16.mxu0 %v7850_v29  ;;  %7266 = vmatprep.mubr.bf16.mxu1 %v7851_v30 }
  0xbc   :  { %7295 = vmatpush3.bf16.msra.mxu0 %v8513_v32  ;;  %7343 = vmatpush3.bf16.msra.mxu1 %v8513_v32 }
  0xbd   :  { %7296 = vmatprep.subr.bf16.mxu0 %v8534_v37  ;;  %7344 = vmatprep.subr.bf16.mxu1 %v8534_v37 }
  0xc0   :  { %7297 = vmatpush3.bf16.msra.mxu0 %v8534_v37  ;;  %7345 = vmatpush3.bf16.msra.mxu1 %v8534_v37 }
  0xc1   :  { %7378 = vmatprep.subr.bf16.mxu0 %v8425_v14  ;;  %7426 = vmatprep.subr.bf16.mxu1 %v8425_v14 }
  0xc2   :  { %7219 = vmatmul.mubr.bf16.gmra.mrb[80].mxu0 %v7852_v33  ;;  %7267 = vmatmul.mubr.bf16.gmra.mrb[80].mxu1 %v7853_v34 }
  0xc3   :  { %7222 = vmatprep.mubr.bf16.mxu0 %v7854_v35  ;;  %7270 = vmatprep.mubr.bf16.mxu1 %v7855_v36  ;;  %v7884_v35 = vld [vmem:[%s9802_s0 + $0x348] sm:$0xff]  }
  0xca   :  { %7223 = vmatmul.mubr.bf16.gmra.mrb[84].mxu0 %v7856_v38  ;;  %7271 = vmatmul.mubr.bf16.gmra.mrb[84].mxu1 %v7857_v39 }
  0xcb   :  { %7226 = vmatprep.mubr.bf16.mxu0 %v7858_v40  ;;  %7274 = vmatprep.mubr.bf16.mxu1 %v7859_v41 }
  0xd2   :  { %7227 = vmatmul.mubr.bf16.gmra.mrb[88].mxu0 %v7860_v42  ;;  %7275 = vmatmul.mubr.bf16.gmra.mrb[88].mxu1 %v7861_v43  ;;  %v7886_v43 = vld [vmem:[%s9802_s0 + $0x350] sm:$0xff]  }
  0xd3   :  { %7230 = vmatprep.mubr.bf16.mxu0 %v7862_v44  ;;  %7278 = vmatprep.mubr.bf16.mxu1 %v7863_v45  ;;  %v7887_v44 = vld [vmem:[%s9802_s0 + $0x3d0] sm:$0xff]  }
  0xda   :  { %7231 = vmatmul.mubr.bf16.gmra.mrb[92].mxu0 %v7864_v46  ;;  %7279 = vmatmul.mubr.bf16.gmra.mrb[92].mxu1 %v7865_v47 }
  0xdb   :  { %7298 = vmatprep.mubr.bf16.mxu0 %v7866_v48  ;;  %7346 = vmatprep.mubr.bf16.mxu1 %v7867_v49 }
  0xe2   :  { %7299 = vmatmul.mubr.bf16.vlgmr.msra.gmra.mrb[96].mxu0 %v7868_v50  ;;  %7347 = vmatmul.mubr.bf16.vlgmr.msra.gmra.mrb[96].mxu1 %v7869_v51 }
  0xe3   :  { %7379 = vmatpush3.bf16.msra.mxu0 %v8425_v14  ;;  %7427 = vmatpush3.bf16.msra.mxu1 %v8425_v14 }
  0xe4   :  { %7302 = vmatprep.mubr.bf16.mxu0 %v7870_v52  ;;  %7350 = vmatprep.mubr.bf16.mxu1 %v7871_v53 }
  0xe5   :  { %7380 = vmatprep.subr.bf16.mxu0 %v8438_v17  ;;  %7428 = vmatprep.subr.bf16.mxu1 %v8438_v17 }
  0xe7   :  { %7381 = vmatpush3.bf16.msra.mxu0 %v8438_v17  ;;  %7429 = vmatpush3.bf16.msra.mxu1 %v8438_v17 }
  0xe8   :  { %7382 = vmatprep.subr.bf16.mxu0 %v8453_v20  ;;  %7430 = vmatprep.subr.bf16.mxu1 %v8453_v20 }
  0xea   :  { %7303 = vmatmul.mubr.bf16.gmra.mrb[100].mxu0 %v7872_v54  ;;  %7351 = vmatmul.mubr.bf16.gmra.mrb[100].mxu1 %v7873_v55 }
  0xeb   :  { %7306 = vmatprep.mubr.bf16.mxu0 %v7874_v56  ;;  %7354 = vmatprep.mubr.bf16.mxu1 %v7875_v57 }
  0xec   :  { %7383 = vmatpush3.bf16.msra.mxu0 %v8453_v20  ;;  %7431 = vmatpush3.bf16.msra.mxu1 %v8453_v20 }
  0xed   :  { %7384 = vmatprep.subr.bf16.mxu0 %v8474_v25  ;;  %7432 = vmatprep.subr.bf16.mxu1 %v8474_v25 }
  0xf0   :  { %7385 = vmatpush3.bf16.msra.mxu0 %v8474_v25  ;;  %7433 = vmatpush3.bf16.msra.mxu1 %v8474_v25 }
  0xf1   :  { %7386 = vmatprep.subr.bf16.mxu0 %v8483_v26  ;;  %7434 = vmatprep.subr.bf16.mxu1 %v8483_v26 }
  0xf2   :  { %7307 = vmatmul.mubr.bf16.gmra.mrb[104].mxu0 %v7876_v58  ;;  %7355 = vmatmul.mubr.bf16.gmra.mrb[104].mxu1 %v7877_v59 }
  0xf3   :  { %7310 = vmatprep.mubr.bf16.mxu0 %v7878_v60  ;;  %7358 = vmatprep.mubr.bf16.mxu1 %v7879_v61 }
  0xf4   :  { %7387 = vmatpush3.bf16.msra.mxu0 %v8483_v26  ;;  %7435 = vmatpush3.bf16.msra.mxu1 %v8483_v26 }
  0xf5   :  { %v7012_v63 = vpop.f32.mrb[0].mxu0  ;;  %v7060_v1 = vpop.f32.mrb[0].mxu1  ;;  %7388 = vmatprep.subr.bf16.mxu0 %v8504_v31  ;;  %7436 = vmatprep.subr.bf16.mxu1 %v8504_v31 }
  0xf6   :  { %v248_v0 = vpop.f32.mrb[1].mxu0  ;;  %v609_v2 = vpop.f32.mrb[1].mxu1  ;;  %v257_v11 = vadd.f32 %v7012_v63, %v8633_v62  ;;  %v618_v15 = vadd.f32 %v7060_v1, %v8633_v62 }
  0xf7   :  { %v249_v5 = vadd.f32 %v8633_v62, %v248_v0  ;;  %v610_v6 = vadd.f32 %v8633_v62, %v609_v2  ;;  %v7013_v7 = vpop.f32.mrb[2].mxu0  ;;  %v7061_v8 = vpop.f32.mrb[2].mxu1 }
  0xf8   :  { %v251_v12 = vpop.f32.mrb[3].mxu0  ;;  %v612_v13 = vpop.f32.mrb[3].mxu1  ;;  %7389 = vmatpush3.bf16.msra.mxu0 %v8504_v31  ;;  %7437 = vmatpush3.bf16.msra.mxu1 %v8504_v31  ;;  %v260_v18 = vadd.f32 %v7013_v7, %v8633_v62  ;;  %v621_v19 = vadd.f32 %v7061_v8, %v8633_v62  ;;  %v377_v24 = vmax.f32 %v257_v11, 0.0  ;;  %v738_v25 = vmax.f32 %v618_v15, 0.0 }
  0xf9   :  { %v252_v16 = vadd.f32 %v8633_v62, %v251_v12  ;;  %v613_v17 = vadd.f32 %v8633_v62, %v612_v13  ;;  %7390 = vmatprep.subr.bf16.mxu0 %v8513_v32  ;;  %7438 = vmatprep.subr.bf16.mxu1 %v8513_v32  ;;  %v375_v20 = vmax.f32 %v249_v5, 0.0  ;;  %v736_v21 = vmax.f32 %v610_v6, 0.0 }
  0xfa   :  { %7311 = vmatmul.mubr.bf16.gmra.mrb[108].mxu0 %v7880_v3  ;;  %7359 = vmatmul.mubr.bf16.gmra.mrb[108].mxu1 %v7881_v4  ;;  %v378_v30 = vmax.f32 %v260_v18, 0.0  ;;  %v739_v31 = vmax.f32 %v621_v19, 0.0  ;;  %v7888_v4 = vld [vmem:[%s9802_s0 + $0x358] sm:$0xff]   ;;  %v7891_v18 = vld [vmem:[%s9802_s0 + $0x3e0] sm:$0xff]  }
  0xfb   :  { %v376_v22 = vmax.f32 %v252_v16, 0.0  ;;  %v737_v23 = vmax.f32 %v613_v17, 0.0  ;;  %7314 = vmatprep.mubr.bf16.mxu0 %v7882_v9  ;;  %7362 = vmatprep.mubr.bf16.mxu1 %v7883_v10  ;;  %v7889_v9 = vld [vmem:[%s9802_s0 + $0x3d8] sm:$0xff]   ;;  %v7890_v10 = vld [vmem:[%s9802_s0 + $0x360] sm:$0xff]  }
  0xfc   :  { %7391 = vmatpush3.bf16.msra.mxu0 %v8513_v32  ;;  %7439 = vmatpush3.bf16.msra.mxu1 %v8513_v32  ;;  %v7885_v32 = vld [vmem:[%s9802_s0 + $0x3c8] sm:$0xff]  }
  0xfd   :  { %v407_v26 = vadd.f32 %v376_v22, %v375_v20  ;;  %v768_v27 = vadd.f32 %v737_v23, %v736_v21  ;;  %v7016_v28 = vpop.f32.mrb[4].mxu0  ;;  %v7064_v29 = vpop.f32.mrb[4].mxu1  ;;  %7392 = vmatprep.subr.bf16.mxu0 %v8534_v37  ;;  %7440 = vmatprep.subr.bf16.mxu1 %v8534_v37 }
  0xfe   :  { %v264_v33 = vpop.f32.mrb[5].mxu0  ;;  %v625_v34 = vpop.f32.mrb[5].mxu1  ;;  %v273_v45 = vadd.f32 %v7016_v28, %v8633_v62  ;;  %v634_v52 = vadd.f32 %v7064_v29, %v8633_v62 }
  0xff   :  { %v408_v36 = vadd.f32 %v407_v26, %v377_v24  ;;  %v769_v38 = vadd.f32 %v768_v27, %v738_v25  ;;  %v265_v39 = vadd.f32 %v8633_v62, %v264_v33  ;;  %v626_v40 = vadd.f32 %v8633_v62, %v625_v34  ;;  %v7017_v41 = vpop.f32.mrb[6].mxu0  ;;  %v7065_v42 = vpop.f32.mrb[6].mxu1 }
 0x100   :  { %v267_v46 = vpop.f32.mrb[7].mxu0  ;;  %v628_v47 = vpop.f32.mrb[7].mxu1  ;;  %7393 = vmatpush3.bf16.msra.mxu0 %v8534_v37  ;;  %7441 = vmatpush3.bf16.msra.mxu1 %v8534_v37  ;;  %v276_v37 = vadd.f32 %v7017_v41, %v8633_v62  ;;  %v637_v57 = vadd.f32 %v7065_v42, %v8633_v62  ;;  %v381_v61 = vmax.f32 %v273_v45, 0.0  ;;  %v742_v63 = vmax.f32 %v634_v52, 0.0  ;;  %v7892_v42 = vld [vmem:[%s9802_s0 + $0x368] sm:$0xff]  }
 0x101   :  { %v379_v48 = vmax.f32 %v265_v39, 0.0  ;;  %v409_v49 = vadd.f32 %v408_v36, %v378_v30  ;;  %v740_v50 = vmax.f32 %v626_v40, 0.0  ;;  %v770_v51 = vadd.f32 %v769_v38, %v739_v31  ;;  %7474 = vmatprep.subr.bf16.mxu0 %v8425_v14  ;;  %7522 = vmatprep.subr.bf16.mxu1 %v8425_v14 }
 0x102   :  { %v268_v53 = vadd.f32 %v8633_v62, %v267_v46  ;;  %v629_v54 = vadd.f32 %v8633_v62, %v628_v47  ;;  %7315 = vmatmul.mubr.bf16.gmra.mrb[112].mxu0 %v7884_v35  ;;  %7363 = vmatmul.mubr.bf16.gmra.mrb[112].mxu1 %v7885_v32  ;;  %v382_v11 = vmax.f32 %v276_v37, 0.0  ;;  %v743_v12 = vmax.f32 %v637_v57, 0.0  ;;  %v7893_v47 = vld [vmem:[%s9802_s0 + $0x3e8] sm:$0xff]  }
 0x103   :  { %v410_v55 = vadd.f32 %v409_v49, %v379_v48  ;;  %v771_v56 = vadd.f32 %v770_v51, %v740_v50  ;;  %7318 = vmatprep.mubr.bf16.mxu0 %v7886_v43  ;;  %7366 = vmatprep.mubr.bf16.mxu1 %v7887_v44  ;;  %v7894_v48 = vld [vmem:[%s9802_s0 + $0x370] sm:$0xff]  }
 0x104   :  { %v380_v58 = vmax.f32 %v268_v53, 0.0  ;;  %v741_v59 = vmax.f32 %v629_v54, 0.0 }
 0x105   :  { %v7020_v60 = vpop.f32.mrb[8].mxu0  ;;  %v7068_v14 = vpop.f32.mrb[8].mxu1 }
 0x106   :  { %v411_v1 = vadd.f32 %v410_v55, %v380_v58  ;;  %v772_v0 = vadd.f32 %v771_v56, %v741_v59  ;;  %v280_v2 = vpop.f32.mrb[9].mxu0  ;;  %v641_v3 = vpop.f32.mrb[9].mxu1  ;;  %v289_v19 = vadd.f32 %v7020_v60, %v8633_v62  ;;  %v650_v20 = vadd.f32 %v7068_v14, %v8633_v62  ;;  %v7895_v55 = vld [vmem:[%s9802_s0 + $0x3f0] sm:$0xff]  }
 0x107   :  { %v281_v5 = vadd.f32 %v8633_v62, %v280_v2  ;;  %v642_v6 = vadd.f32 %v8633_v62, %v641_v3  ;;  %v7021_v7 = vpop.f32.mrb[10].mxu0  ;;  %v7069_v8 = vpop.f32.mrb[10].mxu1 }
 0x108   :  { %v412_v13 = vadd.f32 %v411_v1, %v381_v61  ;;  %v773_v15 = vadd.f32 %v772_v0, %v742_v63  ;;  %v283_v16 = vpop.f32.mrb[11].mxu0  ;;  %v644_v17 = vpop.f32.mrb[11].mxu1  ;;  %v292_v27 = vadd.f32 %v7021_v7, %v8633_v62  ;;  %v653_v28 = vadd.f32 %v7069_v8, %v8633_v62 }
 0x109   :  { %v383_v21 = vmax.f32 %v281_v5, 0.0  ;;  %v744_v22 = vmax.f32 %v642_v6, 0.0  ;;  %v284_v25 = vadd.f32 %v8633_v62, %v283_v16  ;;  %v645_v26 = vadd.f32 %v8633_v62, %v644_v17 }
 0x10a   :  { %v413_v23 = vadd.f32 %v412_v13, %v382_v11  ;;  %v774_v24 = vadd.f32 %v773_v15, %v743_v12  ;;  %7319 = vmatmul.mubr.bf16.gmra.mrb[116].mxu0 %v7888_v4  ;;  %7367 = vmatmul.mubr.bf16.gmra.mrb[116].mxu1 %v7889_v9  ;;  %v385_v32 = vmax.f32 %v289_v19, 0.0  ;;  %v746_v36 = vmax.f32 %v650_v20, 0.0  ;;  %v7896_v13 = vld [vmem:[%s9802_s0 + $0x378] sm:$0xff]   ;;  %v7898_v20 = vld [vmem:[%s9802_s0 + $0x400] sm:$0xff]  }
 0x10b   :  { %7322 = vmatprep.mubr.bf16.mxu0 %v7890_v10  ;;  %v384_v31 = vmax.f32 %v284_v25, 0.0  ;;  %v745_v33 = vmax.f32 %v645_v26, 0.0  ;;  %7370 = vmatprep.mubr.bf16.mxu1 %v7891_v18  ;;  %v386_v49 = vmax.f32 %v292_v27, 0.0  ;;  %v747_v50 = vmax.f32 %v653_v28, 0.0  ;;  %v7897_v19 = vld [vmem:[%s9802_s0 + $0x3f8] sm:$0xff]   ;;  %v7899_v27 = vld [vmem:[%s9802_s0 + $0x480] sm:$0xff]  }
 0x10c   :  { %v414_v29 = vadd.f32 %v413_v23, %v383_v21  ;;  %v775_v30 = vadd.f32 %v774_v24, %v744_v22 }
 0x10d   :  { %v7024_v34 = vpop.f32.mrb[12].mxu0  ;;  %v7072_v35 = vpop.f32.mrb[12].mxu1 }
 0x10e   :  { %v415_v38 = vadd.f32 %v414_v29, %v384_v31  ;;  %v776_v39 = vadd.f32 %v775_v30, %v745_v33  ;;  %v296_v40 = vpop.f32.mrb[13].mxu0  ;;  %v657_v41 = vpop.f32.mrb[13].mxu1  ;;  %v305_v56 = vadd.f32 %v7024_v34, %v8633_v62  ;;  %v666_v37 = vadd.f32 %v7072_v35, %v8633_v62 }
 0x10f   :  { %v297_v43 = vadd.f32 %v8633_v62, %v296_v40  ;;  %v658_v44 = vadd.f32 %v8633_v62, %v657_v41  ;;  %v7025_v45 = vpop.f32.mrb[14].mxu0  ;;  %v7073_v46 = vpop.f32.mrb[14].mxu1 }
 0x110   :  { %v416_v51 = vadd.f32 %v415_v38, %v385_v32  ;;  %v777_v52 = vadd.f32 %v776_v39, %v746_v36  ;;  %v299_v53 = vpop.f32.mrb[15].mxu0  ;;  %v660_v54 = vpop.f32.mrb[15].mxu1  ;;  %v308_v63 = vadd.f32 %v7025_v45, %v8633_v62  ;;  %v669_v1 = vadd.f32 %v7073_v46, %v8633_v62 }
 0x111   :  { %v387_v57 = vmax.f32 %v297_v43, 0.0  ;;  %v748_v58 = vmax.f32 %v658_v44, 0.0  ;;  %v300_v14 = vadd.f32 %v8633_v62, %v299_v53  ;;  %v661_v61 = vadd.f32 %v8633_v62, %v660_v54 }
 0x112   :  { %v417_v59 = vadd.f32 %v416_v51, %v386_v49  ;;  %v778_v60 = vadd.f32 %v777_v52, %v747_v50  ;;  %7323 = vmatmul.mubr.bf16.gmra.mrb[120].mxu0 %v7892_v42  ;;  %7371 = vmatmul.mubr.bf16.gmra.mrb[120].mxu1 %v7893_v47  ;;  %v389_v7 = vmax.f32 %v305_v56, 0.0  ;;  %v750_v8 = vmax.f32 %v666_v37, 0.0  ;;  %v7900_v51 = vld [vmem:[%s9802_s0 + $0x408] sm:$0xff]  }
 0x113   :  { %7326 = vmatprep.mubr.bf16.mxu0 %v7894_v48  ;;  %v388_v3 = vmax.f32 %v300_v14, 0.0  ;;  %v749_v4 = vmax.f32 %v661_v61, 0.0  ;;  %7374 = vmatprep.mubr.bf16.mxu1 %v7895_v55  ;;  %v390_v21 = vmax.f32 %v308_v63, 0.0  ;;  %v751_v22 = vmax.f32 %v669_v1, 0.0  ;;  %v7901_v56 = vld [vmem:[%s9802_s0 + $0x488] sm:$0xff]   ;;  %v7902_v61 = vld [vmem:[%s9802_s0 + $0x410] sm:$0xff]  }
 0x114   :  { %v418_v0 = vadd.f32 %v417_v59, %v387_v57  ;;  %v779_v2 = vadd.f32 %v778_v60, %v748_v58 }
 0x115   :  { %v7028_v5 = vpop.f32.mrb[16].mxu0  ;;  %v7076_v6 = vpop.f32.mrb[16].mxu1 }
 0x116   :  { %v419_v9 = vadd.f32 %v418_v0, %v388_v3  ;;  %v780_v10 = vadd.f32 %v779_v2, %v749_v4  ;;  %v312_v11 = vpop.f32.mrb[17].mxu0  ;;  %v673_v12 = vpop.f32.mrb[17].mxu1  ;;  %v321_v28 = vadd.f32 %v7028_v5, %v8633_v62  ;;  %v682_v29 = vadd.f32 %v7076_v6, %v8633_v62  ;;  %v7903_v3 = vld [vmem:[%s9802_s0 + $0x490] sm:$0xff]  }
 0x117   :  { %v313_v15 = vadd.f32 %v8633_v62, %v312_v11  ;;  %v674_v16 = vadd.f32 %v8633_v62, %v673_v12  ;;  %v7029_v17 = vpop.f32.mrb[18].mxu0  ;;  %v7077_v18 = vpop.f32.mrb[18].mxu1 }
 0x118   :  { %v420_v23 = vadd.f32 %v419_v9, %v389_v7  ;;  %v781_v24 = vadd.f32 %v780_v10, %v750_v8  ;;  %v315_v25 = vpop.f32.mrb[19].mxu0  ;;  %v676_v26 = vpop.f32.mrb[19].mxu1  ;;  %v324_v36 = vadd.f32 %v7029_v17, %v8633_v62  ;;  %v685_v38 = vadd.f32 %v7077_v18, %v8633_v62  ;;  %v8774_v10 = vld [vmem:[%s9801_s1] sm:$0xff]   ;;  %v8781_v18 = vld [vmem:[%s9801_s1 + $0x8] sm:$0xff]  }
 0x119   :  { %v391_v30 = vmax.f32 %v313_v15, 0.0  ;;  %v752_v31 = vmax.f32 %v674_v16, 0.0  ;;  %v316_v35 = vadd.f32 %v8633_v62, %v315_v25  ;;  %v677_v32 = vadd.f32 %v8633_v62, %v676_v26  ;;  %v7904_v25 = vld [vmem:[%s9802_s0 + $0x418] sm:$0xff]  }
 0x11a   :  { %v421_v33 = vadd.f32 %v420_v23, %v390_v21  ;;  %v782_v34 = vadd.f32 %v781_v24, %v751_v22  ;;  %7327 = vmatmul.mubr.bf16.gmra.mrb[124].mxu0 %v7896_v13  ;;  %7375 = vmatmul.mubr.bf16.gmra.mrb[124].mxu1 %v7897_v19  ;;  %v393_v45 = vmax.f32 %v321_v28, 0.0  ;;  %v754_v46 = vmax.f32 %v682_v29, 0.0 }
 0x11b   :  { %7394 = vmatprep.mubr.bf16.mxu0 %v7898_v20  ;;  %v392_v41 = vmax.f32 %v316_v35, 0.0  ;;  %v753_v42 = vmax.f32 %v677_v32, 0.0  ;;  %7442 = vmatprep.mubr.bf16.mxu1 %v7899_v27  ;;  %v394_v37 = vmax.f32 %v324_v36, 0.0  ;;  %v755_v57 = vmax.f32 %v685_v38, 0.0 }
 0x11c   :  { %v422_v39 = vadd.f32 %v421_v33, %v391_v30  ;;  %v783_v40 = vadd.f32 %v782_v34, %v752_v31  ;;  %v7905_v30 = vld [vmem:[%s9802_s0 + $0x498] sm:$0xff]   ;;  %v7906_v31 = vld [vmem:[%s9802_s0 + $0x420] sm:$0xff]  }
 0x11d   :  { %v7032_v43 = vpop.f32.mrb[20].mxu0  ;;  %v7080_v44 = vpop.f32.mrb[20].mxu1 }
 0x11e   :  { %v423_v47 = vadd.f32 %v422_v39, %v392_v41  ;;  %v784_v48 = vadd.f32 %v783_v40, %v753_v42  ;;  %v328_v49 = vpop.f32.mrb[21].mxu0  ;;  %v689_v50 = vpop.f32.mrb[21].mxu1  ;;  %v337_v63 = vadd.f32 %v7032_v43, %v8633_v62  ;;  %v698_v1 = vadd.f32 %v7080_v44, %v8633_v62  ;;  %v7907_v39 = vld [vmem:[%s9802_s0 + $0x4a0] sm:$0xff]   ;;  %v8804_v40 = vld [vmem:[%s9801_s1 + $0x10] sm:$0xff]  }
 0x11f   :  { %v329_v52 = vadd.f32 %v8633_v62, %v328_v49  ;;  %v690_v53 = vadd.f32 %v8633_v62, %v689_v50  ;;  %v7033_v54 = vpop.f32.mrb[22].mxu0  ;;  %v7081_v55 = vpop.f32.mrb[22].mxu1 }
 0x120   :  { %v424_v58 = vadd.f32 %v423_v47, %v393_v45  ;;  %v785_v59 = vadd.f32 %v784_v48, %v754_v46  ;;  %v331_v60 = vpop.f32.mrb[23].mxu0  ;;  %v692_v14 = vpop.f32.mrb[23].mxu1  ;;  %v340_v8 = vadd.f32 %v7033_v54, %v8633_v62  ;;  %v701_v9 = vadd.f32 %v7081_v55, %v8633_v62 }
 0x121   :  { %v395_v0 = vmax.f32 %v329_v52, 0.0  ;;  %v756_v2 = vmax.f32 %v690_v53, 0.0  ;;  %v332_v6 = vadd.f32 %v8633_v62, %v331_v60  ;;  %v693_v7 = vadd.f32 %v8633_v62, %v692_v14 }
 0x122   :  { %v425_v4 = vadd.f32 %v424_v58, %v394_v37  ;;  %v786_v5 = vadd.f32 %v785_v59, %v755_v57  ;;  %7395 = vmatmul.mubr.bf16.vlgmr.msra.gmra.mrb[128].mxu0 %v7900_v51  ;;  %7443 = vmatmul.mubr.bf16.vlgmr.msra.gmra.mrb[128].mxu1 %v7901_v56  ;;  %v397_v19 = vmax.f32 %v337_v63, 0.0  ;;  %v758_v20 = vmax.f32 %v698_v1, 0.0  ;;  %v8819_v37 = vld [vmem:[%s9801_s1 + $0x18] sm:$0xff]   ;;  %v7908_v63 = vld [vmem:[%s9802_s0 + $0x428] sm:$0xff]  }
 0x123   :  { %7475 = vmatpush3.bf16.msra.mxu0 %v8774_v10  ;;  %v396_v13 = vmax.f32 %v332_v6, 0.0  ;;  %v757_v15 = vmax.f32 %v693_v7, 0.0  ;;  %7523 = vmatpush3.bf16.msra.mxu1 %v8774_v10  ;;  %v398_v33 = vmax.f32 %v340_v8, 0.0  ;;  %v759_v34 = vmax.f32 %v701_v9, 0.0 }
 0x124   :  { %v426_v11 = vadd.f32 %v425_v4, %v395_v0  ;;  %v787_v12 = vadd.f32 %v786_v5, %v756_v2  ;;  %7398 = vmatprep.mubr.bf16.mxu0 %v7902_v61  ;;  %7446 = vmatprep.mubr.bf16.mxu1 %v7903_v3  ;;  %v7909_v4 = vld [vmem:[%s9802_s0 + $0x4a8] sm:$0xff]   ;;  %v7910_v5 = vld [vmem:[%s9802_s0 + $0x430] sm:$0xff]  }
 0x125   :  { %v7036_v16 = vpop.f32.mrb[24].mxu0  ;;  %v7084_v17 = vpop.f32.mrb[24].mxu1  ;;  %7476 = vmatprep.subr.bf16.mxu0 %v8781_v18  ;;  %7524 = vmatprep.subr.bf16.mxu1 %v8781_v18 }
 0x126   :  { %v427_v21 = vadd.f32 %v426_v11, %v396_v13  ;;  %v788_v22 = vadd.f32 %v787_v12, %v757_v15  ;;  %v344_v23 = vpop.f32.mrb[25].mxu0  ;;  %v705_v24 = vpop.f32.mrb[25].mxu1  ;;  %v353_v41 = vadd.f32 %v7036_v16, %v8633_v62  ;;  %v714_v42 = vadd.f32 %v7084_v17, %v8633_v62  ;;  %v7911_v13 = vld [vmem:[%s9802_s0 + $0x4b0] sm:$0xff]  }
 0x127   :  { %v345_v26 = vadd.f32 %v8633_v62, %v344_v23  ;;  %v706_v27 = vadd.f32 %v8633_v62, %v705_v24  ;;  %v7037_v28 = vpop.f32.mrb[26].mxu0  ;;  %v7085_v29 = vpop.f32.mrb[26].mxu1  ;;  %7477 = vmatpush3.bf16.msra.mxu0 %v8781_v18  ;;  %7525 = vmatpush3.bf16.msra.mxu1 %v8781_v18 }
 0x128   :  { %v428_v35 = vadd.f32 %v427_v21, %v397_v19  ;;  %v789_v32 = vadd.f32 %v788_v22, %v758_v20  ;;  %v347_v36 = vpop.f32.mrb[27].mxu0  ;;  %v708_v38 = vpop.f32.mrb[27].mxu1  ;;  %7478 = vmatprep.subr.bf16.mxu0 %v8804_v40  ;;  %7526 = vmatprep.subr.bf16.mxu1 %v8804_v40  ;;  %v356_v49 = vadd.f32 %v7037_v28, %v8633_v62  ;;  %v401_v57 = vmax.f32 %v353_v41, 0.0  ;;  %v8844_v20 = vld [vmem:[%s9801_s1 + $0x20] sm:$0xff]   ;;  %v7912_v41 = vld [vmem:[%s9802_s0 + $0x438] sm:$0xff]  }
 0x129   :  { %v399_v43 = vmax.f32 %v345_v26, 0.0  ;;  %v760_v44 = vmax.f32 %v706_v27, 0.0  ;;  %v348_v47 = vadd.f32 %v8633_v62, %v347_v36  ;;  %v709_v48 = vadd.f32 %v8633_v62, %v708_v38 }
 0x12a   :  { %v429_v45 = vadd.f32 %v428_v35, %v398_v33  ;;  %v790_v46 = vadd.f32 %v789_v32, %v759_v34  ;;  %7399 = vmatmul.mubr.bf16.gmra.mrb[132].mxu0 %v7904_v25  ;;  %v717_v50 = vadd.f32 %v7085_v29, %v8633_v62  ;;  %7447 = vmatmul.mubr.bf16.gmra.mrb[132].mxu1 %v7905_v30  ;;  %v762_v58 = vmax.f32 %v714_v42, 0.0  ;;  %v8860_v42 = vld [vmem:[%s9801_s1 + $0x28] sm:$0xff]  }
 0x12b   :  { %7402 = vmatprep.mubr.bf16.mxu0 %v7906_v31  ;;  %v400_v53 = vmax.f32 %v348_v47, 0.0  ;;  %v761_v54 = vmax.f32 %v709_v48, 0.0  ;;  %7450 = vmatprep.mubr.bf16.mxu1 %v7907_v39  ;;  %v402_v6 = vmax.f32 %v356_v49, 0.0  ;;  %v7913_v47 = vld [vmem:[%s9802_s0 + $0x4b8] sm:$0xff]   ;;  %v7914_v48 = vld [vmem:[%s9802_s0 + $0x440] sm:$0xff]  }
 0x12c   :  { %v430_v51 = vadd.f32 %v429_v45, %v399_v43  ;;  %v791_v52 = vadd.f32 %v790_v46, %v760_v44  ;;  %7479 = vmatpush3.bf16.msra.mxu0 %v8804_v40  ;;  %7527 = vmatpush3.bf16.msra.mxu1 %v8804_v40  ;;  %v763_v7 = vmax.f32 %v717_v50, 0.0 }
 0x12d   :  { %v7040_v55 = vpop.f32.mrb[28].mxu0  ;;  %v7088_v56 = vpop.f32.mrb[28].mxu1  ;;  %7480 = vmatprep.subr.bf16.mxu0 %v8819_v37  ;;  %7528 = vmatprep.subr.bf16.mxu1 %v8819_v37 }
 0x12e   :  { %v431_v59 = vadd.f32 %v430_v51, %v400_v53  ;;  %v792_v60 = vadd.f32 %v791_v52, %v761_v54  ;;  %v360_v14 = vpop.f32.mrb[29].mxu0  ;;  %v721_v61 = vpop.f32.mrb[29].mxu1  ;;  %v369_v15 = vadd.f32 %v7040_v55, %v8633_v62  ;;  %v730_v16 = vadd.f32 %v7088_v56, %v8633_v62  ;;  %v7915_v55 = vld [vmem:[%s9802_s0 + $0x4c0] sm:$0xff]  }
 0x12f   :  { %v361_v1 = vadd.f32 %v8633_v62, %v360_v14  ;;  %v722_v0 = vadd.f32 %v8633_v62, %v721_v61  ;;  %v7041_v2 = vpop.f32.mrb[30].mxu0  ;;  %v7089_v3 = vpop.f32.mrb[30].mxu1 }
 0x130   :  { %v432_v8 = vadd.f32 %v431_v59, %v401_v57  ;;  %v793_v9 = vadd.f32 %v792_v60, %v762_v58  ;;  %v363_v11 = vpop.f32.mrb[31].mxu0  ;;  %v724_v12 = vpop.f32.mrb[31].mxu1  ;;  %7481 = vmatpush3.bf16.msra.mxu0 %v8819_v37  ;;  %7529 = vmatpush3.bf16.msra.mxu1 %v8819_v37  ;;  %v372_v25 = vadd.f32 %v7041_v2, %v8633_v62  ;;  %v405_v34 = vmax.f32 %v369_v15, 0.0 }
 0x131   :  { %v403_v17 = vmax.f32 %v361_v1, 0.0  ;;  %v764_v19 = vmax.f32 %v722_v0, 0.0  ;;  %7482 = vmatprep.subr.bf16.mxu0 %v8844_v20  ;;  %v364_v23 = vadd.f32 %v8633_v62, %v363_v11  ;;  %v725_v24 = vadd.f32 %v8633_v62, %v724_v12  ;;  %7530 = vmatprep.subr.bf16.mxu1 %v8844_v20 }
 0x132   :  { %v433_v21 = vadd.f32 %v432_v8, %v402_v6  ;;  %v794_v22 = vadd.f32 %v793_v9, %v763_v7  ;;  %7403 = vmatmul.mubr.bf16.gmra.mrb[136].mxu0 %v7908_v63  ;;  %v733_v26 = vadd.f32 %v7089_v3, %v8633_v62  ;;  %7451 = vmatmul.mubr.bf16.gmra.mrb[136].mxu1 %v7909_v4  ;;  %v766_v35 = vmax.f32 %v730_v16, 0.0  ;;  %v8886_v6 = vld [vmem:[%s9801_s1 + $0x30] sm:$0xff]  }
 0x133   :  { %7406 = vmatprep.mubr.bf16.mxu0 %v7910_v5  ;;  %v404_v29 = vmax.f32 %v364_v23, 0.0  ;;  %v765_v30 = vmax.f32 %v725_v24, 0.0  ;;  %7454 = vmatprep.mubr.bf16.mxu1 %v7911_v13  ;;  %v406_v49 = vmax.f32 %v372_v25, 0.0 }
 0x134   :  { %v434_v27 = vadd.f32 %v433_v21, %v403_v17  ;;  %v795_v28 = vadd.f32 %v794_v22, %v764_v19  ;;  %7483 = vmatpush3.bf16.msra.mxu0 %v8844_v20  ;;  %7531 = vmatpush3.bf16.msra.mxu1 %v8844_v20  ;;  %v767_v50 = vmax.f32 %v733_v26, 0.0  ;;  %v7916_v21 = vld [vmem:[%s9802_s0 + $0x448] sm:$0xff]  }
 0x135   :  { %v7108_v31 = vpop.f32.mrb[32].mxu0  ;;  %v7156_v33 = vpop.f32.mrb[32].mxu1  ;;  %7484 = vmatprep.subr.bf16.mxu0 %v8860_v42  ;;  %7532 = vmatprep.subr.bf16.mxu1 %v8860_v42 }
 0x136   :  { %v435_v32 = vadd.f32 %v434_v27, %v404_v29  ;;  %v796_v36 = vadd.f32 %v795_v28, %v765_v30  ;;  %v970_v38 = vpop.f32.mrb[33].mxu0  ;;  %v1331_v39 = vpop.f32.mrb[33].mxu1  ;;  %v979_v56 = vadd.f32 %v7108_v31, %v8633_v62  ;;  %v1340_v57 = vadd.f32 %v7156_v33, %v8633_v62  ;;  %v7917_v28 = vld [vmem:[%s9802_s0 + $0x4c8] sm:$0xff]   ;;  %v8903_v29 = vld [vmem:[%s9801_s1 + $0x38] sm:$0xff]  }
 0x137   :  { %v971_v43 = vadd.f32 %v8633_v62, %v970_v38  ;;  %v1332_v44 = vadd.f32 %v8633_v62, %v1331_v39  ;;  %v7109_v45 = vpop.f32.mrb[34].mxu0  ;;  %v7157_v46 = vpop.f32.mrb[34].mxu1  ;;  %v7919_v38 = vld [vmem:[%s9802_s0 + $0x4d0] sm:$0xff]  }
 0x138   :  { %v436_v51 = vadd.f32 %v435_v32, %v405_v34  ;;  %v797_v52 = vadd.f32 %v796_v36, %v766_v35  ;;  %v973_v53 = vpop.f32.mrb[35].mxu0  ;;  %v1334_v54 = vpop.f32.mrb[35].mxu1  ;;  %7485 = vmatpush3.bf16.msra.mxu0 %v8860_v42  ;;  %7533 = vmatpush3.bf16.msra.mxu1 %v8860_v42  ;;  %v982_v1 = vadd.f32 %v7109_v45, %v8633_v62  ;;  %v1099_v7 = vmax.f32 %v979_v56, 0.0  ;;  %v7918_v36 = vld [vmem:[%s9802_s0 + $0x450] sm:$0xff]  }
 0x139   :  { %v974_v60 = vadd.f32 %v8633_v62, %v973_v53  ;;  %v1335_v14 = vadd.f32 %v8633_v62, %v1334_v54  ;;  %v1097_v61 = vmax.f32 %v971_v43, 0.0  ;;  %v1458_v63 = vmax.f32 %v1332_v44, 0.0  ;;  %7486 = vmatprep.subr.bf16.mxu0 %v8886_v6  ;;  %7534 = vmatprep.subr.bf16.mxu1 %v8886_v6 }
 0x13a   :  { %v437_v58 = vadd.f32 %v436_v51, %v406_v49  ;;  %v798_v59 = vadd.f32 %v797_v52, %v767_v50  ;;  %7407 = vmatmul.mubr.bf16.gmra.mrb[140].mxu0 %v7912_v41  ;;  %v1343_v0 = vadd.f32 %v7157_v46, %v8633_v62  ;;  %7455 = vmatmul.mubr.bf16.gmra.mrb[140].mxu1 %v7913_v47  ;;  %v1460_v8 = vmax.f32 %v1340_v57, 0.0 }
 0x13b   :  { %7410 = vmatprep.mubr.bf16.mxu0 %v7914_v48  ;;  %v1098_v4 = vmax.f32 %v974_v60, 0.0  ;;  %v1459_v5 = vmax.f32 %v1335_v14, 0.0  ;;  %7458 = vmatprep.mubr.bf16.mxu1 %v7915_v55  ;;  %v1100_v22 = vmax.f32 %v982_v1, 0.0 }
 0x13c   :  { %v438_v2 = vrot.slane %v437_v58, 4  ;;  %v799_v3 = vrot.slane %v798_v59, 4  ;;  %7487 = vmatpush3.bf16.msra.mxu0 %v8886_v6  ;;  %7535 = vmatpush3.bf16.msra.mxu1 %v8886_v6  ;;  %v1461_v23 = vmax.f32 %v1343_v0, 0.0 }
 0x13d   :  { %v7112_v9 = vpop.f32.mrb[36].mxu0  ;;  %v7160_v11 = vpop.f32.mrb[36].mxu1  ;;  %v1129_v15 = vadd.f32 %v1098_v4, %v1097_v61  ;;  %v1490_v16 = vadd.f32 %v1459_v5, %v1458_v63  ;;  %7488 = vmatprep.subr.bf16.mxu0 %v8903_v29  ;;  %7536 = vmatprep.subr.bf16.mxu1 %v8903_v29 }
 0x13e   :  { %v439_v12 = vadd.f32 %v438_v2, %v437_v58  ;;  %v800_v13 = vadd.f32 %v799_v3, %v798_v59  ;;  %v986_v17 = vpop.f32.mrb[37].mxu0  ;;  %v1347_v19 = vpop.f32.mrb[37].mxu1  ;;  %v995_v39 = vadd.f32 %v7112_v9, %v8633_v62  ;;  %v1356_v41 = vadd.f32 %v7160_v11, %v8633_v62  ;;  %v7920_v3 = vld [vmem:[%s9802_s0 + $0x458] sm:$0xff]  }
 0x13f   :  { %v987_v24 = vadd.f32 %v8633_v62, %v986_v17  ;;  %v1348_v25 = vadd.f32 %v8633_v62, %v1347_v19  ;;  %v7113_v26 = vpop.f32.mrb[38].mxu0  ;;  %v7161_v27 = vpop.f32.mrb[38].mxu1  ;;  %v1130_v33 = vadd.f32 %v1129_v15, %v1099_v7  ;;  %v1491_v34 = vadd.f32 %v1490_v16, %v1460_v8  ;;  %v7923_v15 = vld [vmem:[%s9802_s0 + $0x4e0] sm:$0xff]  }
 0x140   :  { %v440_v30 = vrot.slane %v439_v12, 2  ;;  %v801_v31 = vrot.slane %v800_v13, 2  ;;  %v989_v35 = vpop.f32.mrb[39].mxu0  ;;  %v1350_v32 = vpop.f32.mrb[39].mxu1  ;;  %7489 = vmatpush3.bf16.msra.mxu0 %v8903_v29  ;;  %v998_v49 = vadd.f32 %v7113_v26, %v8633_v62  ;;  %v1359_v50 = vadd.f32 %v7161_v27, %v8633_v62  ;;  %7537 = vmatpush3.bf16.msra.mxu1 %v8903_v29 }
 0x141   :  { %v1101_v43 = vmax.f32 %v987_v24, 0.0  ;;  %v1462_v44 = vmax.f32 %v1348_v25, 0.0  ;;  %v1131_v47 = vadd.f32 %v1130_v33, %v1100_v22  ;;  %v1492_v48 = vadd.f32 %v1491_v34, %v1461_v23  ;;  %7570 = vmatprep.subr.bf16.mxu0 %v8774_v10  ;;  %7618 = vmatprep.subr.bf16.mxu1 %v8774_v10 }
 0x142   :  { %v441_v45 = vadd.f32 %v440_v30, %v439_v12  ;;  %v802_v46 = vadd.f32 %v801_v31, %v800_v13  ;;  %7411 = vmatmul.mubr.bf16.gmra.mrb[144].mxu0 %v7916_v21  ;;  %v990_v51 = vadd.f32 %v8633_v62, %v989_v35  ;;  %v1351_v52 = vadd.f32 %v8633_v62, %v1350_v32  ;;  %v7921_v12 = vld [vmem:[%s9802_s0 + $0x4d8] sm:$0xff]   ;;  %v7922_v13 = vld [vmem:[%s9802_s0 + $0x460] sm:$0xff]  }
 0x143   :  { %7459 = vmatmul.mubr.bf16.gmra.mrb[144].mxu1 %v7917_v28  ;;  %v1132_v55 = vadd.f32 %v1131_v47, %v1101_v43  ;;  %v1493_v56 = vadd.f32 %v1492_v48, %v1462_v44  ;;  %7414 = vmatprep.mubr.bf16.mxu0 %v7918_v36  ;;  %v1103_v63 = vmax.f32 %v995_v39, 0.0  ;;  %v1464_v1 = vmax.f32 %v1356_v41, 0.0 }
 0x144   :  { %v442_v53 = vrot.slane %v441_v45, 1  ;;  %v803_v54 = vrot.slane %v802_v46, 1  ;;  %7462 = vmatprep.mubr.bf16.mxu1 %v7919_v38  ;;  %v1102_v57 = vmax.f32 %v990_v51, 0.0  ;;  %v1463_v58 = vmax.f32 %v1351_v52, 0.0 }
 0x145   :  { %v7116_v59 = vpop.f32.mrb[40].mxu0  ;;  %v7164_v60 = vpop.f32.mrb[40].mxu1  ;;  %v1104_v19 = vmax.f32 %v998_v49, 0.0  ;;  %v1465_v21 = vmax.f32 %v1359_v50, 0.0  ;;  %v7924_v50 = vld [vmem:[%s9802_s0 + $0x468] sm:$0xff]  }
 0x146   :  { %v443_v14 = vadd.f32 %v442_v53, %v441_v45  ;;  %v804_v61 = vadd.f32 %v803_v54, %v802_v46  ;;  %v1002_v0 = vpop.f32.mrb[41].mxu0  ;;  %v1363_v2 = vpop.f32.mrb[41].mxu1  ;;  %v1133_v4 = vadd.f32 %v1132_v55, %v1102_v57  ;;  %v1494_v5 = vadd.f32 %v1493_v56, %v1463_v58  ;;  %v7925_v57 = vld [vmem:[%s9802_s0 + $0x4e8] sm:$0xff]   ;;  %v7926_v58 = vld [vmem:[%s9802_s0 + $0x470] sm:$0xff]  }
 0x147   :  { %v1003_v7 = vadd.f32 %v8633_v62, %v1002_v0  ;;  %v1364_v8 = vadd.f32 %v8633_v62, %v1363_v2  ;;  %v7117_v9 = vpop.f32.mrb[42].mxu0  ;;  %v7165_v11 = vpop.f32.mrb[42].mxu1  ;;  %v1011_v28 = vadd.f32 %v7116_v59, %v8633_v62  ;;  %v1372_v30 = vadd.f32 %v7164_v60, %v8633_v62 }
 0x148   :  { %v444_v16 = vmul.f32 0.00390625, %v443_v14  ;;  %v805_v17 = vmul.f32 0.00390625, %v804_v61  ;;  %v1005_v22 = vpop.f32.mrb[43].mxu0  ;;  %v1366_v23 = vpop.f32.mrb[43].mxu1  ;;  %v1134_v24 = vadd.f32 %v1133_v4, %v1103_v63  ;;  %v1495_v25 = vadd.f32 %v1494_v5, %v1464_v1  ;;  %v7927_v63 = vld [vmem:[%s9802_s0 + $0x4f0] sm:$0xff]  }
 0x149   :  { %v1105_v26 = vmax.f32 %v1003_v7, 0.0  ;;  %v1466_v27 = vmax.f32 %v1364_v8, 0.0  ;;  %v1006_v31 = vadd.f32 %v8633_v62, %v1005_v22  ;;  %v1367_v33 = vadd.f32 %v8633_v62, %v1366_v23 }
 0x14a   :  { %445 = vst [vmem:[%s9804_s3] sm:$0x1] %v444_v16  ;;  %806 = vst [vmem:[%s9804_s3 + $0x1] sm:$0x1] %v805_v17  ;;  %7415 = vmatmul.mubr.bf16.gmra.mrb[148].mxu0 %v7920_v3  ;;  %v1135_v34 = vadd.f32 %v1134_v24, %v1104_v19  ;;  %v1496_v35 = vadd.f32 %v1495_v25, %v1465_v21  ;;  %v1014_v32 = vadd.f32 %v7117_v9, %v8633_v62  ;;  %v8966_v3 = vld [vmem:[%s9803_s2] ss:$0 sm:$0xff] }
 0x14b   :  { %7463 = vmatmul.mubr.bf16.gmra.mrb[148].mxu1 %v7921_v12  ;;  %7418 = vmatprep.mubr.bf16.mxu0 %v7922_v13  ;;  %v1375_v36 = vadd.f32 %v7165_v11, %v8633_v62  ;;  %v1106_v38 = vmax.f32 %v1006_v31, 0.0  ;;  %v1467_v39 = vmax.f32 %v1367_v33, 0.0  ;;  %v1107_v46 = vmax.f32 %v1011_v28, 0.0 }
 0x14c   :  { %7466 = vmatprep.mubr.bf16.mxu1 %v7923_v15  ;;  %v1136_v41 = vadd.f32 %v1135_v34, %v1105_v26  ;;  %v1497_v43 = vadd.f32 %v1496_v35, %v1466_v27  ;;  %v1468_v47 = vmax.f32 %v1372_v30, 0.0  ;;  %v1108_v59 = vmax.f32 %v1014_v32, 0.0  ;;  %v7928_v27 = vld [vmem:[%s9802_s0 + $0x478] sm:$0xff]  }
 0x14d   :  { %v7120_v44 = vpop.f32.mrb[44].mxu0  ;;  %v7168_v45 = vpop.f32.mrb[44].mxu1  ;;  %v1469_v60 = vmax.f32 %v1375_v36, 0.0  ;;  %v7929_v32 = vld [vmem:[%s9802_s0 + $0x4f8] sm:$0xff]   ;;  %v7930_v36 = vld [vmem:[%s9802_s0 + $0x500] sm:$0xff]  }
 0x14e   :  { %v1018_v48 = vpop.f32.mrb[45].mxu0  ;;  %v1379_v49 = vpop.f32.mrb[45].mxu1  ;;  %v1137_v51 = vadd.f32 %v1136_v41, %v1106_v38  ;;  %v1498_v52 = vadd.f32 %v1497_v43, %v1467_v39  ;;  %v1027_v4 = vadd.f32 %v8966_v3, %v7120_v44  ;;  %v1388_v5 = vadd.f32 %v8966_v3, %v7168_v45  ;;  %v7931_v44 = vld [vmem:[%s9802_s0 + $0x580] sm:$0xff]  }
 0x14f   :  { %v1019_v53 = vadd.f32 %v8633_v62, %v1018_v48  ;;  %v1380_v54 = vadd.f32 %v8633_v62, %v1379_v49  ;;  %v7121_v55 = vpop.f32.mrb[46].mxu0  ;;  %v7169_v56 = vpop.f32.mrb[46].mxu1 }
 0x150   :  { %v1021_v14 = vpop.f32.mrb[47].mxu0  ;;  %v1382_v61 = vpop.f32.mrb[47].mxu1  ;;  %v1138_v1 = vadd.f32 %v1137_v51, %v1107_v46  ;;  %v1499_v62 = vadd.f32 %v1498_v52, %v1468_v47  ;;  %v1030_v12 = vadd.f32 %v8966_v3, %v7121_v55  ;;  %v1391_v13 = vadd.f32 %v8966_v3, %v7169_v56 }
 0x151   :  { %v1109_v0 = vmax.f32 %v1019_v53, 0.0  ;;  %v1470_v2 = vmax.f32 %v1380_v54, 0.0  ;;  %v1022_v7 = vadd.f32 %v8966_v3, %v1021_v14  ;;  %v1383_v8 = vadd.f32 %v8966_v3, %v1382_v61 }
 0x152   :  { %7419 = vmatmul.mubr.bf16.gmra.mrb[152].mxu0 %v7924_v50  ;;  %v1139_v9 = vadd.f32 %v1138_v1, %v1108_v59  ;;  %v1500_v11 = vadd.f32 %v1499_v62, %v1469_v60  ;;  %v1111_v23 = vmax.f32 %v1027_v4, 0.0  ;;  %v1472_v24 = vmax.f32 %v1388_v5, 0.0 }
 0x153   :  { %7467 = vmatmul.mubr.bf16.gmra.mrb[152].mxu1 %v7925_v57  ;;  %7422 = vmatprep.mubr.bf16.mxu0 %v7926_v58  ;;  %v1110_v15 = vmax.f32 %v1022_v7, 0.0  ;;  %v1471_v16 = vmax.f32 %v1383_v8, 0.0  ;;  %v1112_v38 = vmax.f32 %v1030_v12, 0.0  ;;  %v1473_v39 = vmax.f32 %v1391_v13, 0.0  ;;  %v7933_v12 = vld [vmem:[%s9802_s0 + $0x588] sm:$0xff]  }
 0x154   :  { %7470 = vmatprep.mubr.bf16.mxu1 %v7927_v63  ;;  %v1140_v17 = vadd.f32 %v1139_v9, %v1109_v0  ;;  %v1501_v19 = vadd.f32 %v1500_v11, %v1470_v2  ;;  %v7932_v2 = vld [vmem:[%s9802_s0 + $0x508] sm:$0xff]  }
 0x155   :  { %v7124_v21 = vpop.f32.mrb[48].mxu0  ;;  %v7172_v22 = vpop.f32.mrb[48].mxu1 }
 0x156   :  { %v1034_v25 = vpop.f32.mrb[49].mxu0  ;;  %v1395_v26 = vpop.f32.mrb[49].mxu1  ;;  %v1141_v28 = vadd.f32 %v1140_v17, %v1110_v15  ;;  %v1502_v30 = vadd.f32 %v1501_v19, %v1471_v16  ;;  %v1043_v49 = vadd.f32 %v8966_v3, %v7124_v21  ;;  %v1404_v50 = vadd.f32 %v8966_v3, %v7172_v22  ;;  %v7934_v19 = vld [vmem:[%s9802_s0 + $0x510] sm:$0xff]  }
 0x157   :  { %v1035_v31 = vadd.f32 %v8966_v3, %v1034_v25  ;;  %v1396_v33 = vadd.f32 %v8966_v3, %v1395_v26  ;;  %v7125_v34 = vpop.f32.mrb[50].mxu0  ;;  %v7173_v35 = vpop.f32.mrb[50].mxu1  ;;  %v7935_v25 = vld [vmem:[%s9802_s0 + $0x590] sm:$0xff]  }
 0x158   :  { %v1037_v41 = vpop.f32.mrb[51].mxu0  ;;  %v1398_v43 = vpop.f32.mrb[51].mxu1  ;;  %v1142_v45 = vadd.f32 %v1141_v28, %v1111_v23  ;;  %v1503_v46 = vadd.f32 %v1502_v30, %v1472_v24  ;;  %v1046_v55 = vadd.f32 %v8966_v3, %v7125_v34  ;;  %v1407_v56 = vadd.f32 %v8966_v3, %v7173_v35 }
 0x159   :  { %v1113_v47 = vmax.f32 %v1035_v31, 0.0  ;;  %v1474_v48 = vmax.f32 %v1396_v33, 0.0  ;;  %v1038_v51 = vadd.f32 %v8966_v3, %v1037_v41  ;;  %v1399_v52 = vadd.f32 %v8966_v3, %v1398_v43 }
 0x15a   :  { %7423 = vmatmul.mubr.bf16.gmra.mrb[156].mxu0 %v7928_v27  ;;  %v1143_v53 = vadd.f32 %v1142_v45, %v1112_v38  ;;  %v1504_v54 = vadd.f32 %v1503_v46, %v1473_v39  ;;  %v1115_v63 = vmax.f32 %v1043_v49, 0.0  ;;  %v1476_v1 = vmax.f32 %v1404_v50, 0.0 }
 0x15b   :  { %7471 = vmatmul.mubr.bf16.gmra.mrb[156].mxu1 %v7929_v32  ;;  %7490 = vmatprep.mubr.bf16.mxu0 %v7930_v36  ;;  %v1114_v57 = vmax.f32 %v1038_v51, 0.0  ;;  %v1475_v58 = vmax.f32 %v1399_v52, 0.0  ;;  %v1116_v13 = vmax.f32 %v1046_v55, 0.0  ;;  %v1477_v15 = vmax.f32 %v1407_v56, 0.0  ;;  %v7938_v55 = vld [vmem:[%s9802_s0 + $0x520] sm:$0xff]  }
 0x15c   :  { %7538 = vmatprep.mubr.bf16.mxu1 %v7931_v44  ;;  %v1144_v59 = vadd.f32 %v1143_v53, %v1113_v47  ;;  %v1505_v60 = vadd.f32 %v1504_v54, %v1474_v48  ;;  %v7936_v48 = vld [vmem:[%s9802_s0 + $0x518] sm:$0xff]  }
 0x15d   :  { %v7128_v14 = vpop.f32.mrb[52].mxu0  ;;  %v7176_v61 = vpop.f32.mrb[52].mxu1  ;;  %v7937_v54 = vld [vmem:[%s9802_s0 + $0x598] sm:$0xff]  }
 0x15e   :  { %v1050_v62 = vpop.f32.mrb[53].mxu0  ;;  %v1411_v0 = vpop.f32.mrb[53].mxu1  ;;  %v1145_v4 = vadd.f32 %v1144_v59, %v1114_v57  ;;  %v1506_v5 = vadd.f32 %v1505_v60, %v1475_v58  ;;  %v1059_v26 = vadd.f32 %v8966_v3, %v7128_v14  ;;  %v1420_v27 = vadd.f32 %v8966_v3, %v7176_v61  ;;  %v7939_v60 = vld [vmem:[%s9802_s0 + $0x5a0] sm:$0xff]  }
 0x15f   :  { %v1051_v7 = vadd.f32 %v8966_v3, %v1050_v62  ;;  %v1412_v8 = vadd.f32 %v8966_v3, %v1411_v0  ;;  %v7129_v9 = vpop.f32.mrb[54].mxu0  ;;  %v7177_v11 = vpop.f32.mrb[54].mxu1 }
 0x160   :  { %v1053_v16 = vpop.f32.mrb[55].mxu0  ;;  %v1414_v17 = vpop.f32.mrb[55].mxu1  ;;  %v1146_v21 = vadd.f32 %v1145_v4, %v1115_v63  ;;  %v1507_v22 = vadd.f32 %v1506_v5, %v1476_v1  ;;  %v1062_v34 = vadd.f32 %v8966_v3, %v7129_v9  ;;  %v1423_v35 = vadd.f32 %v8966_v3, %v7177_v11 }
 0x161   :  { %v1117_v23 = vmax.f32 %v1051_v7, 0.0  ;;  %v1478_v24 = vmax.f32 %v1412_v8, 0.0  ;;  %v1054_v28 = vadd.f32 %v8966_v3, %v1053_v16  ;;  %v1415_v30 = vadd.f32 %v8966_v3, %v1414_v17 }
 0x162   :  { %7491 = vmatmul.mubr.bf16.vlgmr.msra.gmra.mrb[160].mxu0 %v7932_v2  ;;  %v1147_v31 = vadd.f32 %v1146_v21, %v1116_v13  ;;  %v1508_v33 = vadd.f32 %v1507_v22, %v1477_v15  ;;  %v1119_v44 = vmax.f32 %v1059_v26, 0.0  ;;  %v1480_v45 = vmax.f32 %v1420_v27, 0.0 }
 0x163   :  { %7539 = vmatmul.mubr.bf16.vlgmr.msra.gmra.mrb[160].mxu1 %v7933_v12  ;;  %7571 = vmatpush3.bf16.msra.mxu0 %v8774_v10  ;;  %v1118_v32 = vmax.f32 %v1054_v28, 0.0  ;;  %v1479_v36 = vmax.f32 %v1415_v30, 0.0  ;;  %v1120_v56 = vmax.f32 %v1062_v34, 0.0  ;;  %v1481_v57 = vmax.f32 %v1423_v35, 0.0  ;;  %v7941_v30 = vld [vmem:[%s9802_s0 + $0x5a8] sm:$0xff]  }
 0x164   :  { %7619 = vmatpush3.bf16.msra.mxu1 %v8774_v10  ;;  %7494 = vmatprep.mubr.bf16.mxu0 %v7934_v19  ;;  %v1148_v38 = vadd.f32 %v1147_v31, %v1117_v23  ;;  %v1509_v39 = vadd.f32 %v1508_v33, %v1478_v24  ;;  %v7940_v23 = vld [vmem:[%s9802_s0 + $0x528] sm:$0xff]   ;;  %v7942_v31 = vld [vmem:[%s9802_s0 + $0x530] sm:$0xff]  }
 0x165   :  { %v7132_v41 = vpop.f32.mrb[56].mxu0  ;;  %v7180_v43 = vpop.f32.mrb[56].mxu1  ;;  %7542 = vmatprep.mubr.bf16.mxu1 %v7935_v25  ;;  %7572 = vmatprep.subr.bf16.mxu0 %v8781_v18 }
 0x166   :  { %v1066_v46 = vpop.f32.mrb[57].mxu0  ;;  %v1427_v47 = vpop.f32.mrb[57].mxu1  ;;  %7620 = vmatprep.subr.bf16.mxu1 %v8781_v18  ;;  %v1149_v49 = vadd.f32 %v1148_v38, %v1118_v32  ;;  %v1510_v10 = vadd.f32 %v1509_v39, %v1479_v36  ;;  %v1075_v62 = vadd.f32 %v8966_v3, %v7132_v41  ;;  %v1436_v0 = vadd.f32 %v8966_v3, %v7180_v43  ;;  %v7943_v36 = vld [vmem:[%s9802_s0 + $0x5b0] sm:$0xff]  }
 0x167   :  { %v1067_v50 = vadd.f32 %v8966_v3, %v1066_v46  ;;  %v1428_v51 = vadd.f32 %v8966_v3, %v1427_v47  ;;  %v7133_v52 = vpop.f32.mrb[58].mxu0  ;;  %v7181_v53 = vpop.f32.mrb[58].mxu1  ;;  %7573 = vmatpush3.bf16.msra.mxu0 %v8781_v18 }
 0x168   :  { %v1069_v58 = vpop.f32.mrb[59].mxu0  ;;  %v1430_v59 = vpop.f32.mrb[59].mxu1  ;;  %7621 = vmatpush3.bf16.msra.mxu1 %v8781_v18  ;;  %7574 = vmatprep.subr.bf16.mxu0 %v8804_v40  ;;  %v1150_v14 = vadd.f32 %v1149_v49, %v1119_v44  ;;  %v1511_v61 = vadd.f32 %v1510_v10, %v1480_v45  ;;  %v1078_v7 = vadd.f32 %v8966_v3, %v7133_v52  ;;  %v1123_v17 = vmax.f32 %v1075_v62, 0.0  ;;  %v7946_v62 = vld [vmem:[%s9802_s0 + $0x540] sm:$0xff]  }
 0x169   :  { %v1121_v63 = vmax.f32 %v1067_v50, 0.0  ;;  %v1482_v1 = vmax.f32 %v1428_v51, 0.0  ;;  %7622 = vmatprep.subr.bf16.mxu1 %v8804_v40  ;;  %v1070_v2 = vadd.f32 %v8966_v3, %v1069_v58  ;;  %v1431_v18 = vadd.f32 %v8966_v3, %v1430_v59  ;;  %v7944_v58 = vld [vmem:[%s9802_s0 + $0x538] sm:$0xff]  }
 0x16a   :  { %7495 = vmatmul.mubr.bf16.gmra.mrb[164].mxu0 %v7936_v48  ;;  %v1151_v4 = vadd.f32 %v1150_v14, %v1120_v56  ;;  %v1512_v5 = vadd.f32 %v1511_v61, %v1481_v57  ;;  %v1439_v8 = vadd.f32 %v8966_v3, %v7181_v53  ;;  %v1484_v19 = vmax.f32 %v1436_v0, 0.0 }
 0x16b   :  { %7543 = vmatmul.mubr.bf16.gmra.mrb[164].mxu1 %v7937_v54  ;;  %7498 = vmatprep.mubr.bf16.mxu0 %v7938_v55  ;;  %v1122_v9 = vmax.f32 %v1070_v2, 0.0  ;;  %v1483_v11 = vmax.f32 %v1431_v18, 0.0  ;;  %v1124_v33 = vmax.f32 %v1078_v7, 0.0 }
 0x16c   :  { %7546 = vmatprep.mubr.bf16.mxu1 %v7939_v60  ;;  %7575 = vmatpush3.bf16.msra.mxu0 %v8804_v40  ;;  %v1152_v12 = vadd.f32 %v1151_v4, %v1121_v63  ;;  %v1513_v13 = vadd.f32 %v1512_v5, %v1482_v1  ;;  %v1485_v34 = vmax.f32 %v1439_v8, 0.0  ;;  %v7947_v8 = vld [vmem:[%s9802_s0 + $0x5c0] sm:$0xff]  }
 0x16d   :  { %v7136_v15 = vpop.f32.mrb[60].mxu0  ;;  %v7184_v16 = vpop.f32.mrb[60].mxu1  ;;  %7623 = vmatpush3.bf16.msra.mxu1 %v8804_v40  ;;  %7576 = vmatprep.subr.bf16.mxu0 %v8819_v37 }
 0x16e   :  { %v1082_v21 = vpop.f32.mrb[61].mxu0  ;;  %v1443_v22 = vpop.f32.mrb[61].mxu1  ;;  %7624 = vmatprep.subr.bf16.mxu1 %v8819_v37  ;;  %v1153_v24 = vadd.f32 %v1152_v12, %v1122_v9  ;;  %v1514_v25 = vadd.f32 %v1513_v13, %v1483_v11  ;;  %v1091_v44 = vadd.f32 %v8966_v3, %v7136_v15  ;;  %v1452_v47 = vadd.f32 %v8966_v3, %v7184_v16 }
 0x16f   :  { %v1083_v26 = vadd.f32 %v8966_v3, %v1082_v21  ;;  %v1444_v27 = vadd.f32 %v8966_v3, %v1443_v22  ;;  %v7137_v28 = vpop.f32.mrb[62].mxu0  ;;  %v7185_v40 = vpop.f32.mrb[62].mxu1 }
 0x170   :  { %v1085_v35 = vpop.f32.mrb[63].mxu0  ;;  %v1446_v32 = vpop.f32.mrb[63].mxu1  ;;  %7577 = vmatpush3.bf16.msra.mxu0 %v8819_v37  ;;  %v1154_v38 = vadd.f32 %v1153_v24, %v1123_v17  ;;  %v1515_v39 = vadd.f32 %v1514_v25, %v1484_v19  ;;  %v1094_v10 = vadd.f32 %v8966_v3, %v7137_v28  ;;  %v1455_v53 = vadd.f32 %v8966_v3, %v7185_v40 }
 0x171   :  { %v1125_v41 = vmax.f32 %v1083_v26, 0.0  ;;  %v1486_v43 = vmax.f32 %v1444_v27, 0.0  ;;  %7625 = vmatpush3.bf16.msra.mxu1 %v8819_v37  ;;  %7578 = vmatprep.subr.bf16.mxu0 %v8844_v20  ;;  %v1086_v45 = vadd.f32 %v8966_v3, %v1085_v35  ;;  %v1447_v46 = vadd.f32 %v8966_v3, %v1446_v32 }
 0x172   :  { %7499 = vmatmul.mubr.bf16.gmra.mrb[168].mxu0 %v7940_v23  ;;  %7626 = vmatprep.subr.bf16.mxu1 %v8844_v20  ;;  %v1155_v48 = vadd.f32 %v1154_v38, %v1124_v33  ;;  %v1516_v49 = vadd.f32 %v1515_v39, %v1485_v34  ;;  %v1127_v59 = vmax.f32 %v1091_v44, 0.0  ;;  %v1488_v60 = vmax.f32 %v1452_v47, 0.0  ;;  %v7948_v38 = vld [vmem:[%s9802_s0 + $0x548] sm:$0xff]  }
 0x173   :  { %7547 = vmatmul.mubr.bf16.gmra.mrb[168].mxu1 %v7941_v30  ;;  %7502 = vmatprep.mubr.bf16.mxu0 %v7942_v31  ;;  %v1126_v37 = vmax.f32 %v1086_v45, 0.0  ;;  %v1487_v50 = vmax.f32 %v1447_v46, 0.0  ;;  %v1128_v0 = vmax.f32 %v1094_v10, 0.0  ;;  %v1489_v9 = vmax.f32 %v1455_v53, 0.0  ;;  %v7949_v46 = vld [vmem:[%s9802_s0 + $0x5c8] sm:$0xff]  }
 0x174   :  { %7550 = vmatprep.mubr.bf16.mxu1 %v7943_v36  ;;  %7579 = vmatpush3.bf16.msra.mxu0 %v8844_v20  ;;  %v1156_v51 = vadd.f32 %v1155_v48, %v1125_v41  ;;  %v1517_v52 = vadd.f32 %v1516_v49, %v1486_v43 }
 0x175   :  { %v7204_v54 = vpop.f32.mrb[64].mxu0  ;;  %v7252_v55 = vpop.f32.mrb[64].mxu1  ;;  %7627 = vmatpush3.bf16.msra.mxu1 %v8844_v20  ;;  %7580 = vmatprep.subr.bf16.mxu0 %v8860_v42  ;;  %v7945_v20 = vld [vmem:[%s9802_s0 + $0x5b8] sm:$0xff]  }
 0x176   :  { %v1692_v56 = vpop.f32.mrb[65].mxu0  ;;  %v2053_v57 = vpop.f32.mrb[65].mxu1  ;;  %7628 = vmatprep.subr.bf16.mxu1 %v8860_v42  ;;  %v1157_v14 = vadd.f32 %v1156_v51, %v1126_v37  ;;  %v1518_v61 = vadd.f32 %v1517_v52, %v1487_v50  ;;  %v1701_v2 = vadd.f32 %v8966_v3, %v7204_v54  ;;  %v2062_v13 = vadd.f32 %v8966_v3, %v7252_v55  ;;  %v7950_v51 = vld [vmem:[%s9802_s0 + $0x550] sm:$0xff]  }
 0x177   :  { %v7205_v63 = vpop.f32.mrb[66].mxu0  ;;  %v7253_v1 = vpop.f32.mrb[66].mxu1  ;;  %v1693_v18 = vadd.f32 %v8966_v3, %v1692_v56  ;;  %v2054_v4 = vadd.f32 %v8966_v3, %v2053_v57  ;;  %v7951_v52 = vld [vmem:[%s9802_s0 + $0x5d0] sm:$0xff]   ;;  %v9122_v57 = vld [vmem:[%s9801_s1] sm:$0xff]  }
 0x178   :  { %v1695_v5 = vpop.f32.mrb[67].mxu0  ;;  %v2056_v7 = vpop.f32.mrb[67].mxu1  ;;  %7581 = vmatpush3.bf16.msra.mxu0 %v8860_v42  ;;  %v1158_v11 = vadd.f32 %v1157_v14, %v1127_v59  ;;  %v1519_v12 = vadd.f32 %v1518_v61, %v1488_v60  ;;  %v1704_v15 = vadd.f32 %v8966_v3, %v7205_v63  ;;  %v2065_v22 = vadd.f32 %v8966_v3, %v7253_v1 }
 0x179   :  { %7629 = vmatpush3.bf16.msra.mxu1 %v8860_v42  ;;  %7582 = vmatprep.subr.bf16.mxu0 %v8886_v6  ;;  %v1696_v16 = vadd.f32 %v8966_v3, %v1695_v5  ;;  %v2057_v17 = vadd.f32 %v8966_v3, %v2056_v7  ;;  %v1819_v23 = vmax.f32 %v1693_v18, 0.0  ;;  %v2180_v24 = vmax.f32 %v2054_v4, 0.0 }
 0x17a   :  { %7503 = vmatmul.mubr.bf16.gmra.mrb[172].mxu0 %v7944_v58  ;;  %7630 = vmatprep.subr.bf16.mxu1 %v8886_v6  ;;  %v1159_v19 = vadd.f32 %v1158_v11, %v1128_v0  ;;  %v1520_v21 = vadd.f32 %v1519_v12, %v1489_v9  ;;  %v1821_v28 = vmax.f32 %v1701_v2, 0.0  ;;  %v2182_v31 = vmax.f32 %v2062_v13, 0.0 }
 0x17b   :  { %7551 = vmatmul.mubr.bf16.gmra.mrb[172].mxu1 %v7945_v20  ;;  %7506 = vmatprep.mubr.bf16.mxu0 %v7946_v62  ;;  %v1820_v42 = vmax.f32 %v1696_v16, 0.0  ;;  %v2181_v25 = vmax.f32 %v2057_v17, 0.0  ;;  %v1822_v33 = vmax.f32 %v1704_v15, 0.0  ;;  %v2183_v47 = vmax.f32 %v2065_v22, 0.0  ;;  %v7952_v15 = vld [vmem:[%s9802_s0 + $0x558] sm:$0xff]  }
 0x17c   :  { %7554 = vmatprep.mubr.bf16.mxu1 %v7947_v8  ;;  %7583 = vmatpush3.bf16.msra.mxu0 %v8886_v6  ;;  %v1160_v26 = vrot.slane %v1159_v19, 4  ;;  %v1521_v27 = vrot.slane %v1520_v21, 4 }
 0x17d   :  { %v7208_v40 = vpop.f32.mrb[68].mxu0  ;;  %v7256_v30 = vpop.f32.mrb[68].mxu1  ;;  %7631 = vmatpush3.bf16.msra.mxu1 %v8886_v6  ;;  %7584 = vmatprep.subr.bf16.mxu0 %v8903_v29  ;;  %v1851_v34 = vadd.f32 %v1820_v42, %v1819_v23  ;;  %v2212_v35 = vadd.f32 %v2181_v25, %v2180_v24  ;;  %v7953_v24 = vld [vmem:[%s9802_s0 + $0x5d8] sm:$0xff]  }
 0x17e   :  { %v1708_v32 = vpop.f32.mrb[69].mxu0  ;;  %v2069_v36 = vpop.f32.mrb[69].mxu1  ;;  %7632 = vmatprep.subr.bf16.mxu1 %v8903_v29  ;;  %v1161_v39 = vadd.f32 %v1160_v26, %v1159_v19  ;;  %v1522_v41 = vadd.f32 %v1521_v27, %v1520_v21  ;;  %v1717_v10 = vadd.f32 %v8966_v3, %v7208_v40  ;;  %v2078_v58 = vadd.f32 %v8966_v3, %v7256_v30  ;;  %v7954_v30 = vld [vmem:[%s9802_s0 + $0x560] sm:$0xff]  }
 0x17f   :  { %v1709_v43 = vadd.f32 %v8966_v3, %v1708_v32  ;;  %v2070_v6 = vadd.f32 %v8966_v3, %v2069_v36  ;;  %v7209_v44 = vpop.f32.mrb[70].mxu0  ;;  %v7257_v45 = vpop.f32.mrb[70].mxu1  ;;  %v1852_v48 = vadd.f32 %v1851_v34, %v1821_v28  ;;  %v2213_v49 = vadd.f32 %v2212_v35, %v2182_v31  ;;  %v7955_v31 = vld [vmem:[%s9802_s0 + $0x5e0] sm:$0xff]  }
 0x180   :  { %v1711_v37 = vpop.f32.mrb[71].mxu0  ;;  %v2072_v50 = vpop.f32.mrb[71].mxu1  ;;  %7585 = vmatpush3.bf16.msra.mxu0 %v8903_v29  ;;  %v1162_v53 = vrot.slane %v1161_v39, 2  ;;  %v1523_v54 = vrot.slane %v1522_v41, 2  ;;  %v1720_v14 = vadd.f32 %v8966_v3, %v7209_v44  ;;  %v2081_v0 = vadd.f32 %v8966_v3, %v7257_v45 }
 0x181   :  { %v1823_v55 = vmax.f32 %v1709_v43, 0.0  ;;  %v2184_v56 = vmax.f32 %v2070_v6, 0.0  ;;  %7633 = vmatpush3.bf16.msra.mxu1 %v8903_v29  ;;  %7666 = vmatprep.subr.bf16.mxu0 %v9122_v57  ;;  %v1853_v59 = vadd.f32 %v1852_v48, %v1822_v33  ;;  %v2214_v60 = vadd.f32 %v2213_v49, %v2183_v47 }
 0x182   :  { %7507 = vmatmul.mubr.bf16.gmra.mrb[176].mxu0 %v7948_v38  ;;  %v1163_v61 = vadd.f32 %v1162_v53, %v1161_v39  ;;  %v1524_v63 = vadd.f32 %v1523_v54, %v1522_v41  ;;  %v1712_v1 = vadd.f32 %v8966_v3, %v1711_v37  ;;  %v2073_v29 = vadd.f32 %v8966_v3, %v2072_v50 }
 0x183   :  { %7555 = vmatmul.mubr.bf16.gmra.mrb[176].mxu1 %v7949_v46  ;;  %v1854_v20 = vadd.f32 %v1853_v59, %v1823_v55  ;;  %v2215_v62 = vadd.f32 %v2214_v60, %v2184_v56  ;;  %7510 = vmatprep.mubr.bf16.mxu0 %v7950_v51  ;;  %v1825_v9 = vmax.f32 %v1717_v10, 0.0  ;;  %v2186_v11 = vmax.f32 %v2078_v58, 0.0  ;;  %v7956_v56 = vld [vmem:[%s9802_s0 + $0x568] sm:$0xff]  }
 0x184   :  { %7558 = vmatprep.mubr.bf16.mxu1 %v7951_v52  ;;  %v1164_v2 = vrot.slane %v1163_v61, 1  ;;  %v1525_v18 = vrot.slane %v1524_v63, 1  ;;  %v1824_v4 = vmax.f32 %v1712_v1, 0.0  ;;  %v2185_v5 = vmax.f32 %v2073_v29, 0.0  ;;  %7714 = vmatprep.subr.bf16.mxu1 %v9122_v57  ;;  %v7957_v1 = vld [vmem:[%s9802_s0 + $0x5e8] sm:$0xff]   ;;  %v7958_v29 = vld [vmem:[%s9802_s0 + $0x570] sm:$0xff]  }
 0x185   :  { %v7212_v7 = vpop.f32.mrb[72].mxu0  ;;  %v7260_v8 = vpop.f32.mrb[72].mxu1  ;;  %v1826_v42 = vmax.f32 %v1720_v14, 0.0  ;;  %v2187_v25 = vmax.f32 %v2081_v0, 0.0 }
 0x186   :  { %v1724_v12 = vpop.f32.mrb[73].mxu0  ;;  %v2085_v13 = vpop.f32.mrb[73].mxu1  ;;  %v1165_v16 = vadd.f32 %v1164_v2, %v1163_v61  ;;  %v1526_v17 = vadd.f32 %v1525_v18, %v1524_v63  ;;  %v1855_v19 = vadd.f32 %v1854_v20, %v1824_v4  ;;  %v2216_v21 = vadd.f32 %v2215_v62, %v2185_v5  ;;  %v7959_v18 = vld [vmem:[%s9802_s0 + $0x5f0] sm:$0xff]  }
 0x187   :  { %v7213_v22 = vpop.f32.mrb[74].mxu0  ;;  %v7261_v23 = vpop.f32.mrb[74].mxu1  ;;  %v1725_v26 = vadd.f32 %v8966_v3, %v1724_v12  ;;  %v2086_v27 = vadd.f32 %v8966_v3, %v2085_v13  ;;  %v1733_v36 = vadd.f32 %v8966_v3, %v7212_v7  ;;  %v2094_v38 = vadd.f32 %v8966_v3, %v7260_v8 }
 0x188   :  { %v1727_v28 = vpop.f32.mrb[75].mxu0  ;;  %v2088_v40 = vpop.f32.mrb[75].mxu1  ;;  %v1166_v33 = vmul.f32 0.00390625, %v1165_v16  ;;  %v1527_v34 = vmul.f32 0.00390625, %v1526_v17  ;;  %v1856_v35 = vadd.f32 %v1855_v19, %v1825_v9  ;;  %v2217_v32 = vadd.f32 %v2216_v21, %v2186_v11 }
 0x189   :  { %v1827_v39 = vmax.f32 %v1725_v26, 0.0  ;;  %v2188_v41 = vmax.f32 %v2086_v27, 0.0  ;;  %v1728_v44 = vadd.f32 %v8966_v3, %v1727_v28  ;;  %v2089_v45 = vadd.f32 %v8966_v3, %v2088_v40 }
 0x18a   :  { %7511 = vmatmul.mubr.bf16.gmra.mrb[180].mxu0 %v7952_v15  ;;  %1167 = vst [vmem:[%s9804_s3 + $0x2] sm:$0x1] %v1166_v33  ;;  %1528 = vst [vmem:[%s9804_s3 + $0x3] sm:$0x1] %v1527_v34  ;;  %v1857_v43 = vadd.f32 %v1856_v35, %v1826_v42  ;;  %v2218_v6 = vadd.f32 %v2217_v32, %v2187_v25  ;;  %v1736_v46 = vadd.f32 %v8966_v3, %v7213_v22 }
 0x18b   :  { %7559 = vmatmul.mubr.bf16.gmra.mrb[180].mxu1 %v7953_v24  ;;  %v2097_v47 = vadd.f32 %v8966_v3, %v7261_v23  ;;  %7514 = vmatprep.mubr.bf16.mxu0 %v7954_v30  ;;  %v1828_v10 = vmax.f32 %v1728_v44, 0.0  ;;  %v2189_v37 = vmax.f32 %v2089_v45, 0.0  ;;  %v1829_v52 = vmax.f32 %v1733_v36, 0.0  ;;  %v7960_v30 = vld [vmem:[%s9802_s0 + $0x578] sm:$0xff]   ;;  %v7963_v45 = vld [vmem:[%s9802_s0 + $0x680] sm:$0xff]  }
 0x18c   :  { %7562 = vmatprep.mubr.bf16.mxu1 %v7955_v31  ;;  %v1858_v48 = vadd.f32 %v1857_v43, %v1827_v39  ;;  %v2219_v49 = vadd.f32 %v2218_v6, %v2188_v41  ;;  %v2190_v53 = vmax.f32 %v2094_v38, 0.0  ;;  %v1830_v20 = vmax.f32 %v1736_v46, 0.0  ;;  %v7961_v38 = vld [vmem:[%s9802_s0 + $0x5f8] sm:$0xff]   ;;  %v7962_v39 = vld [vmem:[%s9802_s0 + $0x600] sm:$0xff]  }
 0x18d   :  { %v7216_v50 = vpop.f32.mrb[76].mxu0  ;;  %v7264_v51 = vpop.f32.mrb[76].mxu1  ;;  %v2191_v62 = vmax.f32 %v2097_v47, 0.0 }
 0x18e   :  { %v1740_v54 = vpop.f32.mrb[77].mxu0  ;;  %v2101_v55 = vpop.f32.mrb[77].mxu1  ;;  %v1859_v58 = vadd.f32 %v1858_v48, %v1828_v10  ;;  %v2220_v59 = vadd.f32 %v2219_v49, %v2189_v37  ;;  %v1749_v9 = vadd.f32 %v8966_v3, %v7216_v50  ;;  %v2110_v11 = vadd.f32 %v8966_v3, %v7264_v51 }
 0x18f   :  { %v1741_v60 = vadd.f32 %v8966_v3, %v1740_v54  ;;  %v2102_v14 = vadd.f32 %v8966_v3, %v2101_v55  ;;  %v7217_v61 = vpop.f32.mrb[78].mxu0  ;;  %v7265_v63 = vpop.f32.mrb[78].mxu1 }
 0x190   :  { %v1743_v0 = vpop.f32.mrb[79].mxu0  ;;  %v2104_v2 = vpop.f32.mrb[79].mxu1  ;;  %v1860_v4 = vadd.f32 %v1859_v58, %v1829_v52  ;;  %v2221_v5 = vadd.f32 %v2220_v59, %v2190_v53  ;;  %v1752_v17 = vadd.f32 %v8966_v3, %v7217_v61  ;;  %v2113_v19 = vadd.f32 %v8966_v3, %v7265_v63 }
 0x191   :  { %v1831_v7 = vmax.f32 %v1741_v60, 0.0  ;;  %v2192_v8 = vmax.f32 %v2102_v14, 0.0  ;;  %v1744_v12 = vadd.f32 %v8966_v3, %v1743_v0  ;;  %v2105_v13 = vadd.f32 %v8966_v3, %v2104_v2 }
 0x192   :  { %7515 = vmatmul.mubr.bf16.gmra.mrb[184].mxu0 %v7956_v56  ;;  %v1861_v15 = vadd.f32 %v1860_v4, %v1830_v20  ;;  %v2222_v16 = vadd.f32 %v2221_v5, %v2191_v62  ;;  %v1833_v26 = vmax.f32 %v1749_v9, 0.0  ;;  %v2194_v27 = vmax.f32 %v2110_v11, 0.0  ;;  %v7964_v62 = vld [vmem:[%s9802_s0 + $0x608] sm:$0xff]  }
 0x193   :  { %7563 = vmatmul.mubr.bf16.gmra.mrb[184].mxu1 %v7957_v1  ;;  %7518 = vmatprep.mubr.bf16.mxu0 %v7958_v29  ;;  %v1832_v21 = vmax.f32 %v1744_v12, 0.0  ;;  %v2193_v22 = vmax.f32 %v2105_v13, 0.0  ;;  %v1834_v41 = vmax.f32 %v1752_v17, 0.0  ;;  %v2195_v43 = vmax.f32 %v2113_v19, 0.0 }
 0x194   :  { %7566 = vmatprep.mubr.bf16.mxu1 %v7959_v18  ;;  %v1862_v23 = vadd.f32 %v1861_v15, %v1831_v7  ;;  %v2223_v24 = vadd.f32 %v2222_v16, %v2192_v8  ;;  %v7965_v8 = vld [vmem:[%s9802_s0 + $0x688] sm:$0xff]   ;;  %v7966_v15 = vld [vmem:[%s9802_s0 + $0x610] sm:$0xff]  }
 0x195   :  { %v7220_v42 = vpop.f32.mrb[80].mxu0  ;;  %v7268_v25 = vpop.f32.mrb[80].mxu1 }
 0x196   :  { %v1756_v28 = vpop.f32.mrb[81].mxu0  ;;  %v2117_v40 = vpop.f32.mrb[81].mxu1  ;;  %v1863_v31 = vadd.f32 %v1862_v23, %v1832_v21  ;;  %v2224_v33 = vadd.f32 %v2223_v24, %v2193_v22  ;;  %v1765_v10 = vadd.f32 %v8966_v3, %v7220_v42  ;;  %v2126_v37 = vadd.f32 %v8966_v3, %v7268_v25  ;;  %v7967_v22 = vld [vmem:[%s9802_s0 + $0x690] sm:$0xff]  }
 0x197   :  { %v1757_v34 = vadd.f32 %v8966_v3, %v1756_v28  ;;  %v2118_v35 = vadd.f32 %v8966_v3, %v2117_v40  ;;  %v7221_v32 = vpop.f32.mrb[82].mxu0  ;;  %v7269_v36 = vpop.f32.mrb[82].mxu1 }
 0x198   :  { %v1759_v6 = vpop.f32.mrb[83].mxu0  ;;  %v2120_v44 = vpop.f32.mrb[83].mxu1  ;;  %v1864_v46 = vadd.f32 %v1863_v31, %v1833_v26  ;;  %v2225_v47 = vadd.f32 %v2224_v33, %v2194_v27  ;;  %v1768_v54 = vadd.f32 %v8966_v3, %v7221_v32  ;;  %v2129_v55 = vadd.f32 %v8966_v3, %v7269_v36  ;;  %v8044_v36 = vld [vmem:[%s9801_s1 + $0x8] sm:$0xff]  }
 0x199   :  { %v1835_v48 = vmax.f32 %v1757_v34, 0.0  ;;  %v2196_v49 = vmax.f32 %v2118_v35, 0.0  ;;  %v1760_v50 = vadd.f32 %v8966_v3, %v1759_v6  ;;  %v2121_v51 = vadd.f32 %v8966_v3, %v2120_v44  ;;  %v7968_v6 = vld [vmem:[%s9802_s0 + $0x618] sm:$0xff]  }
 0x19a   :  { %7519 = vmatmul.mubr.bf16.gmra.mrb[188].mxu0 %v7960_v30  ;;  %v1865_v52 = vadd.f32 %v1864_v46, %v1834_v41  ;;  %v2226_v53 = vadd.f32 %v2225_v47, %v2195_v43  ;;  %v1837_v63 = vmax.f32 %v1765_v10, 0.0  ;;  %v2198_v1 = vmax.f32 %v2126_v37, 0.0  ;;  %v7970_v10 = vld [vmem:[%s9802_s0 + $0x620] sm:$0xff]  }
 0x19b   :  { %7567 = vmatmul.mubr.bf16.gmra.mrb[188].mxu1 %v7961_v38  ;;  %7586 = vmatprep.mubr.bf16.mxu0 %v7962_v39  ;;  %v1836_v56 = vmax.f32 %v1760_v50, 0.0  ;;  %v2197_v58 = vmax.f32 %v2121_v51, 0.0  ;;  %v1838_v9 = vmax.f32 %v1768_v54, 0.0  ;;  %v2199_v11 = vmax.f32 %v2129_v55, 0.0  ;;  %v8045_v54 = vld [vmem:[%s9801_s1 + $0x10] sm:$0xff]  }
 0x19c   :  { %7634 = vmatprep.mubr.bf16.mxu1 %v7963_v45  ;;  %v1866_v59 = vadd.f32 %v1865_v52, %v1835_v48  ;;  %v2227_v60 = vadd.f32 %v2226_v53, %v2196_v49  ;;  %v7969_v49 = vld [vmem:[%s9802_s0 + $0x698] sm:$0xff]   ;;  %v7971_v53 = vld [vmem:[%s9802_s0 + $0x6a0] sm:$0xff]  }
 0x19d   :  { %v7224_v14 = vpop.f32.mrb[84].mxu0  ;;  %v7272_v61 = vpop.f32.mrb[84].mxu1 }
 0x19e   :  { %v1772_v29 = vpop.f32.mrb[85].mxu0  ;;  %v2133_v20 = vpop.f32.mrb[85].mxu1  ;;  %v1867_v0 = vadd.f32 %v1866_v59, %v1836_v56  ;;  %v2228_v2 = vadd.f32 %v2227_v60, %v2197_v58  ;;  %v1781_v23 = vadd.f32 %v8966_v3, %v7224_v14  ;;  %v2142_v24 = vadd.f32 %v8966_v3, %v7272_v61 }
 0x19f   :  { %v1773_v18 = vadd.f32 %v8966_v3, %v1772_v29  ;;  %v2134_v4 = vadd.f32 %v8966_v3, %v2133_v20  ;;  %v7225_v5 = vpop.f32.mrb[86].mxu0  ;;  %v7273_v7 = vpop.f32.mrb[86].mxu1 }
 0x1a0   :  { %v1775_v12 = vpop.f32.mrb[87].mxu0  ;;  %v2136_v13 = vpop.f32.mrb[87].mxu1  ;;  %v1868_v16 = vadd.f32 %v1867_v0, %v1837_v63  ;;  %v2229_v17 = vadd.f32 %v2228_v2, %v2198_v1  ;;  %v1784_v28 = vadd.f32 %v8966_v3, %v7225_v5  ;;  %v2145_v40 = vadd.f32 %v8966_v3, %v7273_v7 }
 0x1a1   :  { %v1839_v19 = vmax.f32 %v1773_v18, 0.0  ;;  %v2200_v21 = vmax.f32 %v2134_v4, 0.0  ;;  %v1776_v42 = vadd.f32 %v8966_v3, %v1775_v12  ;;  %v2137_v25 = vadd.f32 %v8966_v3, %v2136_v13 }
 0x1a2   :  { %7587 = vmatmul.mubr.bf16.vlgmr.msra.gmra.mrb[192].mxu0 %v7964_v62  ;;  %v1869_v26 = vadd.f32 %v1868_v16, %v1838_v9  ;;  %v2230_v27 = vadd.f32 %v2229_v17, %v2199_v11  ;;  %v1841_v38 = vmax.f32 %v1781_v23, 0.0  ;;  %v2202_v39 = vmax.f32 %v2142_v24, 0.0  ;;  %v9254_v17 = vld [vmem:[%s9803_s2] ss:$0 sm:$0xff]  ;;  %v7973_v24 = vld [vmem:[%s9802_s0 + $0x6a8] sm:$0xff]  }
 0x1a3   :  { %7635 = vmatmul.mubr.bf16.vlgmr.msra.gmra.mrb[192].mxu1 %v7965_v8  ;;  %7667 = vmatpush3.bf16.msra.mxu0 %v9122_v57  ;;  %v1840_v30 = vmax.f32 %v1776_v42, 0.0  ;;  %v2201_v31 = vmax.f32 %v2137_v25, 0.0  ;;  %v1842_v37 = vmax.f32 %v1784_v28, 0.0  ;;  %v2203_v50 = vmax.f32 %v2145_v40, 0.0  ;;  %v8046_v8 = vld [vmem:[%s9801_s1 + $0x18] sm:$0xff]   ;;  %v7974_v42 = vld [vmem:[%s9802_s0 + $0x630] sm:$0xff]  }
 0x1a4   :  { %7715 = vmatpush3.bf16.msra.mxu1 %v9122_v57  ;;  %7590 = vmatprep.mubr.bf16.mxu0 %v7966_v15  ;;  %v1870_v33 = vadd.f32 %v1869_v26, %v1839_v19  ;;  %v2231_v34 = vadd.f32 %v2230_v27, %v2200_v21  ;;  %v7975_v40 = vld [vmem:[%s9802_s0 + $0x6b0] sm:$0xff]  }
 0x1a5   :  { %v7228_v35 = vpop.f32.mrb[88].mxu0  ;;  %v7276_v32 = vpop.f32.mrb[88].mxu1  ;;  %7638 = vmatprep.mubr.bf16.mxu1 %v7967_v22  ;;  %7668 = vmatprep.subr.bf16.mxu0 %v8044_v36 }
 0x1a6   :  { %v1788_v41 = vpop.f32.mrb[89].mxu0  ;;  %v2149_v43 = vpop.f32.mrb[89].mxu1  ;;  %7716 = vmatprep.subr.bf16.mxu1 %v8044_v36  ;;  %v1871_v57 = vadd.f32 %v1870_v33, %v1840_v30  ;;  %v2232_v44 = vadd.f32 %v2231_v34, %v2201_v31  ;;  %v1797_v60 = vadd.f32 %v8966_v3, %v7228_v35  ;;  %v2158_v14 = vadd.f32 %v8966_v3, %v7276_v32  ;;  %v8048_v35 = vld [vmem:[%s9801_s1 + $0x20] sm:$0xff]  }
 0x1a7   :  { %v1789_v45 = vadd.f32 %v8966_v3, %v1788_v41  ;;  %v2150_v46 = vadd.f32 %v8966_v3, %v2149_v43  ;;  %v7229_v47 = vpop.f32.mrb[90].mxu0  ;;  %v7277_v48 = vpop.f32.mrb[90].mxu1  ;;  %7669 = vmatpush3.bf16.msra.mxu0 %v8044_v36 }
 0x1a8   :  { %v1791_v51 = vpop.f32.mrb[91].mxu0  ;;  %v2152_v52 = vpop.f32.mrb[91].mxu1  ;;  %7717 = vmatpush3.bf16.msra.mxu1 %v8044_v36  ;;  %7670 = vmatprep.subr.bf16.mxu0 %v8045_v54  ;;  %v1872_v55 = vadd.f32 %v1871_v57, %v1841_v38  ;;  %v2233_v56 = vadd.f32 %v2232_v44, %v2202_v39  ;;  %v1800_v20 = vadd.f32 %v8966_v3, %v7229_v47  ;;  %v1845_v9 = vmax.f32 %v1797_v60, 0.0  ;;  %v7978_v60 = vld [vmem:[%s9802_s0 + $0x640] sm:$0xff]  }
 0x1a9   :  { %v1843_v58 = vmax.f32 %v1789_v45, 0.0  ;;  %v2204_v59 = vmax.f32 %v2150_v46, 0.0  ;;  %7718 = vmatprep.subr.bf16.mxu1 %v8045_v54  ;;  %v1792_v61 = vadd.f32 %v8966_v3, %v1791_v51  ;;  %v2153_v63 = vadd.f32 %v8966_v3, %v2152_v52  ;;  %v7976_v51 = vld [vmem:[%s9802_s0 + $0x638] sm:$0xff]  }
 0x1aa   :  { %7591 = vmatmul.mubr.bf16.gmra.mrb[196].mxu0 %v7968_v6  ;;  %v1873_v1 = vadd.f32 %v1872_v55, %v1842_v37  ;;  %v2234_v29 = vadd.f32 %v2233_v56, %v2203_v50  ;;  %v2161_v62 = vadd.f32 %v8966_v3, %v7277_v48  ;;  %v2206_v11 = vmax.f32 %v2158_v14, 0.0  ;;  %v7972_v3 = vld [vmem:[%s9802_s0 + $0x628] sm:$0xff]  }
 0x1ab   :  { %7639 = vmatmul.mubr.bf16.gmra.mrb[196].mxu1 %v7969_v49  ;;  %7594 = vmatprep.mubr.bf16.mxu0 %v7970_v10  ;;  %v1844_v0 = vmax.f32 %v1792_v61, 0.0  ;;  %v2205_v2 = vmax.f32 %v2153_v63, 0.0  ;;  %v1846_v25 = vmax.f32 %v1800_v20, 0.0  ;;  %v8049_v10 = vld [vmem:[%s9801_s1 + $0x28] sm:$0xff]  }
 0x1ac   :  { %7642 = vmatprep.mubr.bf16.mxu1 %v7971_v53  ;;  %7671 = vmatpush3.bf16.msra.mxu0 %v8045_v54  ;;  %v1874_v18 = vadd.f32 %v1873_v1, %v1843_v58  ;;  %v2235_v4 = vadd.f32 %v2234_v29, %v2204_v59  ;;  %v2207_v26 = vmax.f32 %v2161_v62, 0.0  ;;  %v7977_v59 = vld [vmem:[%s9802_s0 + $0x6b8] sm:$0xff]   ;;  %v7979_v62 = vld [vmem:[%s9802_s0 + $0x6c0] sm:$0xff]  }
 0x1ad   :  { %v7232_v5 = vpop.f32.mrb[92].mxu0  ;;  %v7280_v7 = vpop.f32.mrb[92].mxu1  ;;  %7719 = vmatpush3.bf16.msra.mxu1 %v8045_v54  ;;  %7672 = vmatprep.subr.bf16.mxu0 %v8046_v8 }
 0x1ae   :  { %v1804_v12 = vpop.f32.mrb[93].mxu0  ;;  %v2165_v13 = vpop.f32.mrb[93].mxu1  ;;  %7720 = vmatprep.subr.bf16.mxu1 %v8046_v8  ;;  %v1875_v15 = vadd.f32 %v1874_v18, %v1844_v0  ;;  %v2236_v16 = vadd.f32 %v2235_v4, %v2205_v2  ;;  %v1813_v32 = vadd.f32 %v9254_v17, %v7232_v5  ;;  %v2174_v39 = vadd.f32 %v9254_v17, %v7280_v7  ;;  %v8050_v5 = vld [vmem:[%s9801_s1 + $0x30] sm:$0xff]  }
 0x1af   :  { %v1805_v19 = vadd.f32 %v9254_v17, %v1804_v12  ;;  %v2166_v21 = vadd.f32 %v9254_v17, %v2165_v13  ;;  %v7233_v22 = vpop.f32.mrb[94].mxu0  ;;  %v7281_v23 = vpop.f32.mrb[94].mxu1 }
 0x1b0   :  { %v1807_v27 = vpop.f32.mrb[95].mxu0  ;;  %v2168_v28 = vpop.f32.mrb[95].mxu1  ;;  %7673 = vmatpush3.bf16.msra.mxu0 %v8046_v8  ;;  %v1876_v30 = vadd.f32 %v1875_v15, %v1845_v9  ;;  %v2237_v31 = vadd.f32 %v2236_v16, %v2206_v11  ;;  %v1816_v6 = vadd.f32 %v9254_v17, %v7233_v22  ;;  %v2177_v47 = vadd.f32 %v9254_v17, %v7281_v23 }
 0x1b1   :  { %v1847_v33 = vmax.f32 %v1805_v19, 0.0  ;;  %v2208_v34 = vmax.f32 %v2166_v21, 0.0  ;;  %7721 = vmatpush3.bf16.msra.mxu1 %v8046_v8  ;;  %7674 = vmatprep.subr.bf16.mxu0 %v8048_v35  ;;  %v1808_v36 = vadd.f32 %v9254_v17, %v1807_v27  ;;  %v2169_v38 = vadd.f32 %v9254_v17, %v2168_v28 }
 0x1b2   :  { %7595 = vmatmul.mubr.bf16.gmra.mrb[200].mxu0 %v7972_v3  ;;  %7722 = vmatprep.subr.bf16.mxu1 %v8048_v35  ;;  %v1877_v41 = vadd.f32 %v1876_v30, %v1846_v25  ;;  %v2238_v43 = vadd.f32 %v2237_v31, %v2207_v26  ;;  %v1849_v52 = vmax.f32 %v1813_v32, 0.0  ;;  %v2210_v53 = vmax.f32 %v2174_v39, 0.0  ;;  %v8051_v25 = vld [vmem:[%s9801_s1 + $0x38] sm:$0xff]  }
 0x1b3   :  { %7643 = vmatmul.mubr.bf16.gmra.mrb[200].mxu1 %v7973_v24  ;;  %7598 = vmatprep.mubr.bf16.mxu0 %v7974_v42  ;;  %v1848_v57 = vmax.f32 %v1808_v36, 0.0  ;;  %v2209_v44 = vmax.f32 %v2169_v38, 0.0  ;;  %v1850_v14 = vmax.f32 %v1816_v6, 0.0  ;;  %v2211_v0 = vmax.f32 %v2177_v47, 0.0  ;;  %v7982_v47 = vld [vmem:[%s9802_s0 + $0x650] sm:$0xff]  }
 0x1b4   :  { %7646 = vmatprep.mubr.bf16.mxu1 %v7975_v40  ;;  %7675 = vmatpush3.bf16.msra.mxu0 %v8048_v35  ;;  %v1878_v45 = vadd.f32 %v1877_v41, %v1847_v33  ;;  %v2239_v46 = vadd.f32 %v2238_v43, %v2208_v34  ;;  %v7980_v33 = vld [vmem:[%s9802_s0 + $0x648] sm:$0xff]  }
 0x1b5   :  { %v7300_v48 = vpop.f32.mrb[96].mxu0  ;;  %v7348_v49 = vpop.f32.mrb[96].mxu1  ;;  %7723 = vmatpush3.bf16.msra.mxu1 %v8048_v35  ;;  %7676 = vmatprep.subr.bf16.mxu0 %v8049_v10  ;;  %v7981_v41 = vld [vmem:[%s9802_s0 + $0x6c8] sm:$0xff]  }
 0x1b6   :  { %v2414_v37 = vpop.f32.mrb[97].mxu0  ;;  %v2775_v50 = vpop.f32.mrb[97].mxu1  ;;  %7724 = vmatprep.subr.bf16.mxu1 %v8049_v10  ;;  %v1879_v54 = vadd.f32 %v1878_v45, %v1848_v57  ;;  %v2240_v55 = vadd.f32 %v2239_v46, %v2209_v44  ;;  %v2423_v61 = vadd.f32 %v9254_v17, %v7300_v48  ;;  %v2784_v4 = vadd.f32 %v9254_v17, %v7348_v49  ;;  %v7983_v48 = vld [vmem:[%s9802_s0 + $0x6d0] sm:$0xff]  }
 0x1b7   :  { %v7301_v56 = vpop.f32.mrb[98].mxu0  ;;  %v7349_v58 = vpop.f32.mrb[98].mxu1  ;;  %v2415_v63 = vadd.f32 %v9254_v17, %v2414_v37  ;;  %v2776_v1 = vadd.f32 %v9254_v17, %v2775_v50 }
 0x1b8   :  { %v2417_v29 = vpop.f32.mrb[99].mxu0  ;;  %v2778_v20 = vpop.f32.mrb[99].mxu1  ;;  %7677 = vmatpush3.bf16.msra.mxu0 %v8049_v10  ;;  %v1880_v2 = vadd.f32 %v1879_v54, %v1849_v52  ;;  %v2241_v18 = vadd.f32 %v2240_v55, %v2210_v53  ;;  %v2426_v7 = vadd.f32 %v9254_v17, %v7301_v56  ;;  %v2787_v13 = vadd.f32 %v9254_v17, %v7349_v58 }
 0x1b9   :  { %7725 = vmatpush3.bf16.msra.mxu1 %v8049_v10  ;;  %7678 = vmatprep.subr.bf16.mxu0 %v8050_v5  ;;  %v2418_v8 = vadd.f32 %v9254_v17, %v2417_v29  ;;  %v2779_v9 = vadd.f32 %v9254_v17, %v2778_v20  ;;  %v2541_v3 = vmax.f32 %v2415_v63, 0.0  ;;  %v2902_v15 = vmax.f32 %v2776_v1, 0.0 }
 0x1ba   :  { %7599 = vmatmul.mubr.bf16.gmra.mrb[204].mxu0 %v7976_v51  ;;  %7726 = vmatprep.subr.bf16.mxu1 %v8050_v5  ;;  %v1881_v11 = vadd.f32 %v1880_v2, %v1850_v14  ;;  %v2242_v12 = vadd.f32 %v2241_v18, %v2211_v0  ;;  %v2543_v23 = vmax.f32 %v2423_v61, 0.0  ;;  %v2904_v26 = vmax.f32 %v2784_v4, 0.0 }
 0x1bb   :  { %7647 = vmatmul.mubr.bf16.gmra.mrb[204].mxu1 %v7977_v59  ;;  %7602 = vmatprep.mubr.bf16.mxu0 %v7978_v60  ;;  %v2542_v16 = vmax.f32 %v2418_v8, 0.0  ;;  %v2903_v19 = vmax.f32 %v2779_v9, 0.0  ;;  %v2544_v27 = vmax.f32 %v2426_v7, 0.0  ;;  %v2905_v43 = vmax.f32 %v2787_v13, 0.0  ;;  %v7984_v7 = vld [vmem:[%s9802_s0 + $0x658] sm:$0xff]  }
 0x1bc   :  { %7650 = vmatprep.mubr.bf16.mxu1 %v7979_v62  ;;  %7679 = vmatpush3.bf16.msra.mxu0 %v8050_v5  ;;  %v1882_v21 = vrot.slane %v1881_v11, 4  ;;  %v2243_v22 = vrot.slane %v2242_v12, 4 }
 0x1bd   :  { %v7304_v24 = vpop.f32.mrb[100].mxu0  ;;  %v7352_v42 = vpop.f32.mrb[100].mxu1  ;;  %7727 = vmatpush3.bf16.msra.mxu1 %v8050_v5  ;;  %7680 = vmatprep.subr.bf16.mxu0 %v8051_v25  ;;  %v2573_v28 = vadd.f32 %v2542_v16, %v2541_v3  ;;  %v2934_v40 = vadd.f32 %v2903_v19, %v2902_v15  ;;  %v7985_v15 = vld [vmem:[%s9802_s0 + $0x6d8] sm:$0xff]  }
 0x1be   :  { %v2430_v30 = vpop.f32.mrb[101].mxu0  ;;  %v2791_v31 = vpop.f32.mrb[101].mxu1  ;;  %7728 = vmatprep.subr.bf16.mxu1 %v8051_v25  ;;  %v1883_v34 = vadd.f32 %v1882_v21, %v1881_v11  ;;  %v2244_v35 = vadd.f32 %v2243_v22, %v2242_v12  ;;  %v2439_v44 = vadd.f32 %v9254_v17, %v7304_v24  ;;  %v2800_v51 = vadd.f32 %v9254_v17, %v7352_v42  ;;  %v7986_v42 = vld [vmem:[%s9802_s0 + $0x660] sm:$0xff]  }
 0x1bf   :  { %v2431_v32 = vadd.f32 %v9254_v17, %v2430_v30  ;;  %v2792_v36 = vadd.f32 %v9254_v17, %v2791_v31  ;;  %v7305_v38 = vpop.f32.mrb[102].mxu0  ;;  %v7353_v39 = vpop.f32.mrb[102].mxu1  ;;  %v2574_v6 = vadd.f32 %v2573_v28, %v2543_v23  ;;  %v2935_v57 = vadd.f32 %v2934_v40, %v2904_v26 }
 0x1c0   :  { %v2433_v45 = vpop.f32.mrb[103].mxu0  ;;  %v2794_v46 = vpop.f32.mrb[103].mxu1  ;;  %7681 = vmatpush3.bf16.msra.mxu0 %v8051_v25  ;;  %v1884_v49 = vrot.slane %v1883_v34, 2  ;;  %v2245_v10 = vrot.slane %v2244_v35, 2  ;;  %v2442_v54 = vadd.f32 %v9254_v17, %v7305_v38  ;;  %v2803_v61 = vadd.f32 %v9254_v17, %v7353_v39 }
 0x1c1   :  { %v2545_v37 = vmax.f32 %v2431_v32, 0.0  ;;  %v2906_v50 = vmax.f32 %v2792_v36, 0.0  ;;  %7729 = vmatpush3.bf16.msra.mxu1 %v8051_v25  ;;  %v2575_v52 = vadd.f32 %v2574_v6, %v2544_v27  ;;  %v2936_v53 = vadd.f32 %v2935_v57, %v2905_v43  ;;  %v7987_v25 = vld [vmem:[%s9802_s0 + $0x6e0] sm:$0xff]  }
 0x1c2   :  { %7603 = vmatmul.mubr.bf16.gmra.mrb[208].mxu0 %v7980_v33  ;;  %v1885_v55 = vadd.f32 %v1884_v49, %v1883_v34  ;;  %v2246_v56 = vadd.f32 %v2245_v10, %v2244_v35  ;;  %v2434_v58 = vadd.f32 %v9254_v17, %v2433_v45  ;;  %v2795_v59 = vadd.f32 %v9254_v17, %v2794_v46 }
 0x1c3   :  { %7651 = vmatmul.mubr.bf16.gmra.mrb[208].mxu1 %v7981_v41  ;;  %v2576_v60 = vadd.f32 %v2575_v52, %v2545_v37  ;;  %v2937_v14 = vadd.f32 %v2936_v53, %v2906_v50  ;;  %7606 = vmatprep.mubr.bf16.mxu0 %v7982_v47  ;;  %v2547_v2 = vmax.f32 %v2439_v44, 0.0  ;;  %v2908_v18 = vmax.f32 %v2800_v51, 0.0  ;;  %v7988_v37 = vld [vmem:[%s9802_s0 + $0x668] sm:$0xff]  }
 0x1c4   :  { %7654 = vmatprep.mubr.bf16.mxu1 %v7983_v48  ;;  %v1886_v63 = vrot.slane %v1885_v55, 1  ;;  %v2247_v1 = vrot.slane %v2246_v56, 1  ;;  %v2546_v29 = vmax.f32 %v2434_v58, 0.0  ;;  %v2907_v20 = vmax.f32 %v2795_v59, 0.0  ;;  %v7990_v58 = vld [vmem:[%s9802_s0 + $0x670] sm:$0xff]  }
 0x1c5   :  { %v7308_v62 = vpop.f32.mrb[104].mxu0  ;;  %v7356_v0 = vpop.f32.mrb[104].mxu1  ;;  %v2548_v16 = vmax.f32 %v2442_v54, 0.0  ;;  %v2909_v19 = vmax.f32 %v2803_v61, 0.0 }
 0x1c6   :  { %v2446_v4 = vpop.f32.mrb[105].mxu0  ;;  %v2807_v5 = vpop.f32.mrb[105].mxu1  ;;  %v1887_v8 = vadd.f32 %v1886_v63, %v1885_v55  ;;  %v2248_v9 = vadd.f32 %v2247_v1, %v2246_v56  ;;  %v2577_v11 = vadd.f32 %v2576_v60, %v2546_v29  ;;  %v2938_v12 = vadd.f32 %v2937_v14, %v2907_v20  ;;  %v7989_v56 = vld [vmem:[%s9802_s0 + $0x6e8] sm:$0xff]   ;;  %v7991_v63 = vld [vmem:[%s9802_s0 + $0x6f0] sm:$0xff]  }
 0x1c7   :  { %v7309_v13 = vpop.f32.mrb[106].mxu0  ;;  %v7357_v3 = vpop.f32.mrb[106].mxu1  ;;  %v2447_v21 = vadd.f32 %v9254_v17, %v2446_v4  ;;  %v2808_v22 = vadd.f32 %v9254_v17, %v2807_v5  ;;  %v2455_v30 = vadd.f32 %v9254_v17, %v7308_v62  ;;  %v2816_v31 = vadd.f32 %v9254_v17, %v7356_v0 }
 0x1c8   :  { %v2449_v23 = vpop.f32.mrb[107].mxu0  ;;  %v2810_v24 = vpop.f32.mrb[107].mxu1  ;;  %v1888_v26 = vmul.f32 0.00390625, %v1887_v8  ;;  %v2249_v27 = vmul.f32 0.00390625, %v2248_v9  ;;  %v2578_v28 = vadd.f32 %v2577_v11, %v2547_v2  ;;  %v2939_v40 = vadd.f32 %v2938_v12, %v2908_v18 }
 0x1c9   :  { %v2549_v33 = vmax.f32 %v2447_v21, 0.0  ;;  %v2910_v34 = vmax.f32 %v2808_v22, 0.0  ;;  %v2450_v36 = vadd.f32 %v9254_v17, %v2449_v23  ;;  %v2811_v38 = vadd.f32 %v9254_v17, %v2810_v24  ;;  %v7992_v24 = vld [vmem:[%s9802_s0 + $0x678] sm:$0xff]  }
 0x1ca   :  { %7607 = vmatmul.mubr.bf16.gmra.mrb[212].mxu0 %v7984_v7  ;;  %1889 = vst [vmem:[%s9804_s3 + $0x4] sm:$0x1] %v1888_v26  ;;  %2250 = vst [vmem:[%s9804_s3 + $0x5] sm:$0x1] %v2249_v27  ;;  %v2579_v35 = vadd.f32 %v2578_v28, %v2548_v16  ;;  %v2940_v32 = vadd.f32 %v2939_v40, %v2909_v19  ;;  %v2458_v39 = vadd.f32 %v9254_v17, %v7309_v13 }
 0x1cb   :  { %7655 = vmatmul.mubr.bf16.gmra.mrb[212].mxu1 %v7985_v15  ;;  %v2819_v41 = vadd.f32 %v9254_v17, %v7357_v3  ;;  %7610 = vmatprep.mubr.bf16.mxu0 %v7986_v42  ;;  %v2550_v57 = vmax.f32 %v2450_v36, 0.0  ;;  %v2911_v44 = vmax.f32 %v2811_v38, 0.0  ;;  %v2551_v47 = vmax.f32 %v2455_v30, 0.0  ;;  %v7993_v30 = vld [vmem:[%s9802_s0 + $0x6f8] sm:$0xff]   ;;  %v7995_v36 = vld [vmem:[%s9802_s0 + $0x780] sm:$0xff]  }
 0x1cc   :  { %7658 = vmatprep.mubr.bf16.mxu1 %v7987_v25  ;;  %v2580_v43 = vadd.f32 %v2579_v35, %v2549_v33  ;;  %v2941_v6 = vadd.f32 %v2940_v32, %v2910_v34  ;;  %v2912_v48 = vmax.f32 %v2816_v31, 0.0  ;;  %v2552_v59 = vmax.f32 %v2458_v39, 0.0  ;;  %v7994_v31 = vld [vmem:[%s9802_s0 + $0x700] sm:$0xff]  }
 0x1cd   :  { %v7312_v45 = vpop.f32.mrb[108].mxu0  ;;  %v7360_v46 = vpop.f32.mrb[108].mxu1  ;;  %v2913_v60 = vmax.f32 %v2819_v41, 0.0 }
 0x1ce   :  { %v2462_v49 = vpop.f32.mrb[109].mxu0  ;;  %v2823_v10 = vpop.f32.mrb[109].mxu1  ;;  %v2581_v50 = vadd.f32 %v2580_v43, %v2550_v57  ;;  %v2942_v51 = vadd.f32 %v2941_v6, %v2911_v44  ;;  %v2471_v0 = vadd.f32 %v9254_v17, %v7312_v45  ;;  %v2832_v2 = vadd.f32 %v9254_v17, %v7360_v46 }
 0x1cf   :  { %v2463_v52 = vadd.f32 %v9254_v17, %v2462_v49  ;;  %v2824_v53 = vadd.f32 %v9254_v17, %v2823_v10  ;;  %v7313_v54 = vpop.f32.mrb[110].mxu0  ;;  %v7361_v55 = vpop.f32.mrb[110].mxu1 }
 0x1d0   :  { %v2465_v14 = vpop.f32.mrb[111].mxu0  ;;  %v2826_v61 = vpop.f32.mrb[111].mxu1  ;;  %v2582_v1 = vadd.f32 %v2581_v50, %v2551_v47  ;;  %v2943_v29 = vadd.f32 %v2942_v51, %v2912_v48  ;;  %v2474_v8 = vadd.f32 %v9254_v17, %v7313_v54  ;;  %v2835_v9 = vadd.f32 %v9254_v17, %v7361_v55 }
 0x1d1   :  { %v2553_v20 = vmax.f32 %v2463_v52, 0.0  ;;  %v2914_v62 = vmax.f32 %v2824_v53, 0.0  ;;  %v2466_v18 = vadd.f32 %v9254_v17, %v2465_v14  ;;  %v2827_v4 = vadd.f32 %v9254_v17, %v2826_v61 }
 0x1d2   :  { %7611 = vmatmul.mubr.bf16.gmra.mrb[216].mxu0 %v7988_v37  ;;  %v2583_v5 = vadd.f32 %v2582_v1, %v2552_v59  ;;  %v2944_v7 = vadd.f32 %v2943_v29, %v2913_v60  ;;  %v2555_v19 = vmax.f32 %v2471_v0, 0.0  ;;  %v2916_v21 = vmax.f32 %v2832_v2, 0.0  ;;  %v7997_v1 = vld [vmem:[%s9802_s0 + $0x788] sm:$0xff]   ;;  %v7998_v29 = vld [vmem:[%s9802_s0 + $0x710] sm:$0xff]  }
 0x1d3   :  { %7659 = vmatmul.mubr.bf16.gmra.mrb[216].mxu1 %v7989_v56  ;;  %7614 = vmatprep.mubr.bf16.mxu0 %v7990_v58  ;;  %v2554_v11 = vmax.f32 %v2466_v18, 0.0  ;;  %v2915_v12 = vmax.f32 %v2827_v4, 0.0  ;;  %v2556_v33 = vmax.f32 %v2474_v8, 0.0  ;;  %v2917_v34 = vmax.f32 %v2835_v9, 0.0  ;;  %v7996_v56 = vld [vmem:[%s9802_s0 + $0x708] sm:$0xff]   ;;  %v7999_v18 = vld [vmem:[%s9802_s0 + $0x790] sm:$0xff]  }
 0x1d4   :  { %7662 = vmatprep.mubr.bf16.mxu1 %v7991_v63  ;;  %v2584_v13 = vadd.f32 %v2583_v5, %v2553_v20  ;;  %v2945_v3 = vadd.f32 %v2944_v7, %v2914_v62 }
 0x1d5   :  { %v7316_v15 = vpop.f32.mrb[112].mxu0  ;;  %v7364_v16 = vpop.f32.mrb[112].mxu1 }
 0x1d6   :  { %v2478_v22 = vpop.f32.mrb[113].mxu0  ;;  %v2839_v23 = vpop.f32.mrb[113].mxu1  ;;  %v2585_v42 = vadd.f32 %v2584_v13, %v2554_v11  ;;  %v2946_v25 = vadd.f32 %v2945_v3, %v2915_v12  ;;  %v2487_v6 = vadd.f32 %v9254_v17, %v7316_v15  ;;  %v2848_v45 = vadd.f32 %v9254_v17, %v7364_v16 }
 0x1d7   :  { %v2479_v26 = vadd.f32 %v9254_v17, %v2478_v22  ;;  %v2840_v27 = vadd.f32 %v9254_v17, %v2839_v23  ;;  %v7317_v28 = vpop.f32.mrb[114].mxu0  ;;  %v7365_v40 = vpop.f32.mrb[114].mxu1 }
 0x1d8   :  { %v2481_v35 = vpop.f32.mrb[115].mxu0  ;;  %v2842_v32 = vpop.f32.mrb[115].mxu1  ;;  %v2586_v38 = vadd.f32 %v2585_v42, %v2555_v19  ;;  %v2947_v39 = vadd.f32 %v2946_v25, %v2916_v21  ;;  %v2490_v48 = vadd.f32 %v9254_v17, %v7317_v28  ;;  %v2851_v51 = vadd.f32 %v9254_v17, %v7365_v40 }
 0x1d9   :  { %v2557_v41 = vmax.f32 %v2479_v26, 0.0  ;;  %v2918_v43 = vmax.f32 %v2840_v27, 0.0  ;;  %v2482_v57 = vadd.f32 %v9254_v17, %v2481_v35  ;;  %v2843_v44 = vadd.f32 %v9254_v17, %v2842_v32 }
 0x1da   :  { %7615 = vmatmul.mubr.bf16.gmra.mrb[220].mxu0 %v7992_v24  ;;  %v2587_v46 = vadd.f32 %v2586_v38, %v2556_v33  ;;  %v2948_v47 = vadd.f32 %v2947_v39, %v2917_v34  ;;  %v2559_v53 = vmax.f32 %v2487_v6, 0.0  ;;  %v2920_v58 = vmax.f32 %v2848_v45, 0.0  ;;  %v8001_v38 = vld [vmem:[%s9802_s0 + $0x798] sm:$0xff]   ;;  %v8002_v39 = vld [vmem:[%s9802_s0 + $0x720] sm:$0xff]  }
 0x1db   :  { %7663 = vmatmul.mubr.bf16.gmra.mrb[220].mxu1 %v7993_v30  ;;  %7682 = vmatprep.mubr.bf16.mxu0 %v7994_v31  ;;  %v2558_v49 = vmax.f32 %v2482_v57, 0.0  ;;  %v2919_v10 = vmax.f32 %v2843_v44, 0.0  ;;  %v2560_v20 = vmax.f32 %v2490_v48, 0.0  ;;  %v2921_v4 = vmax.f32 %v2851_v51, 0.0  ;;  %v8000_v30 = vld [vmem:[%s9802_s0 + $0x718] sm:$0xff]   ;;  %v8003_v44 = vld [vmem:[%s9802_s0 + $0x7a0] sm:$0xff]  }
 0x1dc   :  { %7730 = vmatprep.mubr.bf16.mxu1 %v7995_v36  ;;  %v2588_v37 = vadd.f32 %v2587_v46, %v2557_v41  ;;  %v2949_v50 = vadd.f32 %v2948_v47, %v2918_v43 }
 0x1dd   :  { %v7320_v52 = vpop.f32.mrb[116].mxu0  ;;  %v7368_v54 = vpop.f32.mrb[116].mxu1 }
 0x1de   :  { %v2494_v55 = vpop.f32.mrb[117].mxu0  ;;  %v2589_v59 = vadd.f32 %v2588_v37, %v2558_v49  ;;  %v2950_v60 = vadd.f32 %v2949_v50, %v2919_v10  ;;  %v2855_v61 = vpop.f32.mrb[117].mxu1  ;;  %v2503_v11 = vadd.f32 %v9254_v17, %v7320_v52  ;;  %v2864_v12 = vadd.f32 %v9254_v17, %v7368_v54 }
 0x1df   :  { %v2495_v14 = vadd.f32 %v9254_v17, %v2494_v55  ;;  %v7321_v63 = vpop.f32.mrb[118].mxu0  ;;  %v2856_v62 = vadd.f32 %v9254_v17, %v2855_v61  ;;  %v7369_v0 = vpop.f32.mrb[118].mxu1 }
 0x1e0   :  { %v2497_v2 = vpop.f32.mrb[119].mxu0  ;;  %v2590_v5 = vadd.f32 %v2589_v59, %v2559_v53  ;;  %v2951_v7 = vadd.f32 %v2950_v60, %v2920_v58  ;;  %v2858_v9 = vpop.f32.mrb[119].mxu1  ;;  %v2506_v21 = vadd.f32 %v9254_v17, %v7321_v63  ;;  %v2867_v42 = vadd.f32 %v9254_v17, %v7369_v0 }
 0x1e1   :  { %v2561_v8 = vmax.f32 %v2495_v14, 0.0  ;;  %v2922_v13 = vmax.f32 %v2856_v62, 0.0  ;;  %v2498_v3 = vadd.f32 %v9254_v17, %v2497_v2  ;;  %v2859_v19 = vadd.f32 %v9254_v17, %v2858_v9 }
 0x1e2   :  { %7683 = vmatmul.mubr.bf16.vlgmr.msra.gmra.mrb[224].mxu0 %v7996_v56  ;;  %v2591_v15 = vadd.f32 %v2590_v5, %v2560_v20  ;;  %v2952_v16 = vadd.f32 %v2951_v7, %v2921_v4  ;;  %v2563_v27 = vmax.f32 %v2503_v11, 0.0  ;;  %v2924_v31 = vmax.f32 %v2864_v12, 0.0  ;;  %v8004_v20 = vld [vmem:[%s9802_s0 + $0x728] sm:$0xff]  }
 0x1e3   :  { %7731 = vmatmul.mubr.bf16.vlgmr.msra.gmra.mrb[224].mxu1 %v7997_v1  ;;  %7686 = vmatprep.mubr.bf16.mxu0 %v7998_v29  ;;  %v2562_v22 = vmax.f32 %v2498_v3, 0.0  ;;  %v2923_v25 = vmax.f32 %v2859_v19, 0.0  ;;  %v2564_v41 = vmax.f32 %v2506_v21, 0.0  ;;  %v2925_v45 = vmax.f32 %v2867_v42, 0.0  ;;  %v8005_v7 = vld [vmem:[%s9802_s0 + $0x7a8] sm:$0xff]   ;;  %v8007_v3 = vld [vmem:[%s9802_s0 + $0x7b0] sm:$0xff]  }
 0x1e4   :  { %7734 = vmatprep.mubr.bf16.mxu1 %v7999_v18  ;;  %v2592_v23 = vadd.f32 %v2591_v15, %v2561_v8  ;;  %v2953_v24 = vadd.f32 %v2952_v16, %v2922_v13  ;;  %v8006_v8 = vld [vmem:[%s9802_s0 + $0x730] sm:$0xff]  }
 0x1e5   :  { %v7324_v26 = vpop.f32.mrb[120].mxu0  ;;  %v7372_v28 = vpop.f32.mrb[120].mxu1 }
 0x1e6   :  { %v2510_v40 = vpop.f32.mrb[121].mxu0  ;;  %v2593_v33 = vadd.f32 %v2592_v23, %v2562_v22  ;;  %v2954_v34 = vadd.f32 %v2953_v24, %v2923_v25  ;;  %v2871_v32 = vpop.f32.mrb[121].mxu1  ;;  %v2519_v10 = vadd.f32 %v9254_v17, %v7324_v26  ;;  %v2880_v37 = vadd.f32 %v9254_v17, %v7372_v28 }
 0x1e7   :  { %v2511_v35 = vadd.f32 %v9254_v17, %v2510_v40  ;;  %v7325_v36 = vpop.f32.mrb[122].mxu0  ;;  %v2872_v43 = vadd.f32 %v9254_v17, %v2871_v32  ;;  %v7373_v6 = vpop.f32.mrb[122].mxu1 }
 0x1e8   :  { %v2513_v57 = vpop.f32.mrb[123].mxu0  ;;  %v2594_v46 = vadd.f32 %v2593_v33, %v2563_v27  ;;  %v2955_v47 = vadd.f32 %v2954_v34, %v2924_v31  ;;  %v2874_v49 = vpop.f32.mrb[123].mxu1  ;;  %v2522_v55 = vadd.f32 %v9254_v17, %v7325_v36  ;;  %v2883_v60 = vadd.f32 %v9254_v17, %v7373_v6 }
 0x1e9   :  { %v2565_v48 = vmax.f32 %v2511_v35, 0.0  ;;  %v2926_v50 = vmax.f32 %v2872_v43, 0.0  ;;  %v2514_v51 = vadd.f32 %v9254_v17, %v2513_v57  ;;  %v2875_v54 = vadd.f32 %v9254_v17, %v2874_v49 }
 0x1ea   :  { %7687 = vmatmul.mubr.bf16.gmra.mrb[228].mxu0 %v8000_v30  ;;  %v2595_v52 = vadd.f32 %v2594_v46, %v2564_v41  ;;  %v2956_v53 = vadd.f32 %v2955_v47, %v2925_v45  ;;  %v2567_v63 = vmax.f32 %v2519_v10, 0.0  ;;  %v2928_v62 = vmax.f32 %v2880_v37, 0.0  ;;  %v8009_v46 = vld [vmem:[%s9802_s0 + $0x7b8] sm:$0xff]   ;;  %v8010_v47 = vld [vmem:[%s9802_s0 + $0x740] sm:$0xff]  }
 0x1eb   :  { %7735 = vmatmul.mubr.bf16.gmra.mrb[228].mxu1 %v8001_v38  ;;  %7690 = vmatprep.mubr.bf16.mxu0 %v8002_v39  ;;  %v2566_v56 = vmax.f32 %v2514_v51, 0.0  ;;  %v2927_v14 = vmax.f32 %v2875_v54, 0.0  ;;  %v2568_v9 = vmax.f32 %v2522_v55, 0.0  ;;  %v2929_v15 = vmax.f32 %v2883_v60, 0.0  ;;  %v8008_v39 = vld [vmem:[%s9802_s0 + $0x738] sm:$0xff]  }
 0x1ec   :  { %7738 = vmatprep.mubr.bf16.mxu1 %v8003_v44  ;;  %v2596_v58 = vadd.f32 %v2595_v52, %v2565_v48  ;;  %v2957_v59 = vadd.f32 %v2956_v53, %v2926_v50  ;;  %v8011_v50 = vld [vmem:[%s9802_s0 + $0x7c0] sm:$0xff]  }
 0x1ed   :  { %v7328_v61 = vpop.f32.mrb[124].mxu0  ;;  %v7376_v1 = vpop.f32.mrb[124].mxu1 }
 0x1ee   :  { %v2526_v29 = vpop.f32.mrb[125].mxu0  ;;  %v2597_v0 = vadd.f32 %v2596_v58, %v2566_v56  ;;  %v2958_v2 = vadd.f32 %v2957_v59, %v2927_v14  ;;  %v2887_v4 = vpop.f32.mrb[125].mxu1  ;;  %v2535_v23 = vadd.f32 %v9254_v17, %v7328_v61  ;;  %v2896_v24 = vadd.f32 %v9254_v17, %v7376_v1 }
 0x1ef   :  { %v2527_v18 = vadd.f32 %v9254_v17, %v2526_v29  ;;  %v7329_v5 = vpop.f32.mrb[126].mxu0  ;;  %v2888_v11 = vadd.f32 %v9254_v17, %v2887_v4  ;;  %v7377_v12 = vpop.f32.mrb[126].mxu1 }
 0x1f0   :  { %v2529_v13 = vpop.f32.mrb[127].mxu0  ;;  %v2598_v16 = vadd.f32 %v2597_v0, %v2567_v63  ;;  %v2959_v19 = vadd.f32 %v2958_v2, %v2928_v62  ;;  %v2890_v22 = vpop.f32.mrb[127].mxu1  ;;  %v2538_v40 = vadd.f32 %v9254_v17, %v7329_v5  ;;  %v2899_v34 = vadd.f32 %v9254_v17, %v7377_v12  ;;  %v8012_v12 = vld [vmem:[%s9802_s0 + $0x748] sm:$0xff]  }
 0x1f1   :  { %v2569_v21 = vmax.f32 %v2527_v18, 0.0  ;;  %v2930_v42 = vmax.f32 %v2888_v11, 0.0  ;;  %v2530_v25 = vadd.f32 %v9254_v17, %v2529_v13  ;;  %v2891_v28 = vadd.f32 %v9254_v17, %v2890_v22  ;;  %v8013_v22 = vld [vmem:[%s9802_s0 + $0x7c8] sm:$0xff]  }
 0x1f2   :  { %7691 = vmatmul.mubr.bf16.gmra.mrb[232].mxu0 %v8004_v20  ;;  %v2599_v26 = vadd.f32 %v2598_v16, %v2568_v9  ;;  %v2960_v27 = vadd.f32 %v2959_v19, %v2929_v15  ;;  %v2571_v41 = vmax.f32 %v2535_v23, 0.0  ;;  %v2932_v43 = vmax.f32 %v2896_v24, 0.0 }
 0x1f3   :  { %7739 = vmatmul.mubr.bf16.gmra.mrb[232].mxu1 %v8005_v7  ;;  %7694 = vmatprep.mubr.bf16.mxu0 %v8006_v8  ;;  %v2570_v30 = vmax.f32 %v2530_v25, 0.0  ;;  %v2931_v35 = vmax.f32 %v2891_v28, 0.0  ;;  %v2572_v48 = vmax.f32 %v2538_v40, 0.0  ;;  %v2933_v51 = vmax.f32 %v2899_v34, 0.0  ;;  %v8014_v28 = vld [vmem:[%s9802_s0 + $0x750] sm:$0xff]  }
 0x1f4   :  { %7742 = vmatprep.mubr.bf16.mxu1 %v8007_v3  ;;  %v2600_v31 = vadd.f32 %v2599_v26, %v2569_v21  ;;  %v2961_v33 = vadd.f32 %v2960_v27, %v2930_v42  ;;  %v8015_v40 = vld [vmem:[%s9802_s0 + $0x7d0] sm:$0xff]  }
 0x1f5   :  { %v7396_v32 = vpop.f32.mrb[128].mxu0  ;;  %v7444_v36 = vpop.f32.mrb[128].mxu1 }
 0x1f6   :  { %v3136_v38 = vpop.f32.mrb[129].mxu0  ;;  %v2601_v6 = vadd.f32 %v2600_v31, %v2570_v30  ;;  %v2962_v57 = vadd.f32 %v2961_v33, %v2931_v35  ;;  %v3497_v44 = vpop.f32.mrb[129].mxu1  ;;  %v3145_v56 = vadd.f32 %v9254_v17, %v7396_v32  ;;  %v3506_v58 = vadd.f32 %v9254_v17, %v7444_v36 }
 0x1f7   :  { %v7397_v45 = vpop.f32.mrb[130].mxu0  ;;  %v3137_v49 = vadd.f32 %v9254_v17, %v3136_v38  ;;  %v7445_v10 = vpop.f32.mrb[130].mxu1  ;;  %v3498_v54 = vadd.f32 %v9254_v17, %v3497_v44 }
 0x1f8   :  { %v3139_v37 = vpop.f32.mrb[131].mxu0  ;;  %v2602_v52 = vadd.f32 %v2601_v6, %v2571_v41  ;;  %v2963_v53 = vadd.f32 %v2962_v57, %v2932_v43  ;;  %v3500_v55 = vpop.f32.mrb[131].mxu1  ;;  %v3148_v59 = vadd.f32 %v9254_v17, %v7397_v45  ;;  %v3509_v29 = vadd.f32 %v9254_v17, %v7445_v10 }
 0x1f9   :  { %v3140_v60 = vadd.f32 %v9254_v17, %v3139_v37  ;;  %v3501_v63 = vadd.f32 %v9254_v17, %v3500_v55  ;;  %v3263_v1 = vmax.f32 %v3137_v49, 0.0  ;;  %v3624_v2 = vmax.f32 %v3498_v54, 0.0  ;;  %v8016_v54 = vld [vmem:[%s9802_s0 + $0x758] sm:$0xff]  }
 0x1fa   :  { %7695 = vmatmul.mubr.bf16.gmra.mrb[236].mxu0 %v8008_v39  ;;  %v2603_v14 = vadd.f32 %v2602_v52, %v2572_v48  ;;  %v2964_v61 = vadd.f32 %v2963_v53, %v2933_v51  ;;  %v3265_v5 = vmax.f32 %v3145_v56, 0.0  ;;  %v3626_v7 = vmax.f32 %v3506_v58, 0.0 }
 0x1fb   :  { %7743 = vmatmul.mubr.bf16.gmra.mrb[236].mxu1 %v8009_v46  ;;  %7698 = vmatprep.mubr.bf16.mxu0 %v8010_v47  ;;  %v3264_v20 = vmax.f32 %v3140_v60, 0.0  ;;  %v3625_v18 = vmax.f32 %v3501_v63, 0.0  ;;  %v3266_v15 = vmax.f32 %v3148_v59, 0.0  ;;  %v3627_v23 = vmax.f32 %v3509_v29, 0.0  ;;  %v8018_v63 = vld [vmem:[%s9802_s0 + $0x760] sm:$0xff]  }
 0x1fc   :  { %7746 = vmatprep.mubr.bf16.mxu1 %v8011_v50  ;;  %v2604_v62 = vrot.slane %v2603_v14, 4  ;;  %v2965_v0 = vrot.slane %v2964_v61, 4 }
 0x1fd   :  { %v7400_v4 = vpop.f32.mrb[132].mxu0  ;;  %v3295_v8 = vadd.f32 %v3264_v20, %v3263_v1  ;;  %v7448_v9 = vpop.f32.mrb[132].mxu1  ;;  %v3656_v16 = vadd.f32 %v3625_v18, %v3624_v2  ;;  %v8019_v18 = vld [vmem:[%s9802_s0 + $0x7e0] sm:$0xff]  }
 0x1fe   :  { %v3152_v11 = vpop.f32.mrb[133].mxu0  ;;  %v2605_v13 = vadd.f32 %v2604_v62, %v2603_v14  ;;  %v2966_v3 = vadd.f32 %v2965_v0, %v2964_v61  ;;  %v3513_v19 = vpop.f32.mrb[133].mxu1  ;;  %v3161_v34 = vadd.f32 %v9254_v17, %v7400_v4  ;;  %v3522_v32 = vadd.f32 %v9254_v17, %v7448_v9  ;;  %v8017_v61 = vld [vmem:[%s9802_s0 + $0x7d8] sm:$0xff]  }
 0x1ff   :  { %v7401_v21 = vpop.f32.mrb[134].mxu0  ;;  %v3296_v24 = vadd.f32 %v3295_v8, %v3265_v5  ;;  %v3153_v42 = vadd.f32 %v9254_v17, %v3152_v11  ;;  %v3514_v25 = vadd.f32 %v9254_v17, %v3513_v19  ;;  %v7449_v26 = vpop.f32.mrb[134].mxu1  ;;  %v3657_v33 = vadd.f32 %v3656_v16, %v3626_v7 }
 0x200   :  { %v3155_v27 = vpop.f32.mrb[135].mxu0  ;;  %v2606_v30 = vrot.slane %v2605_v13, 2  ;;  %v2967_v31 = vrot.slane %v2966_v3, 2  ;;  %v3516_v35 = vpop.f32.mrb[135].mxu1  ;;  %v3164_v57 = vadd.f32 %v9254_v17, %v7401_v21  ;;  %v3525_v10 = vadd.f32 %v9254_v17, %v7449_v26 }
 0x201   :  { %v3267_v36 = vmax.f32 %v3153_v42, 0.0  ;;  %v3297_v38 = vadd.f32 %v3296_v24, %v3266_v15  ;;  %v3628_v39 = vmax.f32 %v3514_v25, 0.0  ;;  %v3658_v6 = vadd.f32 %v3657_v33, %v3627_v23  ;;  %v9519_v42 = vld [vmem:[%s9803_s2] ss:$0 sm:$0xff] }
 0x202   :  { %7699 = vmatmul.mubr.bf16.gmra.mrb[240].mxu0 %v8012_v12  ;;  %v2607_v41 = vadd.f32 %v2606_v30, %v2605_v13  ;;  %v2968_v43 = vadd.f32 %v2967_v31, %v2966_v3  ;;  %v3156_v45 = vadd.f32 %v9254_v17, %v3155_v27  ;;  %v3517_v46 = vadd.f32 %v9254_v17, %v3516_v35 }
 0x203   :  { %7747 = vmatmul.mubr.bf16.gmra.mrb[240].mxu1 %v8013_v22  ;;  %v3298_v44 = vadd.f32 %v3297_v38, %v3267_v36  ;;  %7702 = vmatprep.mubr.bf16.mxu0 %v8014_v28  ;;  %v3659_v49 = vadd.f32 %v3658_v6, %v3628_v39  ;;  %v3269_v58 = vmax.f32 %v3161_v34, 0.0  ;;  %v3630_v1 = vmax.f32 %v3522_v32, 0.0  ;;  %v8020_v34 = vld [vmem:[%s9802_s0 + $0x768] sm:$0xff]   ;;  %v8022_v39 = vld [vmem:[%s9802_s0 + $0x770] sm:$0xff]  }
 0x204   :  { %7750 = vmatprep.mubr.bf16.mxu1 %v8015_v40  ;;  %v2608_v47 = vrot.slane %v2607_v41, 1  ;;  %v2969_v48 = vrot.slane %v2968_v43, 1  ;;  %v3268_v50 = vmax.f32 %v3156_v45, 0.0  ;;  %v3629_v51 = vmax.f32 %v3517_v46, 0.0  ;;  %v8021_v38 = vld [vmem:[%s9802_s0 + $0x7e8] sm:$0xff]   ;;  %v8023_v46 = vld [vmem:[%s9802_s0 + $0x7f0] sm:$0xff]  }
 0x205   :  { %v7404_v37 = vpop.f32.mrb[136].mxu0  ;;  %v7452_v52 = vpop.f32.mrb[136].mxu1  ;;  %v3270_v7 = vmax.f32 %v3164_v57, 0.0  ;;  %v3631_v8 = vmax.f32 %v3525_v10, 0.0 }
 0x206   :  { %v3168_v53 = vpop.f32.mrb[137].mxu0  ;;  %v2609_v55 = vadd.f32 %v2608_v47, %v2607_v41  ;;  %v2970_v56 = vadd.f32 %v2969_v48, %v2968_v43  ;;  %v3529_v60 = vpop.f32.mrb[137].mxu1  ;;  %v3299_v29 = vadd.f32 %v3298_v44, %v3268_v50  ;;  %v3660_v20 = vadd.f32 %v3659_v49, %v3629_v51 }
 0x207   :  { %v3169_v59 = vadd.f32 %v9254_v17, %v3168_v53  ;;  %v7405_v14 = vpop.f32.mrb[138].mxu0  ;;  %v3530_v62 = vadd.f32 %v9254_v17, %v3529_v60  ;;  %v7453_v0 = vpop.f32.mrb[138].mxu1  ;;  %v3177_v15 = vadd.f32 %v9254_v17, %v7404_v37  ;;  %v3538_v21 = vadd.f32 %v9254_v17, %v7452_v52 }
 0x208   :  { %v3171_v2 = vpop.f32.mrb[139].mxu0  ;;  %v2610_v4 = vmul.f32 0.00390625, %v2609_v55  ;;  %v2971_v5 = vmul.f32 0.00390625, %v2970_v56  ;;  %v3532_v9 = vpop.f32.mrb[139].mxu1  ;;  %v3300_v11 = vadd.f32 %v3299_v29, %v3269_v58  ;;  %v3661_v12 = vadd.f32 %v3660_v20, %v3630_v1 }
 0x209   :  { %v3271_v13 = vmax.f32 %v3169_v59, 0.0  ;;  %v3632_v3 = vmax.f32 %v3530_v62, 0.0  ;;  %v3172_v16 = vadd.f32 %v9254_v17, %v3171_v2  ;;  %v3533_v19 = vadd.f32 %v9254_v17, %v3532_v9 }
 0x20a   :  { %7703 = vmatmul.mubr.bf16.gmra.mrb[244].mxu0 %v8016_v54  ;;  %2611 = vst [vmem:[%s9804_s3 + $0x6] sm:$0x1] %v2610_v4  ;;  %2972 = vst [vmem:[%s9804_s3 + $0x7] sm:$0x1] %v2971_v5  ;;  %v3301_v22 = vadd.f32 %v3300_v11, %v3270_v7  ;;  %v3662_v23 = vadd.f32 %v3661_v12, %v3631_v8  ;;  %v3180_v24 = vadd.f32 %v9254_v17, %v7405_v14  ;;  %v8025_v7 = vld [vmem:[%s9802_s0 + $0x7f8] sm:$0xff]  }
 0x20b   :  { %7751 = vmatmul.mubr.bf16.gmra.mrb[244].mxu1 %v8017_v61  ;;  %7706 = vmatprep.mubr.bf16.mxu0 %v8018_v63  ;;  %v3541_v25 = vadd.f32 %v9519_v42, %v7453_v0  ;;  %v3272_v26 = vmax.f32 %v3172_v16, 0.0  ;;  %v3633_v27 = vmax.f32 %v3533_v19, 0.0  ;;  %v3273_v35 = vmax.f32 %v3177_v15, 0.0  ;;  %v8024_v0 = vld [vmem:[%s9802_s0 + $0x778] sm:$0xff]  }
 0x20c   :  { %7754 = vmatprep.mubr.bf16.mxu1 %v8019_v18  ;;  %v3302_v40 = vadd.f32 %v3301_v22, %v3271_v13  ;;  %v3663_v30 = vadd.f32 %v3662_v23, %v3632_v3  ;;  %v3634_v41 = vmax.f32 %v3538_v21, 0.0  ;;  %v3274_v47 = vmax.f32 %v3180_v24, 0.0 }
 0x20d   :  { %v7408_v28 = vpop.f32.mrb[140].mxu0  ;;  %v7456_v31 = vpop.f32.mrb[140].mxu1  ;;  %v3635_v48 = vmax.f32 %v3541_v25, 0.0 }
 0x20e   :  { %v3184_v33 = vpop.f32.mrb[141].mxu0  ;;  %v3545_v32 = vpop.f32.mrb[141].mxu1  ;;  %v3303_v43 = vadd.f32 %v3302_v40, %v3272_v26  ;;  %v3664_v6 = vadd.f32 %v3663_v30, %v3633_v27  ;;  %v3193_v53 = vadd.f32 %v9519_v42, %v7408_v28  ;;  %v3554_v55 = vadd.f32 %v9519_v42, %v7456_v31 }
 0x20f   :  { %v3185_v17 = vadd.f32 %v9519_v42, %v3184_v33  ;;  %v7409_v36 = vpop.f32.mrb[142].mxu0  ;;  %v3546_v57 = vadd.f32 %v9519_v42, %v3545_v32  ;;  %v7457_v44 = vpop.f32.mrb[142].mxu1 }
 0x210   :  { %v3187_v45 = vpop.f32.mrb[143].mxu0  ;;  %v3548_v10 = vpop.f32.mrb[143].mxu1  ;;  %v3304_v37 = vadd.f32 %v3303_v43, %v3273_v35  ;;  %v3665_v50 = vadd.f32 %v3664_v6, %v3634_v41  ;;  %v3196_v60 = vadd.f32 %v9519_v42, %v7409_v36  ;;  %v3557_v14 = vadd.f32 %v9519_v42, %v7457_v44 }
 0x211   :  { %v3275_v49 = vmax.f32 %v3185_v17, 0.0  ;;  %v3636_v51 = vmax.f32 %v3546_v57, 0.0  ;;  %v3188_v52 = vadd.f32 %v9519_v42, %v3187_v45  ;;  %v3549_v54 = vadd.f32 %v9519_v42, %v3548_v10 }
 0x212   :  { %7707 = vmatmul.mubr.bf16.gmra.mrb[248].mxu0 %v8020_v34  ;;  %v3305_v56 = vadd.f32 %v3304_v37, %v3274_v47  ;;  %v3666_v58 = vadd.f32 %v3665_v50, %v3635_v48  ;;  %v3277_v2 = vmax.f32 %v3193_v53, 0.0  ;;  %v3638_v8 = vmax.f32 %v3554_v55, 0.0 }
 0x213   :  { %7755 = vmatmul.mubr.bf16.gmra.mrb[248].mxu1 %v8021_v38  ;;  %7710 = vmatprep.mubr.bf16.mxu0 %v8022_v39  ;;  %v3276_v59 = vmax.f32 %v3188_v52, 0.0  ;;  %v3637_v61 = vmax.f32 %v3549_v54, 0.0  ;;  %v3278_v15 = vmax.f32 %v3196_v60, 0.0  ;;  %v3639_v16 = vmax.f32 %v3557_v14, 0.0 }
 0x214   :  { %7758 = vmatprep.mubr.bf16.mxu1 %v8023_v46  ;;  %v3306_v1 = vadd.f32 %v3305_v56, %v3275_v49  ;;  %v3667_v29 = vadd.f32 %v3666_v58, %v3636_v51 }
 0x215   :  { %v7412_v63 = vpop.f32.mrb[144].mxu0 }
 0x216   :  { %v7460_v20 = vpop.f32.mrb[144].mxu1  ;;  %v3200_v62 = vpop.f32.mrb[145].mxu0  ;;  %v3307_v9 = vadd.f32 %v3306_v1, %v3276_v59  ;;  %v3668_v11 = vadd.f32 %v3667_v29, %v3637_v61  ;;  %v3209_v26 = vadd.f32 %v9519_v42, %v7412_v63 }
 0x217   :  { %v3201_v18 = vadd.f32 %v9519_v42, %v3200_v62  ;;  %v3561_v4 = vpop.f32.mrb[145].mxu1  ;;  %v7413_v5 = vpop.f32.mrb[146].mxu0  ;;  %v3570_v28 = vadd.f32 %v9519_v42, %v7460_v20 }
 0x218   :  { %v3562_v12 = vadd.f32 %v9519_v42, %v3561_v4  ;;  %v7461_v13 = vpop.f32.mrb[146].mxu1  ;;  %v3203_v3 = vpop.f32.mrb[147].mxu0  ;;  %v3308_v22 = vadd.f32 %v3307_v9, %v3277_v2  ;;  %v3669_v23 = vadd.f32 %v3668_v11, %v3638_v8  ;;  %v3212_v33 = vadd.f32 %v9519_v42, %v7413_v5 }
 0x219   :  { %v3279_v19 = vmax.f32 %v3201_v18, 0.0  ;;  %v3564_v21 = vpop.f32.mrb[147].mxu1  ;;  %v3204_v25 = vadd.f32 %v9519_v42, %v3203_v3  ;;  %v3573_v34 = vadd.f32 %v9519_v42, %v7461_v13  ;;  %v3281_v41 = vmax.f32 %v3209_v26, 0.0 }
 0x21a   :  { %v3640_v24 = vmax.f32 %v3562_v12, 0.0  ;;  %7711 = vmatmul.mubr.bf16.gmra.mrb[252].mxu0 %v8024_v0  ;;  %v3565_v27 = vadd.f32 %v9519_v42, %v3564_v21  ;;  %v3309_v40 = vadd.f32 %v3308_v22, %v3278_v15  ;;  %v3670_v30 = vadd.f32 %v3669_v23, %v3639_v16 }
 0x21b   :  { %7759 = vmatmul.mubr.bf16.gmra.mrb[252].mxu1 %v8025_v7  ;;  %v3280_v31 = vmax.f32 %v3204_v25, 0.0  ;;  %v3642_v44 = vmax.f32 %v3570_v28, 0.0  ;;  %v3282_v10 = vmax.f32 %v3212_v33, 0.0  ;;  %v3643_v37 = vmax.f32 %v3573_v34, 0.0 }
 0x21c   :  { %v3641_v35 = vmax.f32 %v3565_v27, 0.0  ;;  %v3310_v32 = vadd.f32 %v3309_v40, %v3279_v19  ;;  %v3671_v36 = vadd.f32 %v3670_v30, %v3640_v24 }
 0x21d   :  { %v7416_v17 = vpop.f32.mrb[148].mxu0 }
 0x21e   :  { %v7464_v38 = vpop.f32.mrb[148].mxu1  ;;  %v3216_v39 = vpop.f32.mrb[149].mxu0  ;;  %v3311_v45 = vadd.f32 %v3310_v32, %v3280_v31  ;;  %v3672_v46 = vadd.f32 %v3671_v36, %v3641_v35  ;;  %v3225_v56 = vadd.f32 %v9519_v42, %v7416_v17 }
 0x21f   :  { %v3217_v43 = vadd.f32 %v9519_v42, %v3216_v39  ;;  %v3577_v6 = vpop.f32.mrb[149].mxu1  ;;  %v7417_v57 = vpop.f32.mrb[150].mxu0  ;;  %v3586_v59 = vadd.f32 %v9519_v42, %v7464_v38 }
 0x220   :  { %v3578_v47 = vadd.f32 %v9519_v42, %v3577_v6  ;;  %v7465_v48 = vpop.f32.mrb[150].mxu1  ;;  %v3219_v49 = vpop.f32.mrb[151].mxu0  ;;  %v3312_v52 = vadd.f32 %v3311_v45, %v3281_v41  ;;  %v3673_v53 = vadd.f32 %v3672_v46, %v3642_v44  ;;  %v3228_v63 = vadd.f32 %v9519_v42, %v7417_v57 }
 0x221   :  { %v3283_v50 = vmax.f32 %v3217_v43, 0.0  ;;  %v3580_v51 = vpop.f32.mrb[151].mxu1  ;;  %v3220_v55 = vadd.f32 %v9519_v42, %v3219_v49  ;;  %v3589_v1 = vadd.f32 %v9519_v42, %v7465_v48  ;;  %v3285_v4 = vmax.f32 %v3225_v56, 0.0 }
 0x222   :  { %v3644_v54 = vmax.f32 %v3578_v47, 0.0  ;;  %v3581_v58 = vadd.f32 %v9519_v42, %v3580_v51  ;;  %v3313_v60 = vadd.f32 %v3312_v52, %v3282_v10  ;;  %v3674_v14 = vadd.f32 %v3673_v53, %v3643_v37 }
 0x223   :  { %v3284_v61 = vmax.f32 %v3220_v55, 0.0  ;;  %v3646_v9 = vmax.f32 %v3586_v59, 0.0  ;;  %v3286_v16 = vmax.f32 %v3228_v63, 0.0  ;;  %v3647_v19 = vmax.f32 %v3589_v1, 0.0 }
 0x224   :  { %v3645_v29 = vmax.f32 %v3581_v58, 0.0  ;;  %v3314_v62 = vadd.f32 %v3313_v60, %v3283_v50  ;;  %v3675_v0 = vadd.f32 %v3674_v14, %v3644_v54 }
 0x225   :  { %v7420_v20 = vpop.f32.mrb[152].mxu0 }
 0x226   :  { %v7468_v2 = vpop.f32.mrb[152].mxu1  ;;  %v3232_v18 = vpop.f32.mrb[153].mxu0  ;;  %v3315_v11 = vadd.f32 %v3314_v62, %v3284_v61  ;;  %v3676_v12 = vadd.f32 %v3675_v0, %v3645_v29  ;;  %v3241_v27 = vadd.f32 %v9519_v42, %v7420_v20 }
 0x227   :  { %v3233_v5 = vadd.f32 %v9519_v42, %v3232_v18  ;;  %v3593_v7 = vpop.f32.mrb[153].mxu1  ;;  %v7421_v8 = vpop.f32.mrb[154].mxu0  ;;  %v3602_v40 = vadd.f32 %v9519_v42, %v7468_v2 }
 0x228   :  { %v3594_v13 = vadd.f32 %v9519_v42, %v3593_v7  ;;  %v7469_v3 = vpop.f32.mrb[154].mxu1  ;;  %v3235_v15 = vpop.f32.mrb[155].mxu0  ;;  %v3316_v23 = vadd.f32 %v3315_v11, %v3285_v4  ;;  %v3677_v24 = vadd.f32 %v3676_v12, %v3646_v9  ;;  %v3244_v34 = vadd.f32 %v9519_v42, %v7421_v8 }
 0x229   :  { %v3287_v21 = vmax.f32 %v3233_v5, 0.0  ;;  %v3596_v22 = vpop.f32.mrb[155].mxu1  ;;  %v3236_v26 = vadd.f32 %v9519_v42, %v3235_v15  ;;  %v3605_v35 = vadd.f32 %v9519_v42, %v7469_v3  ;;  %v3289_v43 = vmax.f32 %v3241_v27, 0.0 }
 0x22a   :  { %v3648_v25 = vmax.f32 %v3594_v13, 0.0  ;;  %v3597_v28 = vadd.f32 %v9519_v42, %v3596_v22  ;;  %v3317_v30 = vadd.f32 %v3316_v23, %v3286_v16  ;;  %v3678_v31 = vadd.f32 %v3677_v24, %v3647_v19 }
 0x22b   :  { %v3288_v33 = vmax.f32 %v3236_v26, 0.0  ;;  %v3650_v45 = vmax.f32 %v3602_v40, 0.0  ;;  %v3290_v37 = vmax.f32 %v3244_v34, 0.0  ;;  %v3651_v50 = vmax.f32 %v3605_v35, 0.0 }
 0x22c   :  { %v3649_v17 = vmax.f32 %v3597_v28, 0.0  ;;  %v3318_v36 = vadd.f32 %v3317_v30, %v3287_v21  ;;  %v3679_v38 = vadd.f32 %v3678_v31, %v3648_v25 }
 0x22d   :  { %v7424_v32 = vpop.f32.mrb[156].mxu0 }
 0x22e   :  { %v7472_v39 = vpop.f32.mrb[156].mxu1  ;;  %v3248_v41 = vpop.f32.mrb[157].mxu0  ;;  %v3319_v46 = vadd.f32 %v3318_v36, %v3288_v33  ;;  %v3680_v47 = vadd.f32 %v3679_v38, %v3649_v17  ;;  %v3257_v58 = vadd.f32 %v9519_v42, %v7424_v32 }
 0x22f   :  { %v3249_v6 = vadd.f32 %v9519_v42, %v3248_v41  ;;  %v3609_v57 = vpop.f32.mrb[157].mxu1  ;;  %v7425_v44 = vpop.f32.mrb[158].mxu0  ;;  %v3618_v60 = vadd.f32 %v9519_v42, %v7472_v39 }
 0x230   :  { %v3610_v48 = vadd.f32 %v9519_v42, %v3609_v57  ;;  %v7473_v49 = vpop.f32.mrb[158].mxu1  ;;  %v3251_v10 = vpop.f32.mrb[159].mxu0  ;;  %v3320_v53 = vadd.f32 %v3319_v46, %v3289_v43  ;;  %v3681_v54 = vadd.f32 %v3680_v47, %v3650_v45  ;;  %v3260_v1 = vadd.f32 %v9519_v42, %v7425_v44 }
 0x231   :  { %v3291_v51 = vmax.f32 %v3249_v6, 0.0  ;;  %v3612_v52 = vpop.f32.mrb[159].mxu1  ;;  %v3252_v56 = vadd.f32 %v9519_v42, %v3251_v10  ;;  %v3621_v29 = vadd.f32 %v9519_v42, %v7473_v49  ;;  %v3293_v9 = vmax.f32 %v3257_v58, 0.0 }
 0x232   :  { %v3652_v55 = vmax.f32 %v3610_v48, 0.0  ;;  %v3613_v59 = vadd.f32 %v9519_v42, %v3612_v52  ;;  %v3321_v14 = vadd.f32 %v3320_v53, %v3290_v37  ;;  %v3682_v61 = vadd.f32 %v3681_v54, %v3651_v50 }
 0x233   :  { %v3292_v63 = vmax.f32 %v3252_v56, 0.0  ;;  %v3654_v11 = vmax.f32 %v3618_v60, 0.0  ;;  %v3294_v16 = vmax.f32 %v3260_v1, 0.0  ;;  %v3655_v19 = vmax.f32 %v3621_v29, 0.0 }
 0x234   :  { %v3653_v20 = vmax.f32 %v3613_v59, 0.0  ;;  %v3322_v0 = vadd.f32 %v3321_v14, %v3291_v51  ;;  %v3683_v2 = vadd.f32 %v3682_v61, %v3652_v55 }
 0x235   :  { %v7492_v62 = vpop.f32.mrb[160].mxu0 }
 0x236   :  { %v7540_v18 = vpop.f32.mrb[160].mxu1  ;;  %v3858_v4 = vpop.f32.mrb[161].mxu0  ;;  %v3323_v12 = vadd.f32 %v3322_v0, %v3292_v63  ;;  %v3684_v13 = vadd.f32 %v3683_v2, %v3653_v20  ;;  %v3867_v25 = vadd.f32 %v9519_v42, %v7492_v62 }
 0x237   :  { %v3859_v5 = vadd.f32 %v9519_v42, %v3858_v4  ;;  %v4219_v7 = vpop.f32.mrb[161].mxu1  ;;  %v7493_v8 = vpop.f32.mrb[162].mxu0  ;;  %v4228_v27 = vadd.f32 %v9519_v42, %v7540_v18 }
 0x238   :  { %v7541_v3 = vpop.f32.mrb[162].mxu1  ;;  %v3861_v15 = vpop.f32.mrb[163].mxu0  ;;  %v4220_v21 = vadd.f32 %v9519_v42, %v4219_v7  ;;  %v3324_v23 = vadd.f32 %v3323_v12, %v3293_v9  ;;  %v3685_v24 = vadd.f32 %v3684_v13, %v3654_v11  ;;  %v3870_v33 = vadd.f32 %v9519_v42, %v7493_v8 }
 0x239   :  { %v4222_v22 = vpop.f32.mrb[163].mxu1  ;;  %v3862_v26 = vadd.f32 %v9519_v42, %v3861_v15  ;;  %v3985_v28 = vmax.f32 %v3859_v5, 0.0  ;;  %v4231_v17 = vadd.f32 %v9519_v42, %v7541_v3  ;;  %v3987_v41 = vmax.f32 %v3867_v25, 0.0 }
 0x23a   :  { %v4223_v40 = vadd.f32 %v9519_v42, %v4222_v22  ;;  %v3325_v30 = vadd.f32 %v3324_v23, %v3294_v16  ;;  %v3686_v31 = vadd.f32 %v3685_v24, %v3655_v19  ;;  %v4346_v35 = vmax.f32 %v4220_v21, 0.0 }
 0x23b   :  { %v3986_v34 = vmax.f32 %v3862_v26, 0.0  ;;  %v4348_v44 = vmax.f32 %v4228_v27, 0.0  ;;  %v3988_v37 = vmax.f32 %v3870_v33, 0.0  ;;  %v4349_v53 = vmax.f32 %v4231_v17, 0.0 }
 0x23c   :  { %v4347_v32 = vmax.f32 %v4223_v40, 0.0  ;;  %v3326_v38 = vrot.slane %v3325_v30, 4  ;;  %v3687_v39 = vrot.slane %v3686_v31, 4 }
 0x23d   :  { %v7496_v36 = vpop.f32.mrb[164].mxu0  ;;  %v4017_v43 = vadd.f32 %v3986_v34, %v3985_v28 }
 0x23e   :  { %v7544_v6 = vpop.f32.mrb[164].mxu1  ;;  %v3874_v57 = vpop.f32.mrb[165].mxu0  ;;  %v4378_v45 = vadd.f32 %v4347_v32, %v4346_v35  ;;  %v3327_v49 = vadd.f32 %v3326_v38, %v3325_v30  ;;  %v3688_v10 = vadd.f32 %v3687_v39, %v3686_v31  ;;  %v3883_v61 = vadd.f32 %v9519_v42, %v7496_v36 }
 0x23f   :  { %v3875_v46 = vadd.f32 %v9519_v42, %v3874_v57  ;;  %v4235_v47 = vpop.f32.mrb[165].mxu1  ;;  %v7497_v48 = vpop.f32.mrb[166].mxu0  ;;  %v4018_v50 = vadd.f32 %v4017_v43, %v3987_v41  ;;  %v4244_v0 = vadd.f32 %v9519_v42, %v7544_v6 }
 0x240   :  { %v7545_v51 = vpop.f32.mrb[166].mxu1  ;;  %v3877_v52 = vpop.f32.mrb[167].mxu0  ;;  %v4379_v54 = vadd.f32 %v4378_v45, %v4348_v44  ;;  %v4236_v56 = vadd.f32 %v9519_v42, %v4235_v47  ;;  %v3328_v59 = vrot.slane %v3327_v49, 2  ;;  %v3689_v60 = vrot.slane %v3688_v10, 2 }
 0x241   :  { %v3989_v55 = vmax.f32 %v3875_v46, 0.0  ;;  %v4238_v58 = vpop.f32.mrb[167].mxu1  ;;  %v4019_v14 = vadd.f32 %v4018_v50, %v3988_v37  ;;  %v3878_v29 = vadd.f32 %v9519_v42, %v3877_v52  ;;  %v3886_v4 = vadd.f32 %v9519_v42, %v7497_v48 }
 0x242   :  { %v4350_v63 = vmax.f32 %v4236_v56, 0.0  ;;  %v4380_v1 = vadd.f32 %v4379_v54, %v4349_v53  ;;  %v3329_v20 = vadd.f32 %v3328_v59, %v3327_v49  ;;  %v3690_v62 = vadd.f32 %v3689_v60, %v3688_v10 }
 0x243   :  { %v4020_v2 = vadd.f32 %v4019_v14, %v3989_v55  ;;  %v3990_v5 = vmax.f32 %v3878_v29, 0.0  ;;  %v4239_v7 = vadd.f32 %v9519_v42, %v4238_v58  ;;  %v4247_v12 = vadd.f32 %v9519_v42, %v7545_v51 }
 0x244   :  { %v4381_v18 = vadd.f32 %v4380_v1, %v4350_v63  ;;  %v3330_v9 = vrot.slane %v3329_v20, 1  ;;  %v3691_v11 = vrot.slane %v3690_v62, 1  ;;  %v3991_v15 = vmax.f32 %v3883_v61, 0.0 }
 0x245   :  { %v7500_v8 = vpop.f32.mrb[168].mxu0  ;;  %v4021_v16 = vadd.f32 %v4020_v2, %v3990_v5  ;;  %v4351_v19 = vmax.f32 %v4239_v7, 0.0  ;;  %v4352_v26 = vmax.f32 %v4244_v0, 0.0  ;;  %v3992_v30 = vmax.f32 %v3886_v4, 0.0 }
 0x246   :  { %v7548_v13 = vpop.f32.mrb[168].mxu1  ;;  %v3890_v3 = vpop.f32.mrb[169].mxu0  ;;  %v3331_v24 = vadd.f32 %v3330_v9, %v3329_v20  ;;  %v3692_v25 = vadd.f32 %v3691_v11, %v3690_v62  ;;  %v4353_v36 = vmax.f32 %v4247_v12, 0.0  ;;  %v3899_v38 = vadd.f32 %v9519_v42, %v7500_v8 }
 0x247   :  { %v3891_v21 = vadd.f32 %v9519_v42, %v3890_v3  ;;  %v4251_v22 = vpop.f32.mrb[169].mxu1  ;;  %v7501_v23 = vpop.f32.mrb[170].mxu0  ;;  %v4022_v31 = vadd.f32 %v4021_v16, %v3991_v15  ;;  %v4382_v33 = vadd.f32 %v4381_v18, %v4351_v19  ;;  %v4260_v57 = vadd.f32 %v9519_v42, %v7548_v13 }
 0x248   :  { %v4252_v27 = vadd.f32 %v9519_v42, %v4251_v22  ;;  %v7549_v28 = vpop.f32.mrb[170].mxu1  ;;  %v3893_v40 = vpop.f32.mrb[171].mxu0  ;;  %v3332_v17 = vmul.f32 0.00390625, %v3331_v24  ;;  %v3693_v32 = vmul.f32 0.00390625, %v3692_v25  ;;  %v3902_v47 = vadd.f32 %v9519_v42, %v7501_v23 }
 0x249   :  { %v3993_v34 = vmax.f32 %v3891_v21, 0.0  ;;  %v4254_v35 = vpop.f32.mrb[171].mxu1  ;;  %v4383_v39 = vadd.f32 %v4382_v33, %v4352_v26  ;;  %v4023_v41 = vadd.f32 %v4022_v31, %v3992_v30  ;;  %v3894_v6 = vadd.f32 %v9519_v42, %v3893_v40 }
 0x24a   :  { %v4354_v43 = vmax.f32 %v4252_v27, 0.0  ;;  %3333 = vst [vmem:[%s9804_s3 + $0x8] sm:$0x1] %v3332_v17  ;;  %3694 = vst [vmem:[%s9804_s3 + $0x9] sm:$0x1] %v3693_v32  ;;  %v4255_v44 = vadd.f32 %v9519_v42, %v4254_v35  ;;  %v4263_v10 = vadd.f32 %v9519_v42, %v7549_v28  ;;  %v3995_v52 = vmax.f32 %v3899_v38, 0.0 }
 0x24b   :  { %v4024_v45 = vadd.f32 %v4023_v41, %v3993_v34  ;;  %v4384_v46 = vadd.f32 %v4383_v39, %v4353_v36  ;;  %v3994_v48 = vmax.f32 %v3894_v6, 0.0  ;;  %v4356_v59 = vmax.f32 %v4260_v57, 0.0 }
 0x24c   :  { %v4355_v37 = vmax.f32 %v4255_v44, 0.0  ;;  %v3996_v63 = vmax.f32 %v3902_v47, 0.0  ;;  %v4357_v0 = vmax.f32 %v4263_v10, 0.0 }
 0x24d   :  { %v7504_v49 = vpop.f32.mrb[172].mxu0  ;;  %v4385_v53 = vadd.f32 %v4384_v46, %v4354_v43  ;;  %v4025_v54 = vadd.f32 %v4024_v45, %v3994_v48 }
 0x24e   :  { %v7552_v50 = vpop.f32.mrb[172].mxu1  ;;  %v3906_v51 = vpop.f32.mrb[173].mxu0  ;;  %v3915_v2 = vadd.f32 %v9519_v42, %v7504_v49 }
 0x24f   :  { %v3907_v55 = vadd.f32 %v9519_v42, %v3906_v51  ;;  %v4267_v56 = vpop.f32.mrb[173].mxu1  ;;  %v7505_v58 = vpop.f32.mrb[174].mxu0  ;;  %v4026_v1 = vadd.f32 %v4025_v54, %v3995_v52  ;;  %v4386_v29 = vadd.f32 %v4385_v53, %v4355_v37  ;;  %v4276_v9 = vadd.f32 %v9519_v42, %v7552_v50 }
 0x250   :  { %v4268_v60 = vadd.f32 %v9519_v42, %v4267_v56  ;;  %v7553_v14 = vpop.f32.mrb[174].mxu1  ;;  %v3909_v61 = vpop.f32.mrb[175].mxu0  ;;  %v3918_v3 = vadd.f32 %v9519_v42, %v7505_v58  ;;  %v3999_v23 = vmax.f32 %v3915_v2, 0.0 }
 0x251   :  { %v3997_v20 = vmax.f32 %v3907_v55, 0.0  ;;  %v4270_v62 = vpop.f32.mrb[175].mxu1  ;;  %v3910_v18 = vadd.f32 %v9519_v42, %v3909_v61  ;;  %v4387_v4 = vadd.f32 %v4386_v29, %v4356_v59  ;;  %v4027_v5 = vadd.f32 %v4026_v1, %v3996_v63 }
 0x252   :  { %v4358_v7 = vmax.f32 %v4268_v60, 0.0  ;;  %v4271_v8 = vadd.f32 %v9519_v42, %v4270_v62  ;;  %v4279_v19 = vadd.f32 %v9519_v42, %v7553_v14  ;;  %v4360_v40 = vmax.f32 %v4276_v9, 0.0 }
 0x253   :  { %v3998_v11 = vmax.f32 %v3910_v18, 0.0  ;;  %v4028_v12 = vadd.f32 %v4027_v5, %v3997_v20  ;;  %v4388_v13 = vadd.f32 %v4387_v4, %v4357_v0  ;;  %v4000_v34 = vmax.f32 %v3918_v3, 0.0 }
 0x254   :  { %v4359_v15 = vmax.f32 %v4271_v8, 0.0  ;;  %v4361_v38 = vmax.f32 %v4279_v19, 0.0 }
 0x255   :  { %v7508_v16 = vpop.f32.mrb[176].mxu0  ;;  %v4389_v24 = vadd.f32 %v4388_v13, %v4358_v7  ;;  %v4029_v25 = vadd.f32 %v4028_v12, %v3998_v11 }
 0x256   :  { %v7556_v21 = vpop.f32.mrb[176].mxu1  ;;  %v3922_v22 = vpop.f32.mrb[177].mxu0  ;;  %v3931_v39 = vadd.f32 %v9519_v42, %v7508_v16 }
 0x257   :  { %v3923_v26 = vadd.f32 %v9519_v42, %v3922_v22  ;;  %v4283_v27 = vpop.f32.mrb[177].mxu1  ;;  %v7509_v28 = vpop.f32.mrb[178].mxu0  ;;  %v4030_v35 = vadd.f32 %v4029_v25, %v3999_v23  ;;  %v4390_v17 = vadd.f32 %v4389_v24, %v4359_v15  ;;  %v4292_v45 = vadd.f32 %v9519_v42, %v7556_v21 }
 0x258   :  { %v4284_v30 = vadd.f32 %v9519_v42, %v4283_v27  ;;  %v7557_v31 = vpop.f32.mrb[178].mxu1  ;;  %v3925_v33 = vpop.f32.mrb[179].mxu0  ;;  %v3934_v49 = vadd.f32 %v9519_v42, %v7509_v28  ;;  %v4003_v53 = vmax.f32 %v3931_v39, 0.0 }
 0x259   :  { %v4001_v32 = vmax.f32 %v3923_v26, 0.0  ;;  %v4286_v36 = vpop.f32.mrb[179].mxu1  ;;  %v3926_v41 = vadd.f32 %v9519_v42, %v3925_v33  ;;  %v4391_v43 = vadd.f32 %v4390_v17, %v4360_v40  ;;  %v4031_v6 = vadd.f32 %v4030_v35, %v4000_v34 }
 0x25a   :  { %v4362_v57 = vmax.f32 %v4284_v30, 0.0  ;;  %v4287_v44 = vadd.f32 %v9519_v42, %v4286_v36  ;;  %v4295_v50 = vadd.f32 %v9519_v42, %v7557_v31  ;;  %v4364_v60 = vmax.f32 %v4292_v45, 0.0 }
 0x25b   :  { %v4002_v46 = vmax.f32 %v3926_v41, 0.0  ;;  %v4032_v47 = vadd.f32 %v4031_v6, %v4001_v32  ;;  %v4392_v48 = vadd.f32 %v4391_v43, %v4361_v38  ;;  %v4004_v1 = vmax.f32 %v3934_v49, 0.0 }
 0x25c   :  { %v4363_v10 = vmax.f32 %v4287_v44, 0.0  ;;  %v4365_v2 = vmax.f32 %v4295_v50, 0.0 }
 0x25d   :  { %v7512_v37 = vpop.f32.mrb[180].mxu0  ;;  %v4393_v54 = vadd.f32 %v4392_v48, %v4362_v57  ;;  %v4033_v55 = vadd.f32 %v4032_v47, %v4002_v46 }
 0x25e   :  { %v7560_v51 = vpop.f32.mrb[180].mxu1  ;;  %v3938_v52 = vpop.f32.mrb[181].mxu0  ;;  %v3947_v18 = vadd.f32 %v9519_v42, %v7512_v37 }
 0x25f   :  { %v3939_v56 = vadd.f32 %v9519_v42, %v3938_v52  ;;  %v4299_v58 = vpop.f32.mrb[181].mxu1  ;;  %v7513_v59 = vpop.f32.mrb[182].mxu0  ;;  %v4034_v29 = vadd.f32 %v4033_v55, %v4003_v53  ;;  %v4394_v20 = vadd.f32 %v4393_v54, %v4363_v10  ;;  %v4308_v11 = vadd.f32 %v9519_v42, %v7560_v51 }
 0x260   :  { %v4300_v14 = vadd.f32 %v9519_v42, %v4299_v58  ;;  %v7561_v61 = vpop.f32.mrb[182].mxu1  ;;  %v3941_v63 = vpop.f32.mrb[183].mxu0  ;;  %v3950_v15 = vadd.f32 %v9519_v42, %v7513_v59  ;;  %v4007_v24 = vmax.f32 %v3947_v18, 0.0 }
 0x261   :  { %v4005_v62 = vmax.f32 %v3939_v56, 0.0  ;;  %v4302_v0 = vpop.f32.mrb[183].mxu1  ;;  %v3942_v4 = vadd.f32 %v9519_v42, %v3941_v63  ;;  %v4395_v5 = vadd.f32 %v4394_v20, %v4364_v60  ;;  %v4035_v7 = vadd.f32 %v4034_v29, %v4004_v1 }
 0x262   :  { %v4366_v8 = vmax.f32 %v4300_v14, 0.0  ;;  %v4303_v9 = vadd.f32 %v9519_v42, %v4302_v0  ;;  %v4311_v21 = vadd.f32 %v9519_v42, %v7561_v61  ;;  %v4368_v30 = vmax.f32 %v4308_v11, 0.0 }
 0x263   :  { %v4006_v12 = vmax.f32 %v3942_v4, 0.0  ;;  %v4036_v13 = vadd.f32 %v4035_v7, %v4005_v62  ;;  %v4396_v3 = vadd.f32 %v4395_v5, %v4365_v2  ;;  %v4008_v35 = vmax.f32 %v3950_v15, 0.0 }
 0x264   :  { %v4367_v16 = vmax.f32 %v4303_v9, 0.0  ;;  %v4369_v39 = vmax.f32 %v4311_v21, 0.0 }
 0x265   :  { %v7516_v19 = vpop.f32.mrb[184].mxu0  ;;  %v4397_v25 = vadd.f32 %v4396_v3, %v4366_v8  ;;  %v4037_v26 = vadd.f32 %v4036_v13, %v4006_v12 }
 0x266   :  { %v7564_v22 = vpop.f32.mrb[184].mxu1  ;;  %v3954_v23 = vpop.f32.mrb[185].mxu0  ;;  %v3963_v41 = vadd.f32 %v9519_v42, %v7516_v19 }
 0x267   :  { %v3955_v27 = vadd.f32 %v9519_v42, %v3954_v23  ;;  %v4315_v28 = vpop.f32.mrb[185].mxu1  ;;  %v7517_v40 = vpop.f32.mrb[186].mxu0  ;;  %v4038_v17 = vadd.f32 %v4037_v26, %v4007_v24  ;;  %v4398_v32 = vadd.f32 %v4397_v25, %v4367_v16  ;;  %v4324_v46 = vadd.f32 %v9519_v42, %v7564_v22 }
 0x268   :  { %v4316_v31 = vadd.f32 %v9519_v42, %v4315_v28  ;;  %v7565_v33 = vpop.f32.mrb[186].mxu1  ;;  %v3957_v34 = vpop.f32.mrb[187].mxu0  ;;  %v3966_v10 = vadd.f32 %v9519_v42, %v7517_v40  ;;  %v4011_v54 = vmax.f32 %v3963_v41, 0.0 }
 0x269   :  { %v4009_v36 = vmax.f32 %v3955_v27, 0.0  ;;  %v4318_v38 = vpop.f32.mrb[187].mxu1  ;;  %v3958_v43 = vadd.f32 %v9519_v42, %v3957_v34  ;;  %v4399_v6 = vadd.f32 %v4398_v32, %v4368_v30  ;;  %v4039_v57 = vadd.f32 %v4038_v17, %v4008_v35 }
 0x26a   :  { %v4370_v44 = vmax.f32 %v4316_v31, 0.0  ;;  %v4319_v45 = vadd.f32 %v9519_v42, %v4318_v38  ;;  %v4327_v51 = vadd.f32 %v9519_v42, %v7565_v33  ;;  %v4372_v14 = vmax.f32 %v4324_v46, 0.0 }
 0x26b   :  { %v4010_v47 = vmax.f32 %v3958_v43, 0.0  ;;  %v4040_v48 = vadd.f32 %v4039_v57, %v4009_v36  ;;  %v4400_v49 = vadd.f32 %v4399_v6, %v4369_v39  ;;  %v4012_v29 = vmax.f32 %v3966_v10, 0.0 }
 0x26c   :  { %v4371_v37 = vmax.f32 %v4319_v45, 0.0  ;;  %v4373_v18 = vmax.f32 %v4327_v51, 0.0 }
 0x26d   :  { %v7520_v50 = vpop.f32.mrb[188].mxu0  ;;  %v4401_v55 = vadd.f32 %v4400_v49, %v4370_v44  ;;  %v4041_v56 = vadd.f32 %v4040_v48, %v4010_v47 }
 0x26e   :  { %v7568_v52 = vpop.f32.mrb[188].mxu1  ;;  %v3970_v53 = vpop.f32.mrb[189].mxu0  ;;  %v3979_v4 = vadd.f32 %v9519_v42, %v7520_v50 }
 0x26f   :  { %v3971_v58 = vadd.f32 %v9519_v42, %v3970_v53  ;;  %v4331_v59 = vpop.f32.mrb[189].mxu1  ;;  %v7521_v60 = vpop.f32.mrb[190].mxu0  ;;  %v4042_v20 = vadd.f32 %v4041_v56, %v4011_v54  ;;  %v4402_v62 = vadd.f32 %v4401_v55, %v4371_v37  ;;  %v4340_v12 = vadd.f32 %v9519_v42, %v7568_v52 }
 0x270   :  { %v4332_v61 = vadd.f32 %v9519_v42, %v4331_v59  ;;  %v7569_v63 = vpop.f32.mrb[190].mxu1  ;;  %v3973_v1 = vpop.f32.mrb[191].mxu0  ;;  %v3982_v16 = vadd.f32 %v9519_v42, %v7521_v60  ;;  %v4015_v25 = vmax.f32 %v3979_v4, 0.0 }
 0x271   :  { %v4013_v0 = vmax.f32 %v3971_v58, 0.0  ;;  %v4334_v2 = vpop.f32.mrb[191].mxu1  ;;  %v3974_v5 = vadd.f32 %v9519_v42, %v3973_v1  ;;  %v4403_v7 = vadd.f32 %v4402_v62, %v4372_v14  ;;  %v4043_v8 = vadd.f32 %v4042_v20, %v4012_v29 }
 0x272   :  { %v4374_v9 = vmax.f32 %v4332_v61, 0.0  ;;  %v4335_v11 = vadd.f32 %v9519_v42, %v4334_v2  ;;  %v4343_v22 = vadd.f32 %v9519_v42, %v7569_v63  ;;  %v4376_v35 = vmax.f32 %v4340_v12, 0.0 }
 0x273   :  { %v4014_v13 = vmax.f32 %v3974_v5, 0.0  ;;  %v4044_v3 = vadd.f32 %v4043_v8, %v4013_v0  ;;  %v4404_v15 = vadd.f32 %v4403_v7, %v4373_v18  ;;  %v4016_v17 = vmax.f32 %v3982_v16, 0.0 }
 0x274   :  { %v4375_v19 = vmax.f32 %v4335_v11, 0.0  ;;  %v4377_v39 = vmax.f32 %v4343_v22, 0.0 }
 0x275   :  { %v7588_v21 = vpop.f32.mrb[192].mxu0  ;;  %v4405_v26 = vadd.f32 %v4404_v15, %v4374_v9  ;;  %v4045_v27 = vadd.f32 %v4044_v3, %v4014_v13 }
 0x276   :  { %v7636_v23 = vpop.f32.mrb[192].mxu1  ;;  %v4580_v24 = vpop.f32.mrb[193].mxu0  ;;  %v4589_v41 = vadd.f32 %v9519_v42, %v7588_v21 }
 0x277   :  { %v4941_v28 = vpop.f32.mrb[193].mxu1  ;;  %v7589_v40 = vpop.f32.mrb[194].mxu0  ;;  %v4581_v30 = vadd.f32 %v9519_v42, %v4580_v24  ;;  %v4046_v32 = vadd.f32 %v4045_v27, %v4015_v25  ;;  %v4406_v36 = vadd.f32 %v4405_v26, %v4375_v19  ;;  %v4950_v44 = vadd.f32 %v9519_v42, %v7636_v23 }
 0x278   :  { %v4942_v31 = vadd.f32 %v9519_v42, %v4941_v28  ;;  %v7637_v33 = vpop.f32.mrb[194].mxu1  ;;  %v4583_v34 = vpop.f32.mrb[195].mxu0  ;;  %v4592_v48 = vadd.f32 %v9519_v42, %v7589_v40  ;;  %v4709_v53 = vmax.f32 %v4589_v41, 0.0  ;;  %v9668_v28 = vld [vmem:[%s9803_s2] ss:$0 sm:$0xff] }
 0x279   :  { %v4944_v38 = vpop.f32.mrb[195].mxu1  ;;  %v4584_v43 = vadd.f32 %v9519_v42, %v4583_v34  ;;  %v4047_v6 = vadd.f32 %v4046_v32, %v4016_v17  ;;  %v4407_v57 = vadd.f32 %v4406_v36, %v4376_v35  ;;  %v4707_v46 = vmax.f32 %v4581_v30, 0.0 }
 0x27a   :  { %v4945_v45 = vadd.f32 %v9519_v42, %v4944_v38  ;;  %v5068_v47 = vmax.f32 %v4942_v31, 0.0  ;;  %v4953_v50 = vadd.f32 %v9519_v42, %v7637_v33  ;;  %v5070_v60 = vmax.f32 %v4950_v44, 0.0 }
 0x27b   :  { %v4708_v49 = vmax.f32 %v4584_v43, 0.0  ;;  %v4048_v10 = vrot.slane %v4047_v6, 4  ;;  %v4408_v37 = vadd.f32 %v4407_v57, %v4377_v39  ;;  %v4710_v1 = vmax.f32 %v4592_v48, 0.0 }
 0x27c   :  { %v5069_v51 = vmax.f32 %v4945_v45, 0.0  ;;  %v5071_v5 = vmax.f32 %v4953_v50, 0.0 }
 0x27d   :  { %v7592_v52 = vpop.f32.mrb[196].mxu0  ;;  %v4739_v54 = vadd.f32 %v4708_v49, %v4707_v46  ;;  %v4049_v58 = vadd.f32 %v4048_v10, %v4047_v6  ;;  %v4409_v59 = vrot.slane %v4408_v37, 4 }
 0x27e   :  { %v7640_v55 = vpop.f32.mrb[196].mxu1  ;;  %v4596_v56 = vpop.f32.mrb[197].mxu0  ;;  %v5100_v14 = vadd.f32 %v5069_v51, %v5068_v47  ;;  %v4605_v9 = vadd.f32 %v9519_v42, %v7592_v52 }
 0x27f   :  { %v4957_v61 = vpop.f32.mrb[197].mxu1  ;;  %v7593_v63 = vpop.f32.mrb[198].mxu0  ;;  %v4740_v29 = vadd.f32 %v4739_v54, %v4709_v53  ;;  %v4597_v20 = vadd.f32 %v9519_v42, %v4596_v56  ;;  %v4050_v18 = vrot.slane %v4049_v58, 2  ;;  %v4410_v4 = vadd.f32 %v4409_v59, %v4408_v37 }
 0x280   :  { %v4958_v62 = vadd.f32 %v9519_v42, %v4957_v61  ;;  %v7641_v0 = vpop.f32.mrb[198].mxu1  ;;  %v4599_v2 = vpop.f32.mrb[199].mxu0  ;;  %v5101_v7 = vadd.f32 %v5100_v14, %v5070_v60  ;;  %v4966_v16 = vadd.f32 %v9519_v42, %v7640_v55  ;;  %v4608_v22 = vadd.f32 %v9519_v42, %v7593_v63 }
 0x281   :  { %v4960_v8 = vpop.f32.mrb[199].mxu1  ;;  %v4711_v11 = vmax.f32 %v4597_v20, 0.0  ;;  %v4741_v12 = vadd.f32 %v4740_v29, %v4710_v1  ;;  %v4051_v3 = vadd.f32 %v4050_v18, %v4049_v58  ;;  %v4411_v15 = vrot.slane %v4410_v4, 2 }
 0x282   :  { %v5072_v13 = vmax.f32 %v4958_v62, 0.0  ;;  %v5102_v19 = vadd.f32 %v5101_v7, %v5071_v5  ;;  %v4600_v23 = vadd.f32 %v9519_v42, %v4599_v2  ;;  %v4961_v24 = vadd.f32 %v9519_v42, %v4960_v8 }
 0x283   :  { %v4742_v21 = vadd.f32 %v4741_v12, %v4711_v11  ;;  %v4052_v25 = vrot.slane %v4051_v3, 1  ;;  %v4412_v26 = vadd.f32 %v4411_v15, %v4410_v4  ;;  %v4969_v40 = vadd.f32 %v9668_v28, %v7641_v0 }
 0x284   :  { %v5103_v27 = vadd.f32 %v5102_v19, %v5072_v13  ;;  %v4712_v31 = vmax.f32 %v4600_v23, 0.0  ;;  %v5073_v33 = vmax.f32 %v4961_v24, 0.0  ;;  %v4713_v36 = vmax.f32 %v4605_v9, 0.0 }
 0x285   :  { %v7596_v30 = vpop.f32.mrb[200].mxu0  ;;  %v4053_v17 = vadd.f32 %v4052_v25, %v4051_v3  ;;  %v4413_v32 = vrot.slane %v4412_v26, 1  ;;  %v5074_v41 = vmax.f32 %v4966_v16, 0.0  ;;  %v4714_v48 = vmax.f32 %v4608_v22, 0.0 }
 0x286   :  { %v7644_v34 = vpop.f32.mrb[200].mxu1  ;;  %v4612_v35 = vpop.f32.mrb[201].mxu0  ;;  %v4743_v43 = vadd.f32 %v4742_v21, %v4712_v31  ;;  %v5104_v6 = vadd.f32 %v5103_v27, %v5073_v33  ;;  %v5075_v49 = vmax.f32 %v4969_v40, 0.0  ;;  %v4621_v54 = vadd.f32 %v9668_v28, %v7596_v30 }
 0x287   :  { %v4613_v42 = vadd.f32 %v9668_v28, %v4612_v35  ;;  %v4973_v38 = vpop.f32.mrb[201].mxu1  ;;  %v7597_v39 = vpop.f32.mrb[202].mxu0  ;;  %v4054_v46 = vmul.f32 0.00390625, %v4053_v17  ;;  %v4414_v47 = vadd.f32 %v4413_v32, %v4412_v26  ;;  %v4982_v58 = vadd.f32 %v9668_v28, %v7644_v34 }
 0x288   :  { %v4974_v57 = vadd.f32 %v9668_v28, %v4973_v38  ;;  %v7645_v44 = vpop.f32.mrb[202].mxu1  ;;  %v4615_v45 = vpop.f32.mrb[203].mxu0  ;;  %v4744_v37 = vadd.f32 %v4743_v43, %v4713_v36  ;;  %v5105_v50 = vadd.f32 %v5104_v6, %v5074_v41  ;;  %v4624_v14 = vadd.f32 %v9668_v28, %v7597_v39 }
 0x289   :  { %v4976_v10 = vpop.f32.mrb[203].mxu1  ;;  %v4715_v51 = vmax.f32 %v4613_v42, 0.0  ;;  %4055 = vst [vmem:[%s9804_s3 + $0xa] sm:$0x1] %v4054_v46  ;;  %v4415_v53 = vmul.f32 0.00390625, %v4414_v47  ;;  %v4616_v55 = vadd.f32 %v9668_v28, %v4615_v45  ;;  %v4985_v61 = vadd.f32 %v9668_v28, %v7645_v44 }
 0x28a   :  { %v5076_v52 = vmax.f32 %v4974_v57, 0.0  ;;  %v4977_v56 = vadd.f32 %v9668_v28, %v4976_v10  ;;  %v4745_v59 = vadd.f32 %v4744_v37, %v4714_v48  ;;  %v5106_v60 = vadd.f32 %v5105_v50, %v5075_v49 }
 0x28b   :  { %4416 = vst [vmem:[%s9804_s3 + $0xb] sm:$0x1] %v4415_v53  ;;  %v4716_v63 = vmax.f32 %v4616_v55, 0.0  ;;  %v4717_v18 = vmax.f32 %v4621_v54, 0.0  ;;  %v5078_v8 = vmax.f32 %v4982_v58, 0.0  ;;  %v4718_v15 = vmax.f32 %v4624_v14, 0.0 }
 0x28c   :  { %v5077_v1 = vmax.f32 %v4977_v56, 0.0  ;;  %v4746_v20 = vadd.f32 %v4745_v59, %v4715_v51  ;;  %v5107_v62 = vadd.f32 %v5106_v60, %v5076_v52  ;;  %v5079_v16 = vmax.f32 %v4985_v61, 0.0 }
 0x28d   :  { %v7600_v29 = vpop.f32.mrb[204].mxu0 }
 0x28e   :  { %v7648_v0 = vpop.f32.mrb[204].mxu1  ;;  %v4628_v2 = vpop.f32.mrb[205].mxu0  ;;  %v4747_v9 = vadd.f32 %v4746_v20, %v4716_v63  ;;  %v5108_v11 = vadd.f32 %v5107_v62, %v5077_v1  ;;  %v4637_v26 = vadd.f32 %v9668_v28, %v7600_v29 }
 0x28f   :  { %v4629_v4 = vadd.f32 %v9668_v28, %v4628_v2  ;;  %v4989_v5 = vpop.f32.mrb[205].mxu1  ;;  %v7601_v7 = vpop.f32.mrb[206].mxu0  ;;  %v4998_v40 = vadd.f32 %v9668_v28, %v7648_v0 }
 0x290   :  { %v4990_v12 = vadd.f32 %v9668_v28, %v4989_v5  ;;  %v7649_v13 = vpop.f32.mrb[206].mxu1  ;;  %v4631_v3 = vpop.f32.mrb[207].mxu0  ;;  %v4748_v22 = vadd.f32 %v4747_v9, %v4717_v18  ;;  %v5109_v23 = vadd.f32 %v5108_v11, %v5078_v8  ;;  %v4640_v34 = vadd.f32 %v9668_v28, %v7601_v7 }
 0x291   :  { %v4719_v19 = vmax.f32 %v4629_v4, 0.0  ;;  %v4992_v21 = vpop.f32.mrb[207].mxu1  ;;  %v4632_v25 = vadd.f32 %v9668_v28, %v4631_v3  ;;  %v5001_v35 = vadd.f32 %v9668_v28, %v7649_v13  ;;  %v4721_v41 = vmax.f32 %v4637_v26, 0.0 }
 0x292   :  { %v5080_v24 = vmax.f32 %v4990_v12, 0.0  ;;  %v4993_v27 = vadd.f32 %v9668_v28, %v4992_v21  ;;  %v4749_v30 = vadd.f32 %v4748_v22, %v4718_v15  ;;  %v5110_v31 = vadd.f32 %v5109_v23, %v5079_v16 }
 0x293   :  { %v4720_v33 = vmax.f32 %v4632_v25, 0.0  ;;  %v5082_v44 = vmax.f32 %v4998_v40, 0.0  ;;  %v4722_v10 = vmax.f32 %v4640_v34, 0.0  ;;  %v5083_v37 = vmax.f32 %v5001_v35, 0.0 }
 0x294   :  { %v5081_v17 = vmax.f32 %v4993_v27, 0.0  ;;  %v4750_v36 = vadd.f32 %v4749_v30, %v4719_v19  ;;  %v5111_v42 = vadd.f32 %v5110_v31, %v5080_v24 }
 0x295   :  { %v7604_v32 = vpop.f32.mrb[208].mxu0 }
 0x296   :  { %v7652_v38 = vpop.f32.mrb[208].mxu1  ;;  %v4644_v39 = vpop.f32.mrb[209].mxu0  ;;  %v4751_v45 = vadd.f32 %v4750_v36, %v4720_v33  ;;  %v5112_v46 = vadd.f32 %v5111_v42, %v5081_v17  ;;  %v4653_v56 = vadd.f32 %v9668_v28, %v7604_v32 }
 0x297   :  { %v4645_v43 = vadd.f32 %v9668_v28, %v4644_v39  ;;  %v5005_v6 = vpop.f32.mrb[209].mxu1  ;;  %v7605_v57 = vpop.f32.mrb[210].mxu0  ;;  %v5014_v59 = vadd.f32 %v9668_v28, %v7652_v38 }
 0x298   :  { %v5006_v47 = vadd.f32 %v9668_v28, %v5005_v6  ;;  %v7653_v48 = vpop.f32.mrb[210].mxu1  ;;  %v4647_v49 = vpop.f32.mrb[211].mxu0  ;;  %v4752_v52 = vadd.f32 %v4751_v45, %v4721_v41  ;;  %v5113_v53 = vadd.f32 %v5112_v46, %v5082_v44  ;;  %v4656_v63 = vadd.f32 %v9668_v28, %v7605_v57 }
 0x299   :  { %v4723_v50 = vmax.f32 %v4645_v43, 0.0  ;;  %v5008_v51 = vpop.f32.mrb[211].mxu1  ;;  %v4648_v55 = vadd.f32 %v9668_v28, %v4647_v49  ;;  %v5017_v1 = vadd.f32 %v9668_v28, %v7653_v48  ;;  %v4725_v4 = vmax.f32 %v4653_v56, 0.0 }
 0x29a   :  { %v5084_v54 = vmax.f32 %v5006_v47, 0.0  ;;  %v5009_v58 = vadd.f32 %v9668_v28, %v5008_v51  ;;  %v4753_v60 = vadd.f32 %v4752_v52, %v4722_v10  ;;  %v5114_v14 = vadd.f32 %v5113_v53, %v5083_v37 }
 0x29b   :  { %v4724_v61 = vmax.f32 %v4648_v55, 0.0  ;;  %v5086_v9 = vmax.f32 %v5014_v59, 0.0  ;;  %v4726_v16 = vmax.f32 %v4656_v63, 0.0  ;;  %v5087_v19 = vmax.f32 %v5017_v1, 0.0 }
 0x29c   :  { %v5085_v29 = vmax.f32 %v5009_v58, 0.0  ;;  %v4754_v62 = vadd.f32 %v4753_v60, %v4723_v50  ;;  %v5115_v0 = vadd.f32 %v5114_v14, %v5084_v54 }
 0x29d   :  { %v7608_v20 = vpop.f32.mrb[212].mxu0 }
 0x29e   :  { %v7656_v2 = vpop.f32.mrb[212].mxu1  ;;  %v4660_v18 = vpop.f32.mrb[213].mxu0  ;;  %v4755_v11 = vadd.f32 %v4754_v62, %v4724_v61  ;;  %v5116_v12 = vadd.f32 %v5115_v0, %v5085_v29  ;;  %v4669_v27 = vadd.f32 %v9668_v28, %v7608_v20 }
 0x29f   :  { %v4661_v5 = vadd.f32 %v9668_v28, %v4660_v18  ;;  %v5021_v7 = vpop.f32.mrb[213].mxu1  ;;  %v7609_v8 = vpop.f32.mrb[214].mxu0  ;;  %v5030_v30 = vadd.f32 %v9668_v28, %v7656_v2 }
 0x2a0   :  { %v5022_v13 = vadd.f32 %v9668_v28, %v5021_v7  ;;  %v7657_v3 = vpop.f32.mrb[214].mxu1  ;;  %v4663_v15 = vpop.f32.mrb[215].mxu0  ;;  %v4756_v23 = vadd.f32 %v4755_v11, %v4725_v4  ;;  %v5117_v24 = vadd.f32 %v5116_v12, %v5086_v9  ;;  %v4672_v35 = vadd.f32 %v9668_v28, %v7609_v8 }
 0x2a1   :  { %v4727_v21 = vmax.f32 %v4661_v5, 0.0  ;;  %v5024_v22 = vpop.f32.mrb[215].mxu1  ;;  %v4664_v26 = vadd.f32 %v9668_v28, %v4663_v15  ;;  %v5033_v17 = vadd.f32 %v9668_v28, %v7657_v3  ;;  %v4729_v43 = vmax.f32 %v4669_v27, 0.0 }
 0x2a2   :  { %v5088_v25 = vmax.f32 %v5022_v13, 0.0  ;;  %v5025_v40 = vadd.f32 %v9668_v28, %v5024_v22  ;;  %v4757_v31 = vadd.f32 %v4756_v23, %v4726_v16  ;;  %v5118_v33 = vadd.f32 %v5117_v24, %v5087_v19 }
 0x2a3   :  { %v4728_v34 = vmax.f32 %v4664_v26, 0.0  ;;  %v5090_v45 = vmax.f32 %v5030_v30, 0.0  ;;  %v4730_v37 = vmax.f32 %v4672_v35, 0.0  ;;  %v5091_v50 = vmax.f32 %v5033_v17, 0.0 }
 0x2a4   :  { %v5089_v32 = vmax.f32 %v5025_v40, 0.0  ;;  %v4758_v42 = vadd.f32 %v4757_v31, %v4727_v21  ;;  %v5119_v38 = vadd.f32 %v5118_v33, %v5088_v25 }
 0x2a5   :  { %v7612_v36 = vpop.f32.mrb[216].mxu0 }
 0x2a6   :  { %v7660_v39 = vpop.f32.mrb[216].mxu1  ;;  %v4676_v41 = vpop.f32.mrb[217].mxu0  ;;  %v4759_v46 = vadd.f32 %v4758_v42, %v4728_v34  ;;  %v5120_v47 = vadd.f32 %v5119_v38, %v5089_v32  ;;  %v4685_v58 = vadd.f32 %v9668_v28, %v7612_v36 }
 0x2a7   :  { %v4677_v6 = vadd.f32 %v9668_v28, %v4676_v41  ;;  %v5037_v57 = vpop.f32.mrb[217].mxu1  ;;  %v7613_v44 = vpop.f32.mrb[218].mxu0  ;;  %v5046_v60 = vadd.f32 %v9668_v28, %v7660_v39 }
 0x2a8   :  { %v5038_v48 = vadd.f32 %v9668_v28, %v5037_v57  ;;  %v7661_v49 = vpop.f32.mrb[218].mxu1  ;;  %v4679_v10 = vpop.f32.mrb[219].mxu0  ;;  %v4760_v53 = vadd.f32 %v4759_v46, %v4729_v43  ;;  %v5121_v54 = vadd.f32 %v5120_v47, %v5090_v45  ;;  %v4688_v1 = vadd.f32 %v9668_v28, %v7613_v44 }
 0x2a9   :  { %v4731_v51 = vmax.f32 %v4677_v6, 0.0  ;;  %v5040_v52 = vpop.f32.mrb[219].mxu1  ;;  %v4680_v56 = vadd.f32 %v9668_v28, %v4679_v10  ;;  %v5049_v29 = vadd.f32 %v9668_v28, %v7661_v49  ;;  %v4733_v5 = vmax.f32 %v4685_v58, 0.0 }
 0x2aa   :  { %v5092_v55 = vmax.f32 %v5038_v48, 0.0  ;;  %v5041_v59 = vadd.f32 %v9668_v28, %v5040_v52  ;;  %v4761_v14 = vadd.f32 %v4760_v53, %v4730_v37  ;;  %v5122_v61 = vadd.f32 %v5121_v54, %v5091_v50 }
 0x2ab   :  { %v4732_v63 = vmax.f32 %v4680_v56, 0.0  ;;  %v5094_v11 = vmax.f32 %v5046_v60, 0.0  ;;  %v4734_v19 = vmax.f32 %v4688_v1, 0.0  ;;  %v5095_v21 = vmax.f32 %v5049_v29, 0.0 }
 0x2ac   :  { %v5093_v20 = vmax.f32 %v5041_v59, 0.0  ;;  %v4762_v0 = vadd.f32 %v4761_v14, %v4731_v51  ;;  %v5123_v2 = vadd.f32 %v5122_v61, %v5092_v55 }
 0x2ad   :  { %v7616_v62 = vpop.f32.mrb[220].mxu0 }
 0x2ae   :  { %v7664_v18 = vpop.f32.mrb[220].mxu1  ;;  %v4692_v4 = vpop.f32.mrb[221].mxu0  ;;  %v4763_v12 = vadd.f32 %v4762_v0, %v4732_v63  ;;  %v5124_v13 = vadd.f32 %v5123_v2, %v5093_v20  ;;  %v4701_v40 = vadd.f32 %v9668_v28, %v7616_v62 }
 0x2af   :  { %v4693_v7 = vadd.f32 %v9668_v28, %v4692_v4  ;;  %v5053_v8 = vpop.f32.mrb[221].mxu1  ;;  %v7617_v9 = vpop.f32.mrb[222].mxu0  ;;  %v5062_v31 = vadd.f32 %v9668_v28, %v7664_v18 }
 0x2b0   :  { %v5054_v3 = vadd.f32 %v9668_v28, %v5053_v8  ;;  %v7665_v15 = vpop.f32.mrb[222].mxu1  ;;  %v4695_v16 = vpop.f32.mrb[223].mxu0  ;;  %v4764_v24 = vadd.f32 %v4763_v12, %v4733_v5  ;;  %v5125_v25 = vadd.f32 %v5124_v13, %v5094_v11  ;;  %v4704_v17 = vadd.f32 %v9668_v28, %v7617_v9 }
 0x2b1   :  { %v4735_v22 = vmax.f32 %v4693_v7, 0.0  ;;  %v5056_v23 = vpop.f32.mrb[223].mxu1  ;;  %v4696_v27 = vadd.f32 %v9668_v28, %v4695_v16  ;;  %v5065_v32 = vadd.f32 %v9668_v28, %v7665_v15  ;;  %v4737_v45 = vmax.f32 %v4701_v40, 0.0 }
 0x2b2   :  { %v5096_v26 = vmax.f32 %v5054_v3, 0.0  ;;  %v5057_v30 = vadd.f32 %v9668_v28, %v5056_v23  ;;  %v4765_v33 = vadd.f32 %v4764_v24, %v4734_v19  ;;  %v5126_v34 = vadd.f32 %v5125_v25, %v5095_v21 }
 0x2b3   :  { %v4736_v35 = vmax.f32 %v4696_v27, 0.0  ;;  %v5098_v46 = vmax.f32 %v5062_v31, 0.0  ;;  %v4738_v37 = vmax.f32 %v4704_v17, 0.0  ;;  %v5099_v50 = vmax.f32 %v5065_v32, 0.0 }
 0x2b4   :  { %v5097_v36 = vmax.f32 %v5057_v30, 0.0  ;;  %v4766_v38 = vadd.f32 %v4765_v33, %v4735_v22  ;;  %v5127_v39 = vadd.f32 %v5126_v34, %v5096_v26 }
 0x2b5   :  { %v7684_v42 = vpop.f32.mrb[224].mxu0 }
 0x2b6   :  { %v7732_v41 = vpop.f32.mrb[224].mxu1  ;;  %v5302_v43 = vpop.f32.mrb[225].mxu0  ;;  %v4767_v47 = vadd.f32 %v4766_v38, %v4736_v35  ;;  %v5128_v48 = vadd.f32 %v5127_v39, %v5097_v36  ;;  %v5311_v55 = vadd.f32 %v9668_v28, %v7684_v42 }
 0x2b7   :  { %v5303_v6 = vadd.f32 %v9668_v28, %v5302_v43  ;;  %v5663_v57 = vpop.f32.mrb[225].mxu1  ;;  %v7685_v44 = vpop.f32.mrb[226].mxu0  ;;  %v5672_v58 = vadd.f32 %v9668_v28, %v7732_v41 }
 0x2b8   :  { %v7733_v49 = vpop.f32.mrb[226].mxu1  ;;  %v5305_v10 = vpop.f32.mrb[227].mxu0  ;;  %v5664_v51 = vadd.f32 %v9668_v28, %v5663_v57  ;;  %v4768_v53 = vadd.f32 %v4767_v47, %v4737_v45  ;;  %v5129_v54 = vadd.f32 %v5128_v48, %v5098_v46  ;;  %v5314_v63 = vadd.f32 %v9668_v28, %v7685_v44 }
 0x2b9   :  { %v5666_v52 = vpop.f32.mrb[227].mxu1  ;;  %v5306_v56 = vadd.f32 %v9668_v28, %v5305_v10  ;;  %v5429_v59 = vmax.f32 %v5303_v6, 0.0  ;;  %v5675_v20 = vadd.f32 %v9668_v28, %v7733_v49  ;;  %v5431_v4 = vmax.f32 %v5311_v55, 0.0 }
 0x2ba   :  { %v5667_v60 = vadd.f32 %v9668_v28, %v5666_v52  ;;  %v4769_v14 = vadd.f32 %v4768_v53, %v4738_v37  ;;  %v5130_v61 = vadd.f32 %v5129_v54, %v5099_v50  ;;  %v5790_v29 = vmax.f32 %v5664_v51, 0.0 }
 0x2bb   :  { %v5430_v1 = vmax.f32 %v5306_v56, 0.0  ;;  %v5792_v9 = vmax.f32 %v5672_v58, 0.0  ;;  %v5432_v19 = vmax.f32 %v5314_v63, 0.0  ;;  %v5793_v24 = vmax.f32 %v5675_v20, 0.0 }
 0x2bc   :  { %v5791_v62 = vmax.f32 %v5667_v60, 0.0  ;;  %v4770_v2 = vrot.slane %v4769_v14, 4  ;;  %v5131_v18 = vrot.slane %v5130_v61, 4 }
 0x2bd   :  { %v7688_v0 = vpop.f32.mrb[228].mxu0  ;;  %v5461_v5 = vadd.f32 %v5430_v1, %v5429_v59 }
 0x2be   :  { %v7736_v7 = vpop.f32.mrb[228].mxu1  ;;  %v5318_v8 = vpop.f32.mrb[229].mxu0  ;;  %v5822_v11 = vadd.f32 %v5791_v62, %v5790_v29  ;;  %v4771_v15 = vadd.f32 %v4770_v2, %v4769_v14  ;;  %v5132_v16 = vadd.f32 %v5131_v18, %v5130_v61  ;;  %v5327_v34 = vadd.f32 %v9668_v28, %v7688_v0 }
 0x2bf   :  { %v5319_v12 = vadd.f32 %v9668_v28, %v5318_v8  ;;  %v5679_v13 = vpop.f32.mrb[229].mxu1  ;;  %v7689_v3 = vpop.f32.mrb[230].mxu0  ;;  %v5462_v21 = vadd.f32 %v5461_v5, %v5431_v4  ;;  %v5688_v38 = vadd.f32 %v9668_v28, %v7736_v7 }
 0x2c0   :  { %v7737_v22 = vpop.f32.mrb[230].mxu1  ;;  %v5321_v23 = vpop.f32.mrb[231].mxu0  ;;  %v5823_v25 = vadd.f32 %v5822_v11, %v5792_v9  ;;  %v5680_v27 = vadd.f32 %v9668_v28, %v5679_v13  ;;  %v4772_v30 = vrot.slane %v4771_v15, 2  ;;  %v5133_v31 = vrot.slane %v5132_v16, 2 }
 0x2c1   :  { %v5433_v26 = vmax.f32 %v5319_v12, 0.0  ;;  %v5682_v40 = vpop.f32.mrb[231].mxu1  ;;  %v5463_v33 = vadd.f32 %v5462_v21, %v5432_v19  ;;  %v5322_v32 = vadd.f32 %v9668_v28, %v5321_v23  ;;  %v5330_v43 = vadd.f32 %v9668_v28, %v7689_v3 }
 0x2c2   :  { %v5794_v35 = vmax.f32 %v5680_v27, 0.0  ;;  %v5824_v17 = vadd.f32 %v5823_v25, %v5793_v24  ;;  %v4773_v36 = vadd.f32 %v4772_v30, %v4771_v15  ;;  %v5134_v42 = vadd.f32 %v5133_v31, %v5132_v16 }
 0x2c3   :  { %v5464_v39 = vadd.f32 %v5463_v33, %v5433_v26  ;;  %v5434_v6 = vmax.f32 %v5322_v32, 0.0  ;;  %v5683_v57 = vadd.f32 %v9668_v28, %v5682_v40  ;;  %v5691_v47 = vadd.f32 %v9668_v28, %v7737_v22 }
 0x2c4   :  { %v5825_v41 = vadd.f32 %v5824_v17, %v5794_v35  ;;  %v4774_v45 = vrot.slane %v4773_v36, 1  ;;  %v5135_v46 = vrot.slane %v5134_v42, 1  ;;  %v5435_v10 = vmax.f32 %v5327_v34, 0.0 }
 0x2c5   :  { %v7692_v44 = vpop.f32.mrb[232].mxu0  ;;  %v5465_v37 = vadd.f32 %v5464_v39, %v5434_v6  ;;  %v5795_v50 = vmax.f32 %v5683_v57, 0.0  ;;  %v5796_v56 = vmax.f32 %v5688_v38, 0.0  ;;  %v5436_v14 = vmax.f32 %v5330_v43, 0.0 }
 0x2c6   :  { %v7740_v48 = vpop.f32.mrb[232].mxu1  ;;  %v5334_v49 = vpop.f32.mrb[233].mxu0  ;;  %v4775_v54 = vadd.f32 %v4774_v45, %v4773_v36  ;;  %v5136_v55 = vadd.f32 %v5135_v46, %v5134_v42  ;;  %v5797_v0 = vmax.f32 %v5691_v47, 0.0  ;;  %v5343_v2 = vadd.f32 %v9668_v28, %v7692_v44 }
 0x2c7   :  { %v5335_v51 = vadd.f32 %v9668_v28, %v5334_v49  ;;  %v5695_v52 = vpop.f32.mrb[233].mxu1  ;;  %v7693_v53 = vpop.f32.mrb[234].mxu0  ;;  %v5466_v61 = vadd.f32 %v5465_v37, %v5435_v10  ;;  %v5826_v63 = vadd.f32 %v5825_v41, %v5795_v50  ;;  %v5704_v8 = vadd.f32 %v9668_v28, %v7740_v48 }
 0x2c8   :  { %v5696_v58 = vadd.f32 %v9668_v28, %v5695_v52  ;;  %v7741_v59 = vpop.f32.mrb[234].mxu1  ;;  %v5337_v60 = vpop.f32.mrb[235].mxu0  ;;  %v4776_v20 = vmul.f32 0.00390625, %v4775_v54  ;;  %v5137_v62 = vmul.f32 0.00390625, %v5136_v55  ;;  %v5346_v13 = vadd.f32 %v9668_v28, %v7693_v53 }
 0x2c9   :  { %v5437_v1 = vmax.f32 %v5335_v51, 0.0  ;;  %v5698_v29 = vpop.f32.mrb[235].mxu1  ;;  %v5827_v18 = vadd.f32 %v5826_v63, %v5796_v56  ;;  %v5467_v4 = vadd.f32 %v5466_v61, %v5436_v14  ;;  %v5338_v7 = vadd.f32 %v9668_v28, %v5337_v60 }
 0x2ca   :  { %v5798_v5 = vmax.f32 %v5696_v58, 0.0  ;;  %4777 = vst [vmem:[%s9804_s3 + $0xc] sm:$0x1] %v4776_v20  ;;  %5138 = vst [vmem:[%s9804_s3 + $0xd] sm:$0x1] %v5137_v62  ;;  %v5699_v9 = vadd.f32 %v9668_v28, %v5698_v29  ;;  %v5707_v16 = vadd.f32 %v9668_v28, %v7741_v59  ;;  %v5439_v23 = vmax.f32 %v5343_v2, 0.0 }
 0x2cb   :  { %v5468_v11 = vadd.f32 %v5467_v4, %v5437_v1  ;;  %v5828_v12 = vadd.f32 %v5827_v18, %v5797_v0  ;;  %v5438_v3 = vmax.f32 %v5338_v7, 0.0  ;;  %v5800_v30 = vmax.f32 %v5704_v8, 0.0 }
 0x2cc   :  { %v5799_v19 = vmax.f32 %v5699_v9, 0.0  ;;  %v5440_v35 = vmax.f32 %v5346_v13, 0.0  ;;  %v5801_v38 = vmax.f32 %v5707_v16, 0.0 }
 0x2cd   :  { %v7696_v15 = vpop.f32.mrb[236].mxu0  ;;  %v5829_v24 = vadd.f32 %v5828_v12, %v5798_v5  ;;  %v5469_v25 = vadd.f32 %v5468_v11, %v5438_v3 }
 0x2ce   :  { %v7744_v21 = vpop.f32.mrb[236].mxu1  ;;  %v5350_v22 = vpop.f32.mrb[237].mxu0  ;;  %v5359_v39 = vadd.f32 %v9668_v28, %v7696_v15 }
 0x2cf   :  { %v5351_v26 = vadd.f32 %v9668_v28, %v5350_v22  ;;  %v5711_v27 = vpop.f32.mrb[237].mxu1  ;;  %v7697_v40 = vpop.f32.mrb[238].mxu0  ;;  %v5470_v17 = vadd.f32 %v5469_v25, %v5439_v23  ;;  %v5830_v32 = vadd.f32 %v5829_v24, %v5799_v19  ;;  %v5720_v45 = vadd.f32 %v9668_v28, %v7744_v21 }
 0x2d0   :  { %v5712_v31 = vadd.f32 %v9668_v28, %v5711_v27  ;;  %v7745_v33 = vpop.f32.mrb[238].mxu1  ;;  %v5353_v34 = vpop.f32.mrb[239].mxu0  ;;  %v5362_v49 = vadd.f32 %v9668_v28, %v7697_v40  ;;  %v5443_v53 = vmax.f32 %v5359_v39, 0.0 }
 0x2d1   :  { %v5441_v36 = vmax.f32 %v5351_v26, 0.0  ;;  %v5714_v42 = vpop.f32.mrb[239].mxu1  ;;  %v5354_v41 = vadd.f32 %v9668_v28, %v5353_v34  ;;  %v5831_v43 = vadd.f32 %v5830_v32, %v5800_v30  ;;  %v5471_v6 = vadd.f32 %v5470_v17, %v5440_v35 }
 0x2d2   :  { %v5802_v57 = vmax.f32 %v5712_v31, 0.0  ;;  %v5715_v44 = vadd.f32 %v9668_v28, %v5714_v42  ;;  %v5723_v50 = vadd.f32 %v9668_v28, %v7745_v33  ;;  %v5804_v60 = vmax.f32 %v5720_v45, 0.0 }
 0x2d3   :  { %v5442_v46 = vmax.f32 %v5354_v41, 0.0  ;;  %v5472_v47 = vadd.f32 %v5471_v6, %v5441_v36  ;;  %v5832_v48 = vadd.f32 %v5831_v43, %v5801_v38  ;;  %v5444_v1 = vmax.f32 %v5362_v49, 0.0 }
 0x2d4   :  { %v5803_v10 = vmax.f32 %v5715_v44, 0.0  ;;  %v5805_v2 = vmax.f32 %v5723_v50, 0.0 }
 0x2d5   :  { %v7700_v37 = vpop.f32.mrb[240].mxu0  ;;  %v5833_v54 = vadd.f32 %v5832_v48, %v5802_v57  ;;  %v5473_v55 = vadd.f32 %v5472_v47, %v5442_v46 }
 0x2d6   :  { %v7748_v51 = vpop.f32.mrb[240].mxu1  ;;  %v5366_v52 = vpop.f32.mrb[241].mxu0  ;;  %v5375_v18 = vadd.f32 %v9668_v28, %v7700_v37 }
 0x2d7   :  { %v5367_v56 = vadd.f32 %v9668_v28, %v5366_v52  ;;  %v5727_v58 = vpop.f32.mrb[241].mxu1  ;;  %v7701_v59 = vpop.f32.mrb[242].mxu0  ;;  %v5474_v29 = vadd.f32 %v5473_v55, %v5443_v53  ;;  %v5834_v20 = vadd.f32 %v5833_v54, %v5803_v10  ;;  %v5736_v11 = vadd.f32 %v9668_v28, %v7748_v51 }
 0x2d8   :  { %v5728_v14 = vadd.f32 %v9668_v28, %v5727_v58  ;;  %v7749_v61 = vpop.f32.mrb[242].mxu1  ;;  %v5369_v63 = vpop.f32.mrb[243].mxu0  ;;  %v5378_v15 = vadd.f32 %v9668_v28, %v7701_v59  ;;  %v5447_v24 = vmax.f32 %v5375_v18, 0.0 }
 0x2d9   :  { %v5445_v62 = vmax.f32 %v5367_v56, 0.0  ;;  %v5730_v0 = vpop.f32.mrb[243].mxu1  ;;  %v5370_v4 = vadd.f32 %v9668_v28, %v5369_v63  ;;  %v5835_v5 = vadd.f32 %v5834_v20, %v5804_v60  ;;  %v5475_v7 = vadd.f32 %v5474_v29, %v5444_v1 }
 0x2da   :  { %v5806_v8 = vmax.f32 %v5728_v14, 0.0  ;;  %v5731_v9 = vadd.f32 %v9668_v28, %v5730_v0  ;;  %v5739_v21 = vadd.f32 %v9668_v28, %v7749_v61  ;;  %v5808_v31 = vmax.f32 %v5736_v11, 0.0 }
 0x2db   :  { %v5446_v12 = vmax.f32 %v5370_v4, 0.0  ;;  %v5476_v13 = vadd.f32 %v5475_v7, %v5445_v62  ;;  %v5836_v3 = vadd.f32 %v5835_v5, %v5805_v2  ;;  %v5448_v17 = vmax.f32 %v5378_v15, 0.0 }
 0x2dc   :  { %v5807_v16 = vmax.f32 %v5731_v9, 0.0  ;;  %v5809_v39 = vmax.f32 %v5739_v21, 0.0 }
 0x2dd   :  { %v7704_v19 = vpop.f32.mrb[244].mxu0  ;;  %v5837_v25 = vadd.f32 %v5836_v3, %v5806_v8  ;;  %v5477_v26 = vadd.f32 %v5476_v13, %v5446_v12 }
 0x2de   :  { %v7752_v22 = vpop.f32.mrb[244].mxu1  ;;  %v5382_v23 = vpop.f32.mrb[245].mxu0  ;;  %v5391_v41 = vadd.f32 %v9668_v28, %v7704_v19 }
 0x2df   :  { %v5383_v27 = vadd.f32 %v9668_v28, %v5382_v23  ;;  %v5743_v40 = vpop.f32.mrb[245].mxu1  ;;  %v7705_v30 = vpop.f32.mrb[246].mxu0  ;;  %v5478_v32 = vadd.f32 %v5477_v26, %v5447_v24  ;;  %v5838_v36 = vadd.f32 %v5837_v25, %v5807_v16  ;;  %v5752_v46 = vadd.f32 %v9668_v28, %v7752_v22 }
 0x2e0   :  { %v5744_v33 = vadd.f32 %v9668_v28, %v5743_v40  ;;  %v7753_v34 = vpop.f32.mrb[246].mxu1  ;;  %v5385_v35 = vpop.f32.mrb[247].mxu0  ;;  %v5394_v10 = vadd.f32 %v9668_v28, %v7705_v30  ;;  %v5451_v54 = vmax.f32 %v5391_v41, 0.0 }
 0x2e1   :  { %v5449_v42 = vmax.f32 %v5383_v27, 0.0  ;;  %v5746_v38 = vpop.f32.mrb[247].mxu1  ;;  %v5386_v43 = vadd.f32 %v9668_v28, %v5385_v35  ;;  %v5839_v6 = vadd.f32 %v5838_v36, %v5808_v31  ;;  %v5479_v57 = vadd.f32 %v5478_v32, %v5448_v17 }
 0x2e2   :  { %v5810_v44 = vmax.f32 %v5744_v33, 0.0  ;;  %v5747_v45 = vadd.f32 %v9668_v28, %v5746_v38  ;;  %v5755_v51 = vadd.f32 %v9668_v28, %v7753_v34  ;;  %v5812_v14 = vmax.f32 %v5752_v46, 0.0 }
 0x2e3   :  { %v5450_v47 = vmax.f32 %v5386_v43, 0.0  ;;  %v5480_v48 = vadd.f32 %v5479_v57, %v5449_v42  ;;  %v5840_v49 = vadd.f32 %v5839_v6, %v5809_v39  ;;  %v5452_v29 = vmax.f32 %v5394_v10, 0.0 }
 0x2e4   :  { %v5811_v37 = vmax.f32 %v5747_v45, 0.0  ;;  %v5813_v18 = vmax.f32 %v5755_v51, 0.0 }
 0x2e5   :  { %v7708_v50 = vpop.f32.mrb[248].mxu0  ;;  %v5841_v55 = vadd.f32 %v5840_v49, %v5810_v44  ;;  %v5481_v56 = vadd.f32 %v5480_v48, %v5450_v47 }
 0x2e6   :  { %v7756_v52 = vpop.f32.mrb[248].mxu1  ;;  %v5398_v53 = vpop.f32.mrb[249].mxu0  ;;  %v5407_v4 = vadd.f32 %v9668_v28, %v7708_v50 }
 0x2e7   :  { %v5399_v58 = vadd.f32 %v9668_v28, %v5398_v53  ;;  %v5759_v59 = vpop.f32.mrb[249].mxu1  ;;  %v7709_v60 = vpop.f32.mrb[250].mxu0  ;;  %v5482_v20 = vadd.f32 %v5481_v56, %v5451_v54  ;;  %v5842_v62 = vadd.f32 %v5841_v55, %v5811_v37  ;;  %v5768_v12 = vadd.f32 %v9668_v28, %v7756_v52 }
 0x2e8   :  { %v5760_v61 = vadd.f32 %v9668_v28, %v5759_v59  ;;  %v7757_v63 = vpop.f32.mrb[250].mxu1  ;;  %v5401_v1 = vpop.f32.mrb[251].mxu0  ;;  %v5410_v16 = vadd.f32 %v9668_v28, %v7709_v60  ;;  %v5455_v25 = vmax.f32 %v5407_v4, 0.0 }
 0x2e9   :  { %v5453_v0 = vmax.f32 %v5399_v58, 0.0  ;;  %v5762_v2 = vpop.f32.mrb[251].mxu1  ;;  %v5402_v5 = vadd.f32 %v9668_v28, %v5401_v1  ;;  %v5843_v7 = vadd.f32 %v5842_v62, %v5812_v14  ;;  %v5483_v8 = vadd.f32 %v5482_v20, %v5452_v29 }
 0x2ea   :  { %v5814_v9 = vmax.f32 %v5760_v61, 0.0  ;;  %v5763_v11 = vadd.f32 %v9668_v28, %v5762_v2  ;;  %v5771_v22 = vadd.f32 %v9668_v28, %v7757_v63  ;;  %v5816_v33 = vmax.f32 %v5768_v12, 0.0 }
 0x2eb   :  { %v5454_v13 = vmax.f32 %v5402_v5, 0.0  ;;  %v5484_v3 = vadd.f32 %v5483_v8, %v5453_v0  ;;  %v5844_v15 = vadd.f32 %v5843_v7, %v5813_v18  ;;  %v5456_v32 = vmax.f32 %v5410_v16, 0.0 }
 0x2ec   :  { %v5815_v19 = vmax.f32 %v5763_v11, 0.0  ;;  %v5817_v41 = vmax.f32 %v5771_v22, 0.0 }
 0x2ed   :  { %v7712_v21 = vpop.f32.mrb[252].mxu0  ;;  %v5845_v26 = vadd.f32 %v5844_v15, %v5814_v9  ;;  %v5485_v27 = vadd.f32 %v5484_v3, %v5454_v13 }
 0x2ee   :  { %v7760_v23 = vpop.f32.mrb[252].mxu1  ;;  %v5414_v24 = vpop.f32.mrb[253].mxu0  ;;  %v5423_v43 = vadd.f32 %v9668_v28, %v7712_v21 }
 0x2ef   :  { %v5415_v40 = vadd.f32 %v9668_v28, %v5414_v24  ;;  %v5775_v30 = vpop.f32.mrb[253].mxu1  ;;  %v7713_v31 = vpop.f32.mrb[254].mxu0  ;;  %v5486_v36 = vadd.f32 %v5485_v27, %v5455_v25  ;;  %v5846_v42 = vadd.f32 %v5845_v26, %v5815_v19  ;;  %v5784_v47 = vadd.f32 %v9668_v28, %v7760_v23 }
 0x2f0   :  { %v5776_v34 = vadd.f32 %v9668_v28, %v5775_v30  ;;  %v7761_v35 = vpop.f32.mrb[254].mxu1  ;;  %v5417_v17 = vpop.f32.mrb[255].mxu0  ;;  %v5426_v37 = vadd.f32 %v9668_v28, %v7713_v31  ;;  %v5459_v51 = vmax.f32 %v5423_v43, 0.0 }
 0x2f1   :  { %v5457_v38 = vmax.f32 %v5415_v40, 0.0  ;;  %v5778_v39 = vpop.f32.mrb[255].mxu1  ;;  %v5418_v6 = vadd.f32 %v9668_v28, %v5417_v17  ;;  %v5847_v57 = vadd.f32 %v5846_v42, %v5816_v33  ;;  %v5487_v44 = vadd.f32 %v5486_v36, %v5456_v32 }
 0x2f2   :  { %v5818_v45 = vmax.f32 %v5776_v34, 0.0  ;;  %v5779_v46 = vadd.f32 %v9668_v28, %v5778_v39  ;;  %v5787_v53 = vadd.f32 %v9668_v28, %v7761_v35  ;;  %v5820_v55 = vmax.f32 %v5784_v47, 0.0 }
 0x2f3   :  { %v5458_v48 = vmax.f32 %v5418_v6, 0.0  ;;  %v5488_v49 = vadd.f32 %v5487_v44, %v5457_v38  ;;  %v5848_v10 = vadd.f32 %v5847_v57, %v5817_v41  ;;  %v5460_v56 = vmax.f32 %v5426_v37, 0.0 }
 0x2f4   :  { %v5819_v50 = vmax.f32 %v5779_v46, 0.0  ;;  %v5821_v60 = vmax.f32 %v5787_v53, 0.0 }
 0x2f5   :  { %v5849_v52 = vadd.f32 %v5848_v10, %v5818_v45  ;;  %v5489_v54 = vadd.f32 %v5488_v49, %v5458_v48 }
 0x2f7   :  { %v5490_v58 = vadd.f32 %v5489_v54, %v5459_v51  ;;  %v5850_v59 = vadd.f32 %v5849_v52, %v5819_v50 }
 0x2f9   :  { %v5491_v14 = vadd.f32 %v5490_v58, %v5460_v56  ;;  %v5851_v61 = vadd.f32 %v5850_v59, %v5820_v55 }
 0x2fb   :  { %v5492_v63 = vrot.slane %v5491_v14, 4  ;;  %v5852_v1 = vadd.f32 %v5851_v61, %v5821_v60 }
 0x2fd   :  { %v5493_v29 = vadd.f32 %v5492_v63, %v5491_v14  ;;  %v5853_v20 = vrot.slane %v5852_v1, 4 }
 0x2ff   :  { %v5494_v62 = vrot.slane %v5493_v29, 2  ;;  %v5854_v0 = vadd.f32 %v5853_v20, %v5852_v1 }
 0x301   :  { %v5495_v2 = vadd.f32 %v5494_v62, %v5493_v29  ;;  %v5855_v18 = vrot.slane %v5854_v0, 2 }
 0x303   :  { %v5496_v4 = vrot.slane %v5495_v2, 1  ;;  %v5856_v5 = vadd.f32 %v5855_v18, %v5854_v0 }
 0x305   :  { %v5497_v7 = vadd.f32 %v5496_v4, %v5495_v2  ;;  %v5857_v28 = vrot.slane %v5856_v5, 1 }
 0x307   :  { %v5498_v8 = vmul.f32 0.00390625, %v5497_v7  ;;  %v5858_v9 = vadd.f32 %v5857_v28, %v5856_v5 }
 0x309   :  { %5499 = vst [vmem:[%s9804_s3 + $0xe] sm:$0x1] %v5498_v8  ;;  %v5859_v11 = vmul.f32 0.00390625, %v5858_v9 }
 0x30b   :  { %5860 = vst [vmem:[%s9804_s3 + $0xf] sm:$0x1] %v5859_v11 }

</bundles_post_ra>
